<compile_context>
chip_gen: v7x
topology: tpu7x:2x2x1
jax: 0.10.0
libtpu: 0.0.40
codegen_flags: <defaults>
</compile_context>

<pallas_src>
import math
import numpy as np
import jax
import jax.numpy as jnp
from jax import lax
from jax.experimental import pallas as pl
from jax.experimental.pallas import tpu as pltpu  # noqa: F401  (kept for parity)

BF16 = jnp.bfloat16
F32 = jnp.float32


def _mm(a, b):
    """MXU matmul: bf16 operands, f32 accumulation."""
    return jnp.dot(a.astype(BF16), b.astype(BF16), preferred_element_type=F32)


def _mm_t(a, b):
    """a @ b.T without materializing the transpose (contract last dims)."""
    return lax.dot_general(a.astype(BF16), b.astype(BF16),
                           dimension_numbers=(((1,), (1,)), ((), ())),
                           preferred_element_type=F32)


# ---------------------------------------------------------------------------
# Single fused kernel: embed -> encode -> `steps` x (self-attn pool + FiLMConv
# + GRUUint_s) -> BiLSTM -> readout attention -> MLP.
# ---------------------------------------------------------------------------
def _make_fused_kernel(N, B, Lmax, E, V, in_dim, D, C, n_steps):
    H = D
    inv_sqrt_d = 1.0 / math.sqrt(D)
    inv_l = 1.0 / float(Lmax)

    def kernel(*refs):
        it = iter(refs)
        nxt = lambda: next(it)
        ids_ref, embed_ref, encwt_ref, encb_ref = nxt(), nxt(), nxt(), nxt()
        msame_ref, g_ref, gt_ref, padn_ref, padb_ref = nxt(), nxt(), nxt(), nxt(), nxt()
        gsrc_ref, gdst_ref, aggr_ref = nxt(), nxt(), nxt()
        ssel_ref, maskv_ref, gpos_ref = nxt(), nxt(), nxt()
        conv_refs = [tuple(nxt() for _ in range(6)) for _ in range(n_steps)]
        wzr_ref, bzr_ref, wash_ref, wxh_ref, bh_ref = nxt(), nxt(), nxt(), nxt(), nxt()
        wihf_ref, whhf_ref, bf_ref = nxt(), nxt(), nxt()
        wihb_ref, whhb_ref, bb_ref = nxt(), nxt(), nxt()
        w3t_ref, b3_ref, wvt_ref, bv_ref, mlpw_ref, mlpb_ref = (
            nxt(), nxt(), nxt(), nxt(), nxt(), nxt())
        o_ref = nxt()

        # ---- embedding gather (in-kernel one-hot @ table) + encode (tanh) ----
        ids = ids_ref[...]                                          # (N, 1) int32
        cols = lax.broadcasted_iota(jnp.int32, (N, V), 1)
        onehot = jnp.where(cols == ids, 1.0, 0.0)                   # (N, V) f32
        x_emb = _mm(onehot, embed_ref[...])                         # (N, in_dim)
        x = jnp.tanh(_mm(x_emb, encwt_ref[...]) + encb_ref[...])    # (N, D) f32

        # graph bookkeeping, loaded once and kept resident
        msame = msame_ref[...]
        padn, padb = padn_ref[...], padb_ref[...]
        gmat, gtmat = g_ref[...], gt_ref[...]
        gsrc, gdst, aggr = gsrc_ref[...], gdst_ref[...], aggr_ref[...]

        # GRUUint_s weights (shared across GNN steps), loaded once
        wzr, bzr = wzr_ref[...], bzr_ref[...]
        wash, wxh, bh = wash_ref[...], wxh_ref[...], bh_ref[...]

        for (fsk_ref, fskb_ref, lsk_ref, lin_ref, film_ref, filmb_ref) in conv_refs:
            xb = x.astype(BF16)

            # --- GraphAT.self_attention over each graph's padded sequence
            #     (pads contribute logit 0 / value 0), then mean over Lmax ->
            #     per-graph sentence vector -> broadcast back to nodes.
            s = _mm_t(xb, xb) * inv_sqrt_d                          # (N, N)
            s_msk = jnp.where(msame > 0.5, s, -1e30)                # mask BEFORE exp
            m = jnp.maximum(jnp.max(s_msk, axis=-1, keepdims=True), 0.0)
            e = jnp.exp(s_msk - m)                                  # cross-graph -> 0
            denom = jnp.sum(e, axis=-1, keepdims=True) + padn * jnp.exp(-m)
            attn = _mm(e, xb) / denom                               # (N, D)
            q = _mm(gmat, attn) * inv_l + padb * _mm(gmat, xb) * (inv_l * inv_l)
            sn = _mm(gtmat, q)                                      # (N, D)

            # --- FiLMConv: skip branch + 4 relations, mean aggregation, ReLU.
            fs = _mm(xb, fsk_ref[...]) + fskb_ref[...]              # (N, 2D)
            beta_s, gamma_s = fs[:, :D], fs[:, D:]
            a = jnp.maximum(gamma_s * _mm(xb, lsk_ref[...]) + beta_s, 0.0)
            wx_all = _mm(xb, lin_ref[...])                          # (N, 4D)
            fg_all = _mm(xb, film_ref[...]) + filmb_ref[...]        # (N, 8D) [betas|gammas]
            wx_src = _mm(gsrc, wx_all)                              # (E, 4D)
            fg_dst = _mm(gdst, fg_all)                              # (E, 8D)
            beta_all, gamma_all = fg_dst[:, :4 * D], fg_dst[:, 4 * D:]
            msg_all = jnp.maximum(gamma_all * wx_src + beta_all, 0.0)  # one (E,4D) pass
            for rel in range(4):
                a = a + _mm(aggr[:, rel * E:(rel + 1) * E],
                            msg_all[:, rel * D:(rel + 1) * D])

            # --- GRUUint_s (act = tanh); gates K-stacked.
            axs = jnp.concatenate([a, x, sn], axis=1)               # (N, 3D)
            zr = jax.nn.sigmoid(_mm(axs, wzr) + bzr)                # (N, 2D)
            z, r = zr[:, :D], zr[:, D:]
            a_sn = jnp.concatenate([a, sn], axis=1)                 # (N, 2D)
            h = jnp.tanh(_mm(a_sn, wash) + _mm(x * r, wxh) + bh)
            x = h * z + x * (1.0 - z)

        # ---- BiLSTM over padded sequences, time-major flattened (row = t*B+b).
        # TODO(synk): on v7x the two directions could be sharded over the second
        # TensorCore via a parallel grid axis; not worth it at this size.
        xseq = _mm(ssel_ref[...], x)                                # (L*B, H), pads = 0

        def run_dir(wih_ref, whh_ref, b_ref, reverse):
            xg = _mm(xseq, wih_ref[...]) + b_ref[...]               # (L*B, 4H)
            whh = whh_ref[...]
            h = jnp.zeros((B, H), F32)
            c = jnp.zeros((B, H), F32)
            outs = [None] * Lmax
            ts = range(Lmax - 1, -1, -1) if reverse else range(Lmax)
            # TODO(synk): switch to lax.fori_loop(unroll=k) for long Lmax to
            # bound vreg live ranges; static unroll is fine at Lmax=6.
            for t in ts:
                gates = xg[t * B:(t + 1) * B, :] + _mm(h, whh)      # (B, 4H)
                i_g = jax.nn.sigmoid(gates[:, 0:H])
                f_g = jax.nn.sigmoid(gates[:, H:2 * H])
                g_g = jnp.tanh(gates[:, 2 * H:3 * H])
                o_g = jax.nn.sigmoid(gates[:, 3 * H:4 * H])
                c = f_g * c + i_g * g_g
                h = o_g * jnp.tanh(c)
                outs[t] = h
            # one lane-dense concatenation per direction (no per-step masked stores)
            return jnp.concatenate(outs, axis=0)                    # (L*B, H)

        out_f = run_dir(wihf_ref, whhf_ref, bf_ref, reverse=False)
        out_b = run_dir(wihb_ref, whhb_ref, bb_ref, reverse=True)
        out = jnp.concatenate([out_f, out_b], axis=1)               # (L*B, 2H)

        # ---- ReadoutLayer attention (per-graph softmax, pads included) + MLP.
        hm = out * maskv_ref[...]
        tt = jnp.tanh(_mm(hm, w3t_ref[...]) + b3_ref[...])
        cs = _mm(tt, wvt_ref[...]) + bv_ref[...]                    # (L*B, 1)
        mshift = jnp.max(cs, axis=0, keepdims=True)                 # shared shift const
        ee = jnp.exp(cs - mshift)
        gpos = gpos_ref[...]
        den = _mm(gpos, ee)                                         # (B, 1)
        att = _mm(gpos, ee * hm) / den                              # (B, 2H)
        o_ref[...] = _mm(att, mlpw_ref[...]) + mlpb_ref[...]        # (B, C)

    return kernel


def _cost_estimate(args, out_shape, N, B, L, E, V, in_dim, D, C, steps):
    mm = lambda m, k, n: 2 * m * k * n
    LB = L * B
    flops = mm(N, V, in_dim) + mm(N, in_dim, D)
    per_step = (mm(N, D, N) + mm(N, N, D) + 2 * mm(B, N, D) + mm(N, B, D)
                + mm(N, D, 2 * D) + mm(N, D, D) + mm(N, D, 4 * D) + mm(N, D, 8 * D)
                + mm(E, N, 4 * D) + mm(E, N, 8 * D) + 4 * mm(N, E, D)
                + mm(N, 3 * D, 2 * D) + mm(N, 2 * D, D) + mm(N, D, D))
    flops += steps * per_step
    flops += (mm(LB, N, D) + 2 * (mm(LB, D, 4 * D) + L * mm(B, D, 4 * D))
              + mm(LB, 2 * D, 2 * D) + mm(LB, 2 * D, 1)
              + 2 * mm(B, LB, 2 * D) + mm(B, 2 * D, C))
    transc = (N * D + steps * (N * N + N + N * 3 * D)
              + 2 * L * 5 * B * D + LB * (2 * D + 1))
    bytes_accessed = sum(int(np.prod(a.shape)) * a.dtype.itemsize for a in args)
    bytes_accessed += int(np.prod(out_shape.shape)) * 4
    return pl.CostEstimate(flops=int(flops), transcendentals=int(transc),
                           bytes_accessed=int(bytes_accessed))


# ---------------------------------------------------------------------------
# Host-side (numpy) graph bookkeeping, computed once per graph structure.
# ---------------------------------------------------------------------------
def build_graph_constants(lengths, src, dst, etype, num_relations=4):
    lengths = [int(l) for l in lengths]
    B, Lmax, N = len(lengths), max(lengths), int(sum(lengths))
    src = np.asarray(src, np.int64)
    dst = np.asarray(dst, np.int64)
    etype = np.asarray(etype, np.int64)
    E = int(src.shape[0])
    offsets = np.concatenate([[0], np.cumsum(lengths)[:-1]]).astype(np.int64)
    node_graph = np.concatenate([np.full(l, b, np.int64)
                                 for b, l in enumerate(lengths)])

    msame = (node_graph[:, None] == node_graph[None, :]).astype(np.float32)
    G = np.zeros((B, N), np.float32)
    G[node_graph, np.arange(N)] = 1.0
    padb = (Lmax - np.asarray(lengths, np.float32)).reshape(B, 1)
    padn = padb[node_graph, :]                                      # (N, 1)

    gsrc = np.zeros((E, N), np.float32)
    gsrc[np.arange(E), src] = 1.0
    gdst = np.zeros((E, N), np.float32)
    gdst[np.arange(E), dst] = 1.0
    # per-relation mean-aggregation matrix, stacked along columns: (N, 4E)
    aggr = np.zeros((N, num_relations * E), np.float32)
    for rel in range(num_relations):
        deg = np.zeros((N,), np.float32)
        for e in range(E):
            if etype[e] == rel:
                deg[dst[e]] += 1.0
        for e in range(E):
            if etype[e] == rel:
                aggr[dst[e], rel * E + e] = 1.0 / max(deg[dst[e]], 1.0)

    LB = Lmax * B
    ssel = np.zeros((LB, N), np.float32)    # graph2batch selection (time-major)
    maskv = np.zeros((LB, 1), np.float32)   # padding mask
    gpos = np.zeros((B, LB), np.float32)    # position -> graph indicator
    for b, l in enumerate(lengths):
        for t in range(Lmax):
            row = t * B + b
            gpos[b, row] = 1.0
            if t < l:
                ssel[row, offsets[b] + t] = 1.0
                maskv[row, 0] = 1.0

    j32 = lambda a: jnp.asarray(a, jnp.float32)
    jb = lambda a: jnp.asarray(a, jnp.float32).astype(BF16)   # matmul-only 0/1 matrices
    return dict(N=N, B=B, Lmax=Lmax, E=E,
                msame=j32(msame), G=jb(G), Gt=jb(G.T.copy()),
                padn=j32(padn), padb=j32(padb),
                gsrc=jb(gsrc), gdst=jb(gdst), aggr=jb(aggr),
                ssel=jb(ssel), maskv=j32(maskv), gpos=jb(gpos))


# ---------------------------------------------------------------------------
# Raw parameters (shapes from Model.__init__) and one-time prepacking.
# ---------------------------------------------------------------------------
def init_params(key, num_words, num_classes, in_dim, hid, step=2):
    ks = iter(jax.random.split(key, 64))
    nk = lambda: next(ks)

    def xavier(out_d, in_d):
        lim = math.sqrt(6.0 / (in_d + out_d))
        return jax.random.uniform(nk(), (out_d, in_d), jnp.float32, -lim, lim)

    p = {}
    emb = jax.random.normal(nk(), (num_words + 1, in_dim), jnp.float32)
    p["embed"] = emb.at[num_words].set(0.0)                  # padding_idx row
    p["enc_W"] = xavier(hid, in_dim)
    p["enc_b"] = jnp.zeros((hid,), jnp.float32)
    p["conv"] = [{
        "lin_skip_w": xavier(hid, hid),
        "film_skip_w": xavier(2 * hid, hid),
        "film_skip_b": jnp.zeros((2 * hid,), jnp.float32),
        "lin_w": [xavier(hid, hid) for _ in range(4)],
        "film_w": [xavier(2 * hid, hid) for _ in range(4)],
        "film_b": [jnp.zeros((2 * hid,), jnp.float32) for _ in range(4)],
    } for _ in range(step)]
    g = {}
    for n in ("z0", "z1", "z2", "r0", "r1", "r2", "h0", "h1", "h2"):
        g["w" + n] = xavier(hid, hid)
        g["b" + n] = jnp.zeros((hid,), jnp.float32)
    p["gru_s"] = g
    H = hid
    lim = 1.0 / math.sqrt(H)
    lstm_w = lambda shape: jax.random.uniform(nk(), shape, jnp.float32, -lim, lim)
    p["lstm"] = {"W_ih_f": lstm_w((4 * H, H)), "W_hh_f": lstm_w((4 * H, H)),
                 "b_f": jnp.zeros((4 * H,), jnp.float32),
                 "W_ih_b": lstm_w((4 * H, H)), "W_hh_b": lstm_w((4 * H, H)),
                 "b_b": jnp.zeros((4 * H,), jnp.float32)}
    D2 = 2 * hid
    p["read"] = {"W3": xavier(D2, D2), "b3": jnp.zeros((D2,), jnp.float32),
                 "w3": xavier(1, D2), "bw3": jnp.zeros((1,), jnp.float32),
                 "mlp_W": xavier(num_classes, D2),
                 "mlp_b": jnp.zeros((num_classes,), jnp.float32)}
    return p


def prepack_params(p):
    tb = lambda w: jnp.asarray(w, F32).T.astype(BF16)     # transpose + bf16 operand
    t = lambda w: jnp.asarray(w, F32).T
    fb = lambda b: jnp.asarray(b, F32).reshape(1, -1)     # f32 bias row
    D = p["enc_W"].shape[0]

    pk = {"embed": jnp.asarray(p["embed"], F32).astype(BF16),
          "encWt": tb(p["enc_W"]),
          "enc_b": fb(p["enc_b"])}

    conv = []
    for c in p["conv"]:
        betas = [t(w)[:, :D] for w in c["film_w"]]
        gammas = [t(w)[:, D:] for w in c["film_w"]]
        fbeta = [jnp.asarray(b, F32)[:D] for b in c["film_b"]]
        fgamma = [jnp.asarray(b, F32)[D:] for b in c["film_b"]]
        conv.append({
            "fsk": tb(c["film_skip_w"]),                                   # (D, 2D)
            "fskb": fb(c["film_skip_b"]),                                  # (1, 2D)
            "lsk": tb(c["lin_skip_w"]),                                    # (D, D)
            "lin_all": jnp.concatenate([t(w) for w in c["lin_w"]],
                                       axis=1).astype(BF16),               # (D, 4D)
            "film_all": jnp.concatenate(betas + gammas,
                                        axis=1).astype(BF16),              # (D, 8D)
            "film_b": jnp.concatenate(fbeta + fgamma).reshape(1, -1),      # (1, 8D)
        })
    pk["conv"] = conv

    g = p["gru_s"]
    wzr = jnp.concatenate([
        jnp.concatenate([t(g["wz0"]), t(g["wr0"])], axis=1),
        jnp.concatenate([t(g["wz1"]), t(g["wr1"])], axis=1),
        jnp.concatenate([t(g["wz2"]), t(g["wr2"])], axis=1)], axis=0)      # (3D, 2D)
    was_h = jnp.concatenate([t(g["wh0"]), t(g["wh2"])], axis=0)            # (2D, D)
    pk["gru"] = {
        "wzr": wzr.astype(BF16),
        "b_zr": jnp.concatenate([g["bz0"] + g["bz1"] + g["bz2"],
                                 g["br0"] + g["br1"] + g["br2"]]).reshape(1, -1),
        "was_h": was_h.astype(BF16),
        "wx_h": tb(g["wh1"]),
        "b_h": (g["bh0"] + g["bh1"] + g["bh2"]).reshape(1, -1),
    }
    l = p["lstm"]
    pk["lstm"] = {"wih_f": tb(l["W_ih_f"]), "whh_f": tb(l["W_hh_f"]), "b_f": fb(l["b_f"]),
                  "wih_b": tb(l["W_ih_b"]), "whh_b": tb(l["W_hh_b"]), "b_b": fb(l["b_b"])}
    r = p["read"]
    pk["read"] = {"w3t": tb(r["W3"]), "b3": fb(r["b3"]),
                  "wvt": tb(r["w3"]), "bv": jnp.asarray(r["bw3"], F32).reshape(1, 1),
                  "mlpWt": tb(r["mlp_W"]), "mlpb": fb(r["mlp_b"])}
    return pk


# ---------------------------------------------------------------------------
# Forward: ONE pallas_call for the entire model.
# ---------------------------------------------------------------------------
def make_forward(gconst, num_words, in_dim, hid, num_classes, steps):
    N, B, Lmax, E = gconst["N"], gconst["B"], gconst["Lmax"], gconst["E"]
    V = num_words + 1
    kernel = _make_fused_kernel(N, B, Lmax, E, V, in_dim, hid, num_classes, steps)

    def fwd(params, node_ids):
        args = [node_ids.reshape(N, 1).astype(jnp.int32),
                params["embed"], params["encWt"], params["enc_b"],
                gconst["msame"], gconst["G"], gconst["Gt"],
                gconst["padn"], gconst["padb"],
                gconst["gsrc"], gconst["gdst"], gconst["aggr"],
                gconst["ssel"], gconst["maskv"], gconst["gpos"]]
        for cw in params["conv"]:
            args += [cw["fsk"], cw["fskb"], cw["lsk"],
                     cw["lin_all"], cw["film_all"], cw["film_b"]]
        g = params["gru"]
        args += [g["wzr"], g["b_zr"], g["was_h"], g["wx_h"], g["b_h"]]
        l = params["lstm"]
        args += [l["wih_f"], l["whh_f"], l["b_f"], l["wih_b"], l["whh_b"], l["b_b"]]
        r = params["read"]
        args += [r["w3t"], r["b3"], r["wvt"], r["bv"], r["mlpWt"], r["mlpb"]]

        out_shape = jax.ShapeDtypeStruct((B, num_classes), jnp.float32)
        cost = _cost_estimate(args, out_shape, N, B, Lmax, E, V, in_dim, hid,
                              num_classes, steps)
        return pl.pallas_call(kernel, out_shape=out_shape, cost_estimate=cost)(*args)

    return jax.jit(fwd)


# ---------------------------------------------------------------------------
if __name__ == "__main__":
    num_words, num_classes = 20, 4
    in_dim = hid = 32
    step = 2
    lengths = [6, 5]                      # 2 graphs, 11 nodes total, Lmax = 6
    N = sum(lengths)

    key_params, key_data = jax.random.split(jax.random.PRNGKey(0))
    raw_params = init_params(key_params, num_words, num_classes, in_dim, hid, step)
    params = prepack_params(raw_params)

    node_ids = jax.random.randint(key_data, (N,), 0, num_words)
    src = [0, 1, 1, 2, 2, 3, 3, 4, 4, 5, 0, 5, 6, 7, 7, 8, 8, 9, 9, 10]
    dst = [1, 0, 2, 1, 3, 2, 4, 3, 5, 4, 5, 0, 7, 6, 8, 7, 9, 8, 10, 9]
    etype = [i % 4 for i in range(len(src))]

    gconst = build_graph_constants(lengths, src, dst, etype, num_relations=4)
    forward_fn = make_forward(gconst, num_words, in_dim, hid, num_classes, step)

    logits = forward_fn(params, jnp.asarray(node_ids, jnp.int32))
    logits = jax.block_until_ready(logits)
    assert logits.shape == (len(lengths), num_classes)
    assert bool(jnp.all(jnp.isfinite(logits)))
    print("KERNEL_OK")
</pallas_src>

<mosaic_0001>
module attributes {stable_mosaic.version = 11 : i64} {
  func.func @kernel(%arg0: memref<11x1xi32, #tpu.memory_space<vmem>>, %arg1: memref<21x32xbf16, #tpu.memory_space<vmem>>, %arg2: memref<32x32xbf16, #tpu.memory_space<vmem>>, %arg3: memref<1x32xf32, #tpu.memory_space<vmem>>, %arg4: memref<11x11xf32, #tpu.memory_space<vmem>>, %arg5: memref<2x11xbf16, #tpu.memory_space<vmem>>, %arg6: memref<11x2xbf16, #tpu.memory_space<vmem>>, %arg7: memref<11x1xf32, #tpu.memory_space<vmem>>, %arg8: memref<2x1xf32, #tpu.memory_space<vmem>>, %arg9: memref<20x11xbf16, #tpu.memory_space<vmem>>, %arg10: memref<20x11xbf16, #tpu.memory_space<vmem>>, %arg11: memref<11x80xbf16, #tpu.memory_space<vmem>>, %arg12: memref<12x11xbf16, #tpu.memory_space<vmem>>, %arg13: memref<12x1xf32, #tpu.memory_space<vmem>>, %arg14: memref<2x12xbf16, #tpu.memory_space<vmem>>, %arg15: memref<32x64xbf16, #tpu.memory_space<vmem>>, %arg16: memref<1x64xf32, #tpu.memory_space<vmem>>, %arg17: memref<32x32xbf16, #tpu.memory_space<vmem>>, %arg18: memref<32x128xbf16, #tpu.memory_space<vmem>>, %arg19: memref<32x256xbf16, #tpu.memory_space<vmem>>, %arg20: memref<1x256xf32, #tpu.memory_space<vmem>>, %arg21: memref<32x64xbf16, #tpu.memory_space<vmem>>, %arg22: memref<1x64xf32, #tpu.memory_space<vmem>>, %arg23: memref<32x32xbf16, #tpu.memory_space<vmem>>, %arg24: memref<32x128xbf16, #tpu.memory_space<vmem>>, %arg25: memref<32x256xbf16, #tpu.memory_space<vmem>>, %arg26: memref<1x256xf32, #tpu.memory_space<vmem>>, %arg27: memref<96x64xbf16, #tpu.memory_space<vmem>>, %arg28: memref<1x64xf32, #tpu.memory_space<vmem>>, %arg29: memref<64x32xbf16, #tpu.memory_space<vmem>>, %arg30: memref<32x32xbf16, #tpu.memory_space<vmem>>, %arg31: memref<1x32xf32, #tpu.memory_space<vmem>>, %arg32: memref<32x128xbf16, #tpu.memory_space<vmem>>, %arg33: memref<32x128xbf16, #tpu.memory_space<vmem>>, %arg34: memref<1x128xf32, #tpu.memory_space<vmem>>, %arg35: memref<32x128xbf16, #tpu.memory_space<vmem>>, %arg36: memref<32x128xbf16, #tpu.memory_space<vmem>>, %arg37: memref<1x128xf32, #tpu.memory_space<vmem>>, %arg38: memref<64x64xbf16, #tpu.memory_space<vmem>>, %arg39: memref<1x64xf32, #tpu.memory_space<vmem>>, %arg40: memref<64x1xbf16, #tpu.memory_space<vmem>>, %arg41: memref<1x1xf32, #tpu.memory_space<vmem>>, %arg42: memref<64x4xbf16, #tpu.memory_space<vmem>>, %arg43: memref<1x4xf32, #tpu.memory_space<vmem>>, %arg44: memref<2x4xf32, #tpu.memory_space<vmem>>) attributes {dimension_semantics = [], scalar_prefetch = 0 : i64, scratch_operands = 0 : i64, tpu.core_type = #tpu.core_type<tc>} {
    %c0 = arith.constant 0 : index
    %c0_0 = arith.constant 0 : index
    %0 = vector.load %arg0[%c0, %c0_0] : memref<11x1xi32, #tpu.memory_space<vmem>>, vector<11x1xi32>
    %1 = tpu.iota {dimensions = array<i32: 1>} : vector<11x21xi32>
    %2 = vector.broadcast %0 : vector<11x1xi32> to vector<11x21xi32>
    %3 = arith.cmpi eq, %1, %2 : vector<11x21xi32>
    %cst = arith.constant 1.000000e+00 : f32
    %cst_1 = arith.constant 0.000000e+00 : f32
    %4 = vector.broadcast %cst : f32 to vector<11x21xf32>
    %5 = vector.broadcast %cst_1 : f32 to vector<11x21xf32>
    %6 = arith.select %3, %4, %5 : vector<11x21xi1>, vector<11x21xf32>
    %c0_2 = arith.constant 0 : index
    %c0_3 = arith.constant 0 : index
    %7 = vector.load %arg1[%c0_2, %c0_3] : memref<21x32xbf16, #tpu.memory_space<vmem>>, vector<21x32xbf16>
    %8 = arith.truncf %6 : vector<11x21xf32> to vector<11x21xbf16>
    %cst_4 = arith.constant dense<0.000000e+00> : vector<11x32xf32>
    %9 = tpu.matmul %8, %7, %cst_4 {dimension_numbers = #tpu.dot_dimension_numbers<[1], [0], [0], [1], [0, 0, 1, 1], [], []>} : vector<11x21xbf16>, vector<21x32xbf16>, vector<11x32xf32> -> vector<11x32xf32>
    %c0_5 = arith.constant 0 : index
    %c0_6 = arith.constant 0 : index
    %10 = vector.load %arg2[%c0_5, %c0_6] : memref<32x32xbf16, #tpu.memory_space<vmem>>, vector<32x32xbf16>
    %11 = arith.truncf %9 : vector<11x32xf32> to vector<11x32xbf16>
    %cst_7 = arith.constant dense<0.000000e+00> : vector<11x32xf32>
    %12 = tpu.matmul %11, %10, %cst_7 {dimension_numbers = #tpu.dot_dimension_numbers<[1], [0], [0], [1], [0, 0, 1, 1], [], []>} : vector<11x32xbf16>, vector<32x32xbf16>, vector<11x32xf32> -> vector<11x32xf32>
    %c0_8 = arith.constant 0 : index
    %c0_9 = arith.constant 0 : index
    %13 = vector.load %arg3[%c0_8, %c0_9] : memref<1x32xf32, #tpu.memory_space<vmem>>, vector<1x32xf32>
    %14 = vector.broadcast %13 : vector<1x32xf32> to vector<11x32xf32>
    %15 = arith.addf %12, %14 : vector<11x32xf32>
    %16 = math.tanh %15 : vector<11x32xf32>
    %c0_10 = arith.constant 0 : index
    %c0_11 = arith.constant 0 : index
    %17 = vector.load %arg4[%c0_10, %c0_11] : memref<11x11xf32, #tpu.memory_space<vmem>>, vector<11x11xf32>
    %c0_12 = arith.constant 0 : index
    %c0_13 = arith.constant 0 : index
    %18 = vector.load %arg7[%c0_12, %c0_13] : memref<11x1xf32, #tpu.memory_space<vmem>>, vector<11x1xf32>
    %c0_14 = arith.constant 0 : index
    %c0_15 = arith.constant 0 : index
    %19 = vector.load %arg8[%c0_14, %c0_15] : memref<2x1xf32, #tpu.memory_space<vmem>>, vector<2x1xf32>
    %c0_16 = arith.constant 0 : index
    %c0_17 = arith.constant 0 : index
    %20 = vector.load %arg5[%c0_16, %c0_17] : memref<2x11xbf16, #tpu.memory_space<vmem>>, vector<2x11xbf16>
    %c0_18 = arith.constant 0 : index
    %c0_19 = arith.constant 0 : index
    %21 = vector.load %arg6[%c0_18, %c0_19] : memref<11x2xbf16, #tpu.memory_space<vmem>>, vector<11x2xbf16>
    %c0_20 = arith.constant 0 : index
    %c0_21 = arith.constant 0 : index
    %22 = vector.load %arg9[%c0_20, %c0_21] : memref<20x11xbf16, #tpu.memory_space<vmem>>, vector<20x11xbf16>
    %c0_22 = arith.constant 0 : index
    %c0_23 = arith.constant 0 : index
    %23 = vector.load %arg10[%c0_22, %c0_23] : memref<20x11xbf16, #tpu.memory_space<vmem>>, vector<20x11xbf16>
    %c0_24 = arith.constant 0 : index
    %c0_25 = arith.constant 0 : index
    %24 = vector.load %arg11[%c0_24, %c0_25] : memref<11x80xbf16, #tpu.memory_space<vmem>>, vector<11x80xbf16>
    %c0_26 = arith.constant 0 : index
    %c0_27 = arith.constant 0 : index
    %25 = vector.load %arg27[%c0_26, %c0_27] : memref<96x64xbf16, #tpu.memory_space<vmem>>, vector<96x64xbf16>
    %c0_28 = arith.constant 0 : index
    %c0_29 = arith.constant 0 : index
    %26 = vector.load %arg28[%c0_28, %c0_29] : memref<1x64xf32, #tpu.memory_space<vmem>>, vector<1x64xf32>
    %c0_30 = arith.constant 0 : index
    %c0_31 = arith.constant 0 : index
    %27 = vector.load %arg29[%c0_30, %c0_31] : memref<64x32xbf16, #tpu.memory_space<vmem>>, vector<64x32xbf16>
    %c0_32 = arith.constant 0 : index
    %c0_33 = arith.constant 0 : index
    %28 = vector.load %arg30[%c0_32, %c0_33] : memref<32x32xbf16, #tpu.memory_space<vmem>>, vector<32x32xbf16>
    %c0_34 = arith.constant 0 : index
    %c0_35 = arith.constant 0 : index
    %29 = vector.load %arg31[%c0_34, %c0_35] : memref<1x32xf32, #tpu.memory_space<vmem>>, vector<1x32xf32>
    %30 = arith.truncf %16 : vector<11x32xf32> to vector<11x32xbf16>
    %cst_36 = arith.constant dense<0.000000e+00> : vector<11x11xf32>
    %31 = tpu.matmul %30, %30, %cst_36 {dimension_numbers = #tpu.dot_dimension_numbers<[1], [1], [0], [0], [0, 0, 1, 0], [], []>} : vector<11x32xbf16>, vector<11x32xbf16>, vector<11x11xf32> -> vector<11x11xf32>
    %cst_37 = arith.constant 0.176776692 : f32
    %32 = vector.broadcast %cst_37 : f32 to vector<11x11xf32>
    %33 = arith.mulf %31, %32 : vector<11x11xf32>
    %cst_38 = arith.constant 5.000000e-01 : f32
    %34 = vector.broadcast %cst_38 : f32 to vector<11x11xf32>
    %35 = arith.cmpf ogt, %17, %34 : vector<11x11xf32>
    %cst_39 = arith.constant -1.000000e+30 : f32
    %36 = vector.broadcast %cst_39 : f32 to vector<11x11xf32>
    %37 = arith.select %35, %33, %36 : vector<11x11xi1>, vector<11x11xf32>
    %cst_40 = arith.constant dense<0xFF800000> : vector<11xf32>
    %38 = vector.multi_reduction <maximumf>, %37, %cst_40 [1] : vector<11x11xf32> to vector<11xf32>
    %39 = vector.shape_cast %38 : vector<11xf32> to vector<11x1xf32>
    %cst_41 = arith.constant 0.000000e+00 : f32
    %40 = vector.broadcast %cst_41 : f32 to vector<11x1xf32>
    %41 = arith.maximumf %39, %40 : vector<11x1xf32>
    %42 = vector.broadcast %41 : vector<11x1xf32> to vector<11x11xf32>
    %43 = arith.subf %37, %42 : vector<11x11xf32>
    %44 = math.exp %43 : vector<11x11xf32>
    %cst_42 = arith.constant dense<0.000000e+00> : vector<11xf32>
    %45 = vector.multi_reduction <add>, %44, %cst_42 [1] : vector<11x11xf32> to vector<11xf32>
    %46 = vector.shape_cast %45 : vector<11xf32> to vector<11x1xf32>
    %cst_43 = arith.constant 0.000000e+00 : f32
    %47 = vector.broadcast %cst_43 : f32 to vector<11x1xf32>
    %48 = arith.subf %47, %41 : vector<11x1xf32>
    %49 = math.exp %48 : vector<11x1xf32>
    %50 = arith.mulf %18, %49 : vector<11x1xf32>
    %51 = arith.addf %46, %50 : vector<11x1xf32>
    %52 = arith.truncf %44 : vector<11x11xf32> to vector<11x11xbf16>
    %cst_44 = arith.constant dense<0.000000e+00> : vector<11x32xf32>
    %53 = tpu.matmul %52, %30, %cst_44 {dimension_numbers = #tpu.dot_dimension_numbers<[1], [0], [0], [1], [0, 0, 1, 1], [], []>} : vector<11x11xbf16>, vector<11x32xbf16>, vector<11x32xf32> -> vector<11x32xf32>
    %54 = vector.broadcast %51 : vector<11x1xf32> to vector<11x32xf32>
    %55 = arith.divf %53, %54 : vector<11x32xf32>
    %56 = arith.truncf %55 : vector<11x32xf32> to vector<11x32xbf16>
    %cst_45 = arith.constant dense<0.000000e+00> : vector<2x32xf32>
    %57 = tpu.matmul %20, %56, %cst_45 {dimension_numbers = #tpu.dot_dimension_numbers<[1], [0], [0], [1], [0, 0, 1, 1], [], []>} : vector<2x11xbf16>, vector<11x32xbf16>, vector<2x32xf32> -> vector<2x32xf32>
    %cst_46 = arith.constant 0.166666672 : f32
    %58 = vector.broadcast %cst_46 : f32 to vector<2x32xf32>
    %59 = arith.mulf %57, %58 : vector<2x32xf32>
    %cst_47 = arith.constant dense<0.000000e+00> : vector<2x32xf32>
    %60 = tpu.matmul %20, %30, %cst_47 {dimension_numbers = #tpu.dot_dimension_numbers<[1], [0], [0], [1], [0, 0, 1, 1], [], []>} : vector<2x11xbf16>, vector<11x32xbf16>, vector<2x32xf32> -> vector<2x32xf32>
    %61 = vector.broadcast %19 : vector<2x1xf32> to vector<2x32xf32>
    %62 = arith.mulf %61, %60 : vector<2x32xf32>
    %cst_48 = arith.constant 0.027777778 : f32
    %63 = vector.broadcast %cst_48 : f32 to vector<2x32xf32>
    %64 = arith.mulf %62, %63 : vector<2x32xf32>
    %65 = arith.addf %59, %64 : vector<2x32xf32>
    %66 = arith.truncf %65 : vector<2x32xf32> to vector<2x32xbf16>
    %cst_49 = arith.constant dense<0.000000e+00> : vector<11x32xf32>
    %67 = tpu.matmul %21, %66, %cst_49 {dimension_numbers = #tpu.dot_dimension_numbers<[1], [0], [0], [1], [0, 0, 1, 1], [], []>} : vector<11x2xbf16>, vector<2x32xbf16>, vector<11x32xf32> -> vector<11x32xf32>
    %c0_50 = arith.constant 0 : index
    %c0_51 = arith.constant 0 : index
    %68 = vector.load %arg15[%c0_50, %c0_51] : memref<32x64xbf16, #tpu.memory_space<vmem>>, vector<32x64xbf16>
    %cst_52 = arith.constant dense<0.000000e+00> : vector<11x64xf32>
    %69 = tpu.matmul %30, %68, %cst_52 {dimension_numbers = #tpu.dot_dimension_numbers<[1], [0], [0], [1], [0, 0, 1, 1], [], []>} : vector<11x32xbf16>, vector<32x64xbf16>, vector<11x64xf32> -> vector<11x64xf32>
    %c0_53 = arith.constant 0 : index
    %c0_54 = arith.constant 0 : index
    %70 = vector.load %arg16[%c0_53, %c0_54] : memref<1x64xf32, #tpu.memory_space<vmem>>, vector<1x64xf32>
    %71 = vector.broadcast %70 : vector<1x64xf32> to vector<11x64xf32>
    %72 = arith.addf %69, %71 : vector<11x64xf32>
    %73 = vector.extract_strided_slice %72 {offsets = [0, 0], sizes = [11, 32], strides = [1, 1]} : vector<11x64xf32> to vector<11x32xf32>
    %74 = vector.extract_strided_slice %72 {offsets = [0, 32], sizes = [11, 32], strides = [1, 1]} : vector<11x64xf32> to vector<11x32xf32>
    %c0_55 = arith.constant 0 : index
    %c0_56 = arith.constant 0 : index
    %75 = vector.load %arg17[%c0_55, %c0_56] : memref<32x32xbf16, #tpu.memory_space<vmem>>, vector<32x32xbf16>
    %cst_57 = arith.constant dense<0.000000e+00> : vector<11x32xf32>
    %76 = tpu.matmul %30, %75, %cst_57 {dimension_numbers = #tpu.dot_dimension_numbers<[1], [0], [0], [1], [0, 0, 1, 1], [], []>} : vector<11x32xbf16>, vector<32x32xbf16>, vector<11x32xf32> -> vector<11x32xf32>
    %77 = arith.mulf %74, %76 : vector<11x32xf32>
    %78 = arith.addf %77, %73 : vector<11x32xf32>
    %cst_58 = arith.constant 0.000000e+00 : f32
    %79 = vector.broadcast %cst_58 : f32 to vector<11x32xf32>
    %80 = arith.maximumf %78, %79 : vector<11x32xf32>
    %c0_59 = arith.constant 0 : index
    %c0_60 = arith.constant 0 : index
    %81 = vector.load %arg18[%c0_59, %c0_60] : memref<32x128xbf16, #tpu.memory_space<vmem>>, vector<32x128xbf16>
    %cst_61 = arith.constant dense<0.000000e+00> : vector<11x128xf32>
    %82 = tpu.matmul %30, %81, %cst_61 {dimension_numbers = #tpu.dot_dimension_numbers<[1], [0], [0], [1], [0, 0, 1, 1], [], []>} : vector<11x32xbf16>, vector<32x128xbf16>, vector<11x128xf32> -> vector<11x128xf32>
    %c0_62 = arith.constant 0 : index
    %c0_63 = arith.constant 0 : index
    %83 = vector.load %arg19[%c0_62, %c0_63] : memref<32x256xbf16, #tpu.memory_space<vmem>>, vector<32x256xbf16>
    %cst_64 = arith.constant dense<0.000000e+00> : vector<11x256xf32>
    %84 = tpu.matmul %30, %83, %cst_64 {dimension_numbers = #tpu.dot_dimension_numbers<[1], [0], [0], [1], [0, 0, 1, 1], [], []>} : vector<11x32xbf16>, vector<32x256xbf16>, vector<11x256xf32> -> vector<11x256xf32>
    %c0_65 = arith.constant 0 : index
    %c0_66 = arith.constant 0 : index
    %85 = vector.load %arg20[%c0_65, %c0_66] : memref<1x256xf32, #tpu.memory_space<vmem>>, vector<1x256xf32>
    %86 = vector.broadcast %85 : vector<1x256xf32> to vector<11x256xf32>
    %87 = arith.addf %84, %86 : vector<11x256xf32>
    %88 = arith.truncf %82 : vector<11x128xf32> to vector<11x128xbf16>
    %cst_67 = arith.constant dense<0.000000e+00> : vector<20x128xf32>
    %89 = tpu.matmul %22, %88, %cst_67 {dimension_numbers = #tpu.dot_dimension_numbers<[1], [0], [0], [1], [0, 0, 1, 1], [], []>} : vector<20x11xbf16>, vector<11x128xbf16>, vector<20x128xf32> -> vector<20x128xf32>
    %90 = arith.truncf %87 : vector<11x256xf32> to vector<11x256xbf16>
    %cst_68 = arith.constant dense<0.000000e+00> : vector<20x256xf32>
    %91 = tpu.matmul %23, %90, %cst_68 {dimension_numbers = #tpu.dot_dimension_numbers<[1], [0], [0], [1], [0, 0, 1, 1], [], []>} : vector<20x11xbf16>, vector<11x256xbf16>, vector<20x256xf32> -> vector<20x256xf32>
    %92 = vector.extract_strided_slice %91 {offsets = [0, 0], sizes = [20, 128], strides = [1, 1]} : vector<20x256xf32> to vector<20x128xf32>
    %93 = vector.extract_strided_slice %91 {offsets = [0, 128], sizes = [20, 128], strides = [1, 1]} : vector<20x256xf32> to vector<20x128xf32>
    %94 = arith.mulf %93, %89 : vector<20x128xf32>
    %95 = arith.addf %94, %92 : vector<20x128xf32>
    %cst_69 = arith.constant 0.000000e+00 : f32
    %96 = vector.broadcast %cst_69 : f32 to vector<20x128xf32>
    %97 = arith.maximumf %95, %96 : vector<20x128xf32>
    %98 = vector.extract_strided_slice %24 {offsets = [0, 0], sizes = [11, 20], strides = [1, 1]} : vector<11x80xbf16> to vector<11x20xbf16>
    %99 = vector.extract_strided_slice %97 {offsets = [0, 0], sizes = [20, 32], strides = [1, 1]} : vector<20x128xf32> to vector<20x32xf32>
    %100 = arith.truncf %99 : vector<20x32xf32> to vector<20x32xbf16>
    %cst_70 = arith.constant dense<0.000000e+00> : vector<11x32xf32>
    %101 = tpu.matmul %98, %100, %cst_70 {dimension_numbers = #tpu.dot_dimension_numbers<[1], [0], [0], [1], [0, 0, 1, 1], [], []>} : vector<11x20xbf16>, vector<20x32xbf16>, vector<11x32xf32> -> vector<11x32xf32>
    %102 = arith.addf %80, %101 : vector<11x32xf32>
    %103 = vector.extract_strided_slice %24 {offsets = [0, 20], sizes = [11, 20], strides = [1, 1]} : vector<11x80xbf16> to vector<11x20xbf16>
    %104 = vector.extract_strided_slice %97 {offsets = [0, 32], sizes = [20, 32], strides = [1, 1]} : vector<20x128xf32> to vector<20x32xf32>
    %105 = arith.truncf %104 : vector<20x32xf32> to vector<20x32xbf16>
    %cst_71 = arith.constant dense<0.000000e+00> : vector<11x32xf32>
    %106 = tpu.matmul %103, %105, %cst_71 {dimension_numbers = #tpu.dot_dimension_numbers<[1], [0], [0], [1], [0, 0, 1, 1], [], []>} : vector<11x20xbf16>, vector<20x32xbf16>, vector<11x32xf32> -> vector<11x32xf32>
    %107 = arith.addf %102, %106 : vector<11x32xf32>
    %108 = vector.extract_strided_slice %24 {offsets = [0, 40], sizes = [11, 20], strides = [1, 1]} : vector<11x80xbf16> to vector<11x20xbf16>
    %109 = vector.extract_strided_slice %97 {offsets = [0, 64], sizes = [20, 32], strides = [1, 1]} : vector<20x128xf32> to vector<20x32xf32>
    %110 = arith.truncf %109 : vector<20x32xf32> to vector<20x32xbf16>
    %cst_72 = arith.constant dense<0.000000e+00> : vector<11x32xf32>
    %111 = tpu.matmul %108, %110, %cst_72 {dimension_numbers = #tpu.dot_dimension_numbers<[1], [0], [0], [1], [0, 0, 1, 1], [], []>} : vector<11x20xbf16>, vector<20x32xbf16>, vector<11x32xf32> -> vector<11x32xf32>
    %112 = arith.addf %107, %111 : vector<11x32xf32>
    %113 = vector.extract_strided_slice %24 {offsets = [0, 60], sizes = [11, 20], strides = [1, 1]} : vector<11x80xbf16> to vector<11x20xbf16>
    %114 = vector.extract_strided_slice %97 {offsets = [0, 96], sizes = [20, 32], strides = [1, 1]} : vector<20x128xf32> to vector<20x32xf32>
    %115 = arith.truncf %114 : vector<20x32xf32> to vector<20x32xbf16>
    %cst_73 = arith.constant dense<0.000000e+00> : vector<11x32xf32>
    %116 = tpu.matmul %113, %115, %cst_73 {dimension_numbers = #tpu.dot_dimension_numbers<[1], [0], [0], [1], [0, 0, 1, 1], [], []>} : vector<11x20xbf16>, vector<20x32xbf16>, vector<11x32xf32> -> vector<11x32xf32>
    %117 = arith.addf %112, %116 : vector<11x32xf32>
    %118 = tpu.concatenate %117, %16, %67 in 1 : vector<11x32xf32>, vector<11x32xf32>, vector<11x32xf32> -> vector<11x96xf32>
    %119 = arith.truncf %118 : vector<11x96xf32> to vector<11x96xbf16>
    %cst_74 = arith.constant dense<0.000000e+00> : vector<11x64xf32>
    %120 = tpu.matmul %119, %25, %cst_74 {dimension_numbers = #tpu.dot_dimension_numbers<[1], [0], [0], [1], [0, 0, 1, 1], [], []>} : vector<11x96xbf16>, vector<96x64xbf16>, vector<11x64xf32> -> vector<11x64xf32>
    %121 = vector.broadcast %26 : vector<1x64xf32> to vector<11x64xf32>
    %122 = arith.addf %120, %121 : vector<11x64xf32>
    %123 = arith.negf %122 : vector<11x64xf32>
    %124 = math.exp %123 : vector<11x64xf32>
    %cst_75 = arith.constant 1.000000e+00 : f32
    %125 = vector.broadcast %cst_75 : f32 to vector<11x64xf32>
    %126 = arith.addf %125, %124 : vector<11x64xf32>
    %127 = arith.divf %125, %126 : vector<11x64xf32>
    %128 = vector.extract_strided_slice %127 {offsets = [0, 0], sizes = [11, 32], strides = [1, 1]} : vector<11x64xf32> to vector<11x32xf32>
    %129 = vector.extract_strided_slice %127 {offsets = [0, 32], sizes = [11, 32], strides = [1, 1]} : vector<11x64xf32> to vector<11x32xf32>
    %130 = tpu.concatenate %117, %67 in 1 : vector<11x32xf32>, vector<11x32xf32> -> vector<11x64xf32>
    %131 = arith.truncf %130 : vector<11x64xf32> to vector<11x64xbf16>
    %cst_76 = arith.constant dense<0.000000e+00> : vector<11x32xf32>
    %132 = tpu.matmul %131, %27, %cst_76 {dimension_numbers = #tpu.dot_dimension_numbers<[1], [0], [0], [1], [0, 0, 1, 1], [], []>} : vector<11x64xbf16>, vector<64x32xbf16>, vector<11x32xf32> -> vector<11x32xf32>
    %133 = arith.mulf %16, %129 : vector<11x32xf32>
    %134 = arith.truncf %133 : vector<11x32xf32> to vector<11x32xbf16>
    %cst_77 = arith.constant dense<0.000000e+00> : vector<11x32xf32>
    %135 = tpu.matmul %134, %28, %cst_77 {dimension_numbers = #tpu.dot_dimension_numbers<[1], [0], [0], [1], [0, 0, 1, 1], [], []>} : vector<11x32xbf16>, vector<32x32xbf16>, vector<11x32xf32> -> vector<11x32xf32>
    %136 = arith.addf %132, %135 : vector<11x32xf32>
    %137 = vector.broadcast %29 : vector<1x32xf32> to vector<11x32xf32>
    %138 = arith.addf %136, %137 : vector<11x32xf32>
    %139 = math.tanh %138 : vector<11x32xf32>
    %140 = arith.mulf %139, %128 : vector<11x32xf32>
    %cst_78 = arith.constant 1.000000e+00 : f32
    %141 = vector.broadcast %cst_78 : f32 to vector<11x32xf32>
    %142 = arith.subf %141, %128 : vector<11x32xf32>
    %143 = arith.mulf %16, %142 : vector<11x32xf32>
    %144 = arith.addf %140, %143 : vector<11x32xf32>
    %145 = arith.truncf %144 : vector<11x32xf32> to vector<11x32xbf16>
    %cst_79 = arith.constant dense<0.000000e+00> : vector<11x11xf32>
    %146 = tpu.matmul %145, %145, %cst_79 {dimension_numbers = #tpu.dot_dimension_numbers<[1], [1], [0], [0], [0, 0, 1, 0], [], []>} : vector<11x32xbf16>, vector<11x32xbf16>, vector<11x11xf32> -> vector<11x11xf32>
    %cst_80 = arith.constant 0.176776692 : f32
    %147 = vector.broadcast %cst_80 : f32 to vector<11x11xf32>
    %148 = arith.mulf %146, %147 : vector<11x11xf32>
    %cst_81 = arith.constant 5.000000e-01 : f32
    %149 = vector.broadcast %cst_81 : f32 to vector<11x11xf32>
    %150 = arith.cmpf ogt, %17, %149 : vector<11x11xf32>
    %cst_82 = arith.constant -1.000000e+30 : f32
    %151 = vector.broadcast %cst_82 : f32 to vector<11x11xf32>
    %152 = arith.select %150, %148, %151 : vector<11x11xi1>, vector<11x11xf32>
    %cst_83 = arith.constant dense<0xFF800000> : vector<11xf32>
    %153 = vector.multi_reduction <maximumf>, %152, %cst_83 [1] : vector<11x11xf32> to vector<11xf32>
    %154 = vector.shape_cast %153 : vector<11xf32> to vector<11x1xf32>
    %cst_84 = arith.constant 0.000000e+00 : f32
    %155 = vector.broadcast %cst_84 : f32 to vector<11x1xf32>
    %156 = arith.maximumf %154, %155 : vector<11x1xf32>
    %157 = vector.broadcast %156 : vector<11x1xf32> to vector<11x11xf32>
    %158 = arith.subf %152, %157 : vector<11x11xf32>
    %159 = math.exp %158 : vector<11x11xf32>
    %cst_85 = arith.constant dense<0.000000e+00> : vector<11xf32>
    %160 = vector.multi_reduction <add>, %159, %cst_85 [1] : vector<11x11xf32> to vector<11xf32>
    %161 = vector.shape_cast %160 : vector<11xf32> to vector<11x1xf32>
    %cst_86 = arith.constant 0.000000e+00 : f32
    %162 = vector.broadcast %cst_86 : f32 to vector<11x1xf32>
    %163 = arith.subf %162, %156 : vector<11x1xf32>
    %164 = math.exp %163 : vector<11x1xf32>
    %165 = arith.mulf %18, %164 : vector<11x1xf32>
    %166 = arith.addf %161, %165 : vector<11x1xf32>
    %167 = arith.truncf %159 : vector<11x11xf32> to vector<11x11xbf16>
    %cst_87 = arith.constant dense<0.000000e+00> : vector<11x32xf32>
    %168 = tpu.matmul %167, %145, %cst_87 {dimension_numbers = #tpu.dot_dimension_numbers<[1], [0], [0], [1], [0, 0, 1, 1], [], []>} : vector<11x11xbf16>, vector<11x32xbf16>, vector<11x32xf32> -> vector<11x32xf32>
    %169 = vector.broadcast %166 : vector<11x1xf32> to vector<11x32xf32>
    %170 = arith.divf %168, %169 : vector<11x32xf32>
    %171 = arith.truncf %170 : vector<11x32xf32> to vector<11x32xbf16>
    %cst_88 = arith.constant dense<0.000000e+00> : vector<2x32xf32>
    %172 = tpu.matmul %20, %171, %cst_88 {dimension_numbers = #tpu.dot_dimension_numbers<[1], [0], [0], [1], [0, 0, 1, 1], [], []>} : vector<2x11xbf16>, vector<11x32xbf16>, vector<2x32xf32> -> vector<2x32xf32>
    %cst_89 = arith.constant 0.166666672 : f32
    %173 = vector.broadcast %cst_89 : f32 to vector<2x32xf32>
    %174 = arith.mulf %172, %173 : vector<2x32xf32>
    %cst_90 = arith.constant dense<0.000000e+00> : vector<2x32xf32>
    %175 = tpu.matmul %20, %145, %cst_90 {dimension_numbers = #tpu.dot_dimension_numbers<[1], [0], [0], [1], [0, 0, 1, 1], [], []>} : vector<2x11xbf16>, vector<11x32xbf16>, vector<2x32xf32> -> vector<2x32xf32>
    %176 = vector.broadcast %19 : vector<2x1xf32> to vector<2x32xf32>
    %177 = arith.mulf %176, %175 : vector<2x32xf32>
    %cst_91 = arith.constant 0.027777778 : f32
    %178 = vector.broadcast %cst_91 : f32 to vector<2x32xf32>
    %179 = arith.mulf %177, %178 : vector<2x32xf32>
    %180 = arith.addf %174, %179 : vector<2x32xf32>
    %181 = arith.truncf %180 : vector<2x32xf32> to vector<2x32xbf16>
    %cst_92 = arith.constant dense<0.000000e+00> : vector<11x32xf32>
    %182 = tpu.matmul %21, %181, %cst_92 {dimension_numbers = #tpu.dot_dimension_numbers<[1], [0], [0], [1], [0, 0, 1, 1], [], []>} : vector<11x2xbf16>, vector<2x32xbf16>, vector<11x32xf32> -> vector<11x32xf32>
    %c0_93 = arith.constant 0 : index
    %c0_94 = arith.constant 0 : index
    %183 = vector.load %arg21[%c0_93, %c0_94] : memref<32x64xbf16, #tpu.memory_space<vmem>>, vector<32x64xbf16>
    %cst_95 = arith.constant dense<0.000000e+00> : vector<11x64xf32>
    %184 = tpu.matmul %145, %183, %cst_95 {dimension_numbers = #tpu.dot_dimension_numbers<[1], [0], [0], [1], [0, 0, 1, 1], [], []>} : vector<11x32xbf16>, vector<32x64xbf16>, vector<11x64xf32> -> vector<11x64xf32>
    %c0_96 = arith.constant 0 : index
    %c0_97 = arith.constant 0 : index
    %185 = vector.load %arg22[%c0_96, %c0_97] : memref<1x64xf32, #tpu.memory_space<vmem>>, vector<1x64xf32>
    %186 = vector.broadcast %185 : vector<1x64xf32> to vector<11x64xf32>
    %187 = arith.addf %184, %186 : vector<11x64xf32>
    %188 = vector.extract_strided_slice %187 {offsets = [0, 0], sizes = [11, 32], strides = [1, 1]} : vector<11x64xf32> to vector<11x32xf32>
    %189 = vector.extract_strided_slice %187 {offsets = [0, 32], sizes = [11, 32], strides = [1, 1]} : vector<11x64xf32> to vector<11x32xf32>
    %c0_98 = arith.constant 0 : index
    %c0_99 = arith.constant 0 : index
    %190 = vector.load %arg23[%c0_98, %c0_99] : memref<32x32xbf16, #tpu.memory_space<vmem>>, vector<32x32xbf16>
    %cst_100 = arith.constant dense<0.000000e+00> : vector<11x32xf32>
    %191 = tpu.matmul %145, %190, %cst_100 {dimension_numbers = #tpu.dot_dimension_numbers<[1], [0], [0], [1], [0, 0, 1, 1], [], []>} : vector<11x32xbf16>, vector<32x32xbf16>, vector<11x32xf32> -> vector<11x32xf32>
    %192 = arith.mulf %189, %191 : vector<11x32xf32>
    %193 = arith.addf %192, %188 : vector<11x32xf32>
    %cst_101 = arith.constant 0.000000e+00 : f32
    %194 = vector.broadcast %cst_101 : f32 to vector<11x32xf32>
    %195 = arith.maximumf %193, %194 : vector<11x32xf32>
    %c0_102 = arith.constant 0 : index
    %c0_103 = arith.constant 0 : index
    %196 = vector.load %arg24[%c0_102, %c0_103] : memref<32x128xbf16, #tpu.memory_space<vmem>>, vector<32x128xbf16>
    %cst_104 = arith.constant dense<0.000000e+00> : vector<11x128xf32>
    %197 = tpu.matmul %145, %196, %cst_104 {dimension_numbers = #tpu.dot_dimension_numbers<[1], [0], [0], [1], [0, 0, 1, 1], [], []>} : vector<11x32xbf16>, vector<32x128xbf16>, vector<11x128xf32> -> vector<11x128xf32>
    %c0_105 = arith.constant 0 : index
    %c0_106 = arith.constant 0 : index
    %198 = vector.load %arg25[%c0_105, %c0_106] : memref<32x256xbf16, #tpu.memory_space<vmem>>, vector<32x256xbf16>
    %cst_107 = arith.constant dense<0.000000e+00> : vector<11x256xf32>
    %199 = tpu.matmul %145, %198, %cst_107 {dimension_numbers = #tpu.dot_dimension_numbers<[1], [0], [0], [1], [0, 0, 1, 1], [], []>} : vector<11x32xbf16>, vector<32x256xbf16>, vector<11x256xf32> -> vector<11x256xf32>
    %c0_108 = arith.constant 0 : index
    %c0_109 = arith.constant 0 : index
    %200 = vector.load %arg26[%c0_108, %c0_109] : memref<1x256xf32, #tpu.memory_space<vmem>>, vector<1x256xf32>
    %201 = vector.broadcast %200 : vector<1x256xf32> to vector<11x256xf32>
    %202 = arith.addf %199, %201 : vector<11x256xf32>
    %203 = arith.truncf %197 : vector<11x128xf32> to vector<11x128xbf16>
    %cst_110 = arith.constant dense<0.000000e+00> : vector<20x128xf32>
    %204 = tpu.matmul %22, %203, %cst_110 {dimension_numbers = #tpu.dot_dimension_numbers<[1], [0], [0], [1], [0, 0, 1, 1], [], []>} : vector<20x11xbf16>, vector<11x128xbf16>, vector<20x128xf32> -> vector<20x128xf32>
    %205 = arith.truncf %202 : vector<11x256xf32> to vector<11x256xbf16>
    %cst_111 = arith.constant dense<0.000000e+00> : vector<20x256xf32>
    %206 = tpu.matmul %23, %205, %cst_111 {dimension_numbers = #tpu.dot_dimension_numbers<[1], [0], [0], [1], [0, 0, 1, 1], [], []>} : vector<20x11xbf16>, vector<11x256xbf16>, vector<20x256xf32> -> vector<20x256xf32>
    %207 = vector.extract_strided_slice %206 {offsets = [0, 0], sizes = [20, 128], strides = [1, 1]} : vector<20x256xf32> to vector<20x128xf32>
    %208 = vector.extract_strided_slice %206 {offsets = [0, 128], sizes = [20, 128], strides = [1, 1]} : vector<20x256xf32> to vector<20x128xf32>
    %209 = arith.mulf %208, %204 : vector<20x128xf32>
    %210 = arith.addf %209, %207 : vector<20x128xf32>
    %cst_112 = arith.constant 0.000000e+00 : f32
    %211 = vector.broadcast %cst_112 : f32 to vector<20x128xf32>
    %212 = arith.maximumf %210, %211 : vector<20x128xf32>
    %213 = vector.extract_strided_slice %24 {offsets = [0, 0], sizes = [11, 20], strides = [1, 1]} : vector<11x80xbf16> to vector<11x20xbf16>
    %214 = vector.extract_strided_slice %212 {offsets = [0, 0], sizes = [20, 32], strides = [1, 1]} : vector<20x128xf32> to vector<20x32xf32>
    %215 = arith.truncf %214 : vector<20x32xf32> to vector<20x32xbf16>
    %cst_113 = arith.constant dense<0.000000e+00> : vector<11x32xf32>
    %216 = tpu.matmul %213, %215, %cst_113 {dimension_numbers = #tpu.dot_dimension_numbers<[1], [0], [0], [1], [0, 0, 1, 1], [], []>} : vector<11x20xbf16>, vector<20x32xbf16>, vector<11x32xf32> -> vector<11x32xf32>
    %217 = arith.addf %195, %216 : vector<11x32xf32>
    %218 = vector.extract_strided_slice %24 {offsets = [0, 20], sizes = [11, 20], strides = [1, 1]} : vector<11x80xbf16> to vector<11x20xbf16>
    %219 = vector.extract_strided_slice %212 {offsets = [0, 32], sizes = [20, 32], strides = [1, 1]} : vector<20x128xf32> to vector<20x32xf32>
    %220 = arith.truncf %219 : vector<20x32xf32> to vector<20x32xbf16>
    %cst_114 = arith.constant dense<0.000000e+00> : vector<11x32xf32>
    %221 = tpu.matmul %218, %220, %cst_114 {dimension_numbers = #tpu.dot_dimension_numbers<[1], [0], [0], [1], [0, 0, 1, 1], [], []>} : vector<11x20xbf16>, vector<20x32xbf16>, vector<11x32xf32> -> vector<11x32xf32>
    %222 = arith.addf %217, %221 : vector<11x32xf32>
    %223 = vector.extract_strided_slice %24 {offsets = [0, 40], sizes = [11, 20], strides = [1, 1]} : vector<11x80xbf16> to vector<11x20xbf16>
    %224 = vector.extract_strided_slice %212 {offsets = [0, 64], sizes = [20, 32], strides = [1, 1]} : vector<20x128xf32> to vector<20x32xf32>
    %225 = arith.truncf %224 : vector<20x32xf32> to vector<20x32xbf16>
    %cst_115 = arith.constant dense<0.000000e+00> : vector<11x32xf32>
    %226 = tpu.matmul %223, %225, %cst_115 {dimension_numbers = #tpu.dot_dimension_numbers<[1], [0], [0], [1], [0, 0, 1, 1], [], []>} : vector<11x20xbf16>, vector<20x32xbf16>, vector<11x32xf32> -> vector<11x32xf32>
    %227 = arith.addf %222, %226 : vector<11x32xf32>
    %228 = vector.extract_strided_slice %24 {offsets = [0, 60], sizes = [11, 20], strides = [1, 1]} : vector<11x80xbf16> to vector<11x20xbf16>
    %229 = vector.extract_strided_slice %212 {offsets = [0, 96], sizes = [20, 32], strides = [1, 1]} : vector<20x128xf32> to vector<20x32xf32>
    %230 = arith.truncf %229 : vector<20x32xf32> to vector<20x32xbf16>
    %cst_116 = arith.constant dense<0.000000e+00> : vector<11x32xf32>
    %231 = tpu.matmul %228, %230, %cst_116 {dimension_numbers = #tpu.dot_dimension_numbers<[1], [0], [0], [1], [0, 0, 1, 1], [], []>} : vector<11x20xbf16>, vector<20x32xbf16>, vector<11x32xf32> -> vector<11x32xf32>
    %232 = arith.addf %227, %231 : vector<11x32xf32>
    %233 = tpu.concatenate %232, %144, %182 in 1 : vector<11x32xf32>, vector<11x32xf32>, vector<11x32xf32> -> vector<11x96xf32>
    %234 = arith.truncf %233 : vector<11x96xf32> to vector<11x96xbf16>
    %cst_117 = arith.constant dense<0.000000e+00> : vector<11x64xf32>
    %235 = tpu.matmul %234, %25, %cst_117 {dimension_numbers = #tpu.dot_dimension_numbers<[1], [0], [0], [1], [0, 0, 1, 1], [], []>} : vector<11x96xbf16>, vector<96x64xbf16>, vector<11x64xf32> -> vector<11x64xf32>
    %236 = vector.broadcast %26 : vector<1x64xf32> to vector<11x64xf32>
    %237 = arith.addf %235, %236 : vector<11x64xf32>
    %238 = arith.negf %237 : vector<11x64xf32>
    %239 = math.exp %238 : vector<11x64xf32>
    %cst_118 = arith.constant 1.000000e+00 : f32
    %240 = vector.broadcast %cst_118 : f32 to vector<11x64xf32>
    %241 = arith.addf %240, %239 : vector<11x64xf32>
    %242 = arith.divf %240, %241 : vector<11x64xf32>
    %243 = vector.extract_strided_slice %242 {offsets = [0, 0], sizes = [11, 32], strides = [1, 1]} : vector<11x64xf32> to vector<11x32xf32>
    %244 = vector.extract_strided_slice %242 {offsets = [0, 32], sizes = [11, 32], strides = [1, 1]} : vector<11x64xf32> to vector<11x32xf32>
    %245 = tpu.concatenate %232, %182 in 1 : vector<11x32xf32>, vector<11x32xf32> -> vector<11x64xf32>
    %246 = arith.truncf %245 : vector<11x64xf32> to vector<11x64xbf16>
    %cst_119 = arith.constant dense<0.000000e+00> : vector<11x32xf32>
    %247 = tpu.matmul %246, %27, %cst_119 {dimension_numbers = #tpu.dot_dimension_numbers<[1], [0], [0], [1], [0, 0, 1, 1], [], []>} : vector<11x64xbf16>, vector<64x32xbf16>, vector<11x32xf32> -> vector<11x32xf32>
    %248 = arith.mulf %144, %244 : vector<11x32xf32>
    %249 = arith.truncf %248 : vector<11x32xf32> to vector<11x32xbf16>
    %cst_120 = arith.constant dense<0.000000e+00> : vector<11x32xf32>
    %250 = tpu.matmul %249, %28, %cst_120 {dimension_numbers = #tpu.dot_dimension_numbers<[1], [0], [0], [1], [0, 0, 1, 1], [], []>} : vector<11x32xbf16>, vector<32x32xbf16>, vector<11x32xf32> -> vector<11x32xf32>
    %251 = arith.addf %247, %250 : vector<11x32xf32>
    %252 = vector.broadcast %29 : vector<1x32xf32> to vector<11x32xf32>
    %253 = arith.addf %251, %252 : vector<11x32xf32>
    %254 = math.tanh %253 : vector<11x32xf32>
    %255 = arith.mulf %254, %243 : vector<11x32xf32>
    %cst_121 = arith.constant 1.000000e+00 : f32
    %256 = vector.broadcast %cst_121 : f32 to vector<11x32xf32>
    %257 = arith.subf %256, %243 : vector<11x32xf32>
    %258 = arith.mulf %144, %257 : vector<11x32xf32>
    %259 = arith.addf %255, %258 : vector<11x32xf32>
    %c0_122 = arith.constant 0 : index
    %c0_123 = arith.constant 0 : index
    %260 = vector.load %arg12[%c0_122, %c0_123] : memref<12x11xbf16, #tpu.memory_space<vmem>>, vector<12x11xbf16>
    %261 = arith.truncf %259 : vector<11x32xf32> to vector<11x32xbf16>
    %cst_124 = arith.constant dense<0.000000e+00> : vector<12x32xf32>
    %262 = tpu.matmul %260, %261, %cst_124 {dimension_numbers = #tpu.dot_dimension_numbers<[1], [0], [0], [1], [0, 0, 1, 1], [], []>} : vector<12x11xbf16>, vector<11x32xbf16>, vector<12x32xf32> -> vector<12x32xf32>
    %c0_125 = arith.constant 0 : index
    %c0_126 = arith.constant 0 : index
    %263 = vector.load %arg32[%c0_125, %c0_126] : memref<32x128xbf16, #tpu.memory_space<vmem>>, vector<32x128xbf16>
    %264 = arith.truncf %262 : vector<12x32xf32> to vector<12x32xbf16>
    %cst_127 = arith.constant dense<0.000000e+00> : vector<12x128xf32>
    %265 = tpu.matmul %264, %263, %cst_127 {dimension_numbers = #tpu.dot_dimension_numbers<[1], [0], [0], [1], [0, 0, 1, 1], [], []>} : vector<12x32xbf16>, vector<32x128xbf16>, vector<12x128xf32> -> vector<12x128xf32>
    %c0_128 = arith.constant 0 : index
    %c0_129 = arith.constant 0 : index
    %266 = vector.load %arg34[%c0_128, %c0_129] : memref<1x128xf32, #tpu.memory_space<vmem>>, vector<1x128xf32>
    %267 = vector.broadcast %266 : vector<1x128xf32> to vector<12x128xf32>
    %268 = arith.addf %265, %267 : vector<12x128xf32>
    %c0_130 = arith.constant 0 : index
    %c0_131 = arith.constant 0 : index
    %269 = vector.load %arg33[%c0_130, %c0_131] : memref<32x128xbf16, #tpu.memory_space<vmem>>, vector<32x128xbf16>
    %cst_132 = arith.constant 0.000000e+00 : f32
    %270 = vector.broadcast %cst_132 : f32 to vector<2x32xf32>
    %cst_133 = arith.constant 0.000000e+00 : f32
    %271 = vector.broadcast %cst_133 : f32 to vector<2x32xf32>
    %272 = vector.extract_strided_slice %268 {offsets = [0, 0], sizes = [2, 128], strides = [1, 1]} : vector<12x128xf32> to vector<2x128xf32>
    %273 = arith.truncf %270 : vector<2x32xf32> to vector<2x32xbf16>
    %cst_134 = arith.constant dense<0.000000e+00> : vector<2x128xf32>
    %274 = tpu.matmul %273, %269, %cst_134 {dimension_numbers = #tpu.dot_dimension_numbers<[1], [0], [0], [1], [0, 0, 1, 1], [], []>} : vector<2x32xbf16>, vector<32x128xbf16>, vector<2x128xf32> -> vector<2x128xf32>
    %275 = arith.addf %272, %274 : vector<2x128xf32>
    %276 = vector.extract_strided_slice %275 {offsets = [0, 0], sizes = [2, 32], strides = [1, 1]} : vector<2x128xf32> to vector<2x32xf32>
    %277 = arith.negf %276 : vector<2x32xf32>
    %278 = math.exp %277 : vector<2x32xf32>
    %cst_135 = arith.constant 1.000000e+00 : f32
    %279 = vector.broadcast %cst_135 : f32 to vector<2x32xf32>
    %280 = arith.addf %279, %278 : vector<2x32xf32>
    %281 = arith.divf %279, %280 : vector<2x32xf32>
    %282 = vector.extract_strided_slice %275 {offsets = [0, 32], sizes = [2, 32], strides = [1, 1]} : vector<2x128xf32> to vector<2x32xf32>
    %283 = arith.negf %282 : vector<2x32xf32>
    %284 = math.exp %283 : vector<2x32xf32>
    %cst_136 = arith.constant 1.000000e+00 : f32
    %285 = vector.broadcast %cst_136 : f32 to vector<2x32xf32>
    %286 = arith.addf %285, %284 : vector<2x32xf32>
    %287 = arith.divf %285, %286 : vector<2x32xf32>
    %288 = vector.extract_strided_slice %275 {offsets = [0, 64], sizes = [2, 32], strides = [1, 1]} : vector<2x128xf32> to vector<2x32xf32>
    %289 = math.tanh %288 : vector<2x32xf32>
    %290 = vector.extract_strided_slice %275 {offsets = [0, 96], sizes = [2, 32], strides = [1, 1]} : vector<2x128xf32> to vector<2x32xf32>
    %291 = arith.negf %290 : vector<2x32xf32>
    %292 = math.exp %291 : vector<2x32xf32>
    %cst_137 = arith.constant 1.000000e+00 : f32
    %293 = vector.broadcast %cst_137 : f32 to vector<2x32xf32>
    %294 = arith.addf %293, %292 : vector<2x32xf32>
    %295 = arith.divf %293, %294 : vector<2x32xf32>
    %296 = arith.mulf %287, %271 : vector<2x32xf32>
    %297 = arith.mulf %281, %289 : vector<2x32xf32>
    %298 = arith.addf %296, %297 : vector<2x32xf32>
    %299 = math.tanh %298 : vector<2x32xf32>
    %300 = arith.mulf %295, %299 : vector<2x32xf32>
    %301 = vector.extract_strided_slice %268 {offsets = [2, 0], sizes = [2, 128], strides = [1, 1]} : vector<12x128xf32> to vector<2x128xf32>
    %302 = arith.truncf %300 : vector<2x32xf32> to vector<2x32xbf16>
    %cst_138 = arith.constant dense<0.000000e+00> : vector<2x128xf32>
    %303 = tpu.matmul %302, %269, %cst_138 {dimension_numbers = #tpu.dot_dimension_numbers<[1], [0], [0], [1], [0, 0, 1, 1], [], []>} : vector<2x32xbf16>, vector<32x128xbf16>, vector<2x128xf32> -> vector<2x128xf32>
    %304 = arith.addf %301, %303 : vector<2x128xf32>
    %305 = vector.extract_strided_slice %304 {offsets = [0, 0], sizes = [2, 32], strides = [1, 1]} : vector<2x128xf32> to vector<2x32xf32>
    %306 = arith.negf %305 : vector<2x32xf32>
    %307 = math.exp %306 : vector<2x32xf32>
    %cst_139 = arith.constant 1.000000e+00 : f32
    %308 = vector.broadcast %cst_139 : f32 to vector<2x32xf32>
    %309 = arith.addf %308, %307 : vector<2x32xf32>
    %310 = arith.divf %308, %309 : vector<2x32xf32>
    %311 = vector.extract_strided_slice %304 {offsets = [0, 32], sizes = [2, 32], strides = [1, 1]} : vector<2x128xf32> to vector<2x32xf32>
    %312 = arith.negf %311 : vector<2x32xf32>
    %313 = math.exp %312 : vector<2x32xf32>
    %cst_140 = arith.constant 1.000000e+00 : f32
    %314 = vector.broadcast %cst_140 : f32 to vector<2x32xf32>
    %315 = arith.addf %314, %313 : vector<2x32xf32>
    %316 = arith.divf %314, %315 : vector<2x32xf32>
    %317 = vector.extract_strided_slice %304 {offsets = [0, 64], sizes = [2, 32], strides = [1, 1]} : vector<2x128xf32> to vector<2x32xf32>
    %318 = math.tanh %317 : vector<2x32xf32>
    %319 = vector.extract_strided_slice %304 {offsets = [0, 96], sizes = [2, 32], strides = [1, 1]} : vector<2x128xf32> to vector<2x32xf32>
    %320 = arith.negf %319 : vector<2x32xf32>
    %321 = math.exp %320 : vector<2x32xf32>
    %cst_141 = arith.constant 1.000000e+00 : f32
    %322 = vector.broadcast %cst_141 : f32 to vector<2x32xf32>
    %323 = arith.addf %322, %321 : vector<2x32xf32>
    %324 = arith.divf %322, %323 : vector<2x32xf32>
    %325 = arith.mulf %316, %298 : vector<2x32xf32>
    %326 = arith.mulf %310, %318 : vector<2x32xf32>
    %327 = arith.addf %325, %326 : vector<2x32xf32>
    %328 = math.tanh %327 : vector<2x32xf32>
    %329 = arith.mulf %324, %328 : vector<2x32xf32>
    %330 = vector.extract_strided_slice %268 {offsets = [4, 0], sizes = [2, 128], strides = [1, 1]} : vector<12x128xf32> to vector<2x128xf32>
    %331 = arith.truncf %329 : vector<2x32xf32> to vector<2x32xbf16>
    %cst_142 = arith.constant dense<0.000000e+00> : vector<2x128xf32>
    %332 = tpu.matmul %331, %269, %cst_142 {dimension_numbers = #tpu.dot_dimension_numbers<[1], [0], [0], [1], [0, 0, 1, 1], [], []>} : vector<2x32xbf16>, vector<32x128xbf16>, vector<2x128xf32> -> vector<2x128xf32>
    %333 = arith.addf %330, %332 : vector<2x128xf32>
    %334 = vector.extract_strided_slice %333 {offsets = [0, 0], sizes = [2, 32], strides = [1, 1]} : vector<2x128xf32> to vector<2x32xf32>
    %335 = arith.negf %334 : vector<2x32xf32>
    %336 = math.exp %335 : vector<2x32xf32>
    %cst_143 = arith.constant 1.000000e+00 : f32
    %337 = vector.broadcast %cst_143 : f32 to vector<2x32xf32>
    %338 = arith.addf %337, %336 : vector<2x32xf32>
    %339 = arith.divf %337, %338 : vector<2x32xf32>
    %340 = vector.extract_strided_slice %333 {offsets = [0, 32], sizes = [2, 32], strides = [1, 1]} : vector<2x128xf32> to vector<2x32xf32>
    %341 = arith.negf %340 : vector<2x32xf32>
    %342 = math.exp %341 : vector<2x32xf32>
    %cst_144 = arith.constant 1.000000e+00 : f32
    %343 = vector.broadcast %cst_144 : f32 to vector<2x32xf32>
    %344 = arith.addf %343, %342 : vector<2x32xf32>
    %345 = arith.divf %343, %344 : vector<2x32xf32>
    %346 = vector.extract_strided_slice %333 {offsets = [0, 64], sizes = [2, 32], strides = [1, 1]} : vector<2x128xf32> to vector<2x32xf32>
    %347 = math.tanh %346 : vector<2x32xf32>
    %348 = vector.extract_strided_slice %333 {offsets = [0, 96], sizes = [2, 32], strides = [1, 1]} : vector<2x128xf32> to vector<2x32xf32>
    %349 = arith.negf %348 : vector<2x32xf32>
    %350 = math.exp %349 : vector<2x32xf32>
    %cst_145 = arith.constant 1.000000e+00 : f32
    %351 = vector.broadcast %cst_145 : f32 to vector<2x32xf32>
    %352 = arith.addf %351, %350 : vector<2x32xf32>
    %353 = arith.divf %351, %352 : vector<2x32xf32>
    %354 = arith.mulf %345, %327 : vector<2x32xf32>
    %355 = arith.mulf %339, %347 : vector<2x32xf32>
    %356 = arith.addf %354, %355 : vector<2x32xf32>
    %357 = math.tanh %356 : vector<2x32xf32>
    %358 = arith.mulf %353, %357 : vector<2x32xf32>
    %359 = vector.extract_strided_slice %268 {offsets = [6, 0], sizes = [2, 128], strides = [1, 1]} : vector<12x128xf32> to vector<2x128xf32>
    %360 = arith.truncf %358 : vector<2x32xf32> to vector<2x32xbf16>
    %cst_146 = arith.constant dense<0.000000e+00> : vector<2x128xf32>
    %361 = tpu.matmul %360, %269, %cst_146 {dimension_numbers = #tpu.dot_dimension_numbers<[1], [0], [0], [1], [0, 0, 1, 1], [], []>} : vector<2x32xbf16>, vector<32x128xbf16>, vector<2x128xf32> -> vector<2x128xf32>
    %362 = arith.addf %359, %361 : vector<2x128xf32>
    %363 = vector.extract_strided_slice %362 {offsets = [0, 0], sizes = [2, 32], strides = [1, 1]} : vector<2x128xf32> to vector<2x32xf32>
    %364 = arith.negf %363 : vector<2x32xf32>
    %365 = math.exp %364 : vector<2x32xf32>
    %cst_147 = arith.constant 1.000000e+00 : f32
    %366 = vector.broadcast %cst_147 : f32 to vector<2x32xf32>
    %367 = arith.addf %366, %365 : vector<2x32xf32>
    %368 = arith.divf %366, %367 : vector<2x32xf32>
    %369 = vector.extract_strided_slice %362 {offsets = [0, 32], sizes = [2, 32], strides = [1, 1]} : vector<2x128xf32> to vector<2x32xf32>
    %370 = arith.negf %369 : vector<2x32xf32>
    %371 = math.exp %370 : vector<2x32xf32>
    %cst_148 = arith.constant 1.000000e+00 : f32
    %372 = vector.broadcast %cst_148 : f32 to vector<2x32xf32>
    %373 = arith.addf %372, %371 : vector<2x32xf32>
    %374 = arith.divf %372, %373 : vector<2x32xf32>
    %375 = vector.extract_strided_slice %362 {offsets = [0, 64], sizes = [2, 32], strides = [1, 1]} : vector<2x128xf32> to vector<2x32xf32>
    %376 = math.tanh %375 : vector<2x32xf32>
    %377 = vector.extract_strided_slice %362 {offsets = [0, 96], sizes = [2, 32], strides = [1, 1]} : vector<2x128xf32> to vector<2x32xf32>
    %378 = arith.negf %377 : vector<2x32xf32>
    %379 = math.exp %378 : vector<2x32xf32>
    %cst_149 = arith.constant 1.000000e+00 : f32
    %380 = vector.broadcast %cst_149 : f32 to vector<2x32xf32>
    %381 = arith.addf %380, %379 : vector<2x32xf32>
    %382 = arith.divf %380, %381 : vector<2x32xf32>
    %383 = arith.mulf %374, %356 : vector<2x32xf32>
    %384 = arith.mulf %368, %376 : vector<2x32xf32>
    %385 = arith.addf %383, %384 : vector<2x32xf32>
    %386 = math.tanh %385 : vector<2x32xf32>
    %387 = arith.mulf %382, %386 : vector<2x32xf32>
    %388 = vector.extract_strided_slice %268 {offsets = [8, 0], sizes = [2, 128], strides = [1, 1]} : vector<12x128xf32> to vector<2x128xf32>
    %389 = arith.truncf %387 : vector<2x32xf32> to vector<2x32xbf16>
    %cst_150 = arith.constant dense<0.000000e+00> : vector<2x128xf32>
    %390 = tpu.matmul %389, %269, %cst_150 {dimension_numbers = #tpu.dot_dimension_numbers<[1], [0], [0], [1], [0, 0, 1, 1], [], []>} : vector<2x32xbf16>, vector<32x128xbf16>, vector<2x128xf32> -> vector<2x128xf32>
    %391 = arith.addf %388, %390 : vector<2x128xf32>
    %392 = vector.extract_strided_slice %391 {offsets = [0, 0], sizes = [2, 32], strides = [1, 1]} : vector<2x128xf32> to vector<2x32xf32>
    %393 = arith.negf %392 : vector<2x32xf32>
    %394 = math.exp %393 : vector<2x32xf32>
    %cst_151 = arith.constant 1.000000e+00 : f32
    %395 = vector.broadcast %cst_151 : f32 to vector<2x32xf32>
    %396 = arith.addf %395, %394 : vector<2x32xf32>
    %397 = arith.divf %395, %396 : vector<2x32xf32>
    %398 = vector.extract_strided_slice %391 {offsets = [0, 32], sizes = [2, 32], strides = [1, 1]} : vector<2x128xf32> to vector<2x32xf32>
    %399 = arith.negf %398 : vector<2x32xf32>
    %400 = math.exp %399 : vector<2x32xf32>
    %cst_152 = arith.constant 1.000000e+00 : f32
    %401 = vector.broadcast %cst_152 : f32 to vector<2x32xf32>
    %402 = arith.addf %401, %400 : vector<2x32xf32>
    %403 = arith.divf %401, %402 : vector<2x32xf32>
    %404 = vector.extract_strided_slice %391 {offsets = [0, 64], sizes = [2, 32], strides = [1, 1]} : vector<2x128xf32> to vector<2x32xf32>
    %405 = math.tanh %404 : vector<2x32xf32>
    %406 = vector.extract_strided_slice %391 {offsets = [0, 96], sizes = [2, 32], strides = [1, 1]} : vector<2x128xf32> to vector<2x32xf32>
    %407 = arith.negf %406 : vector<2x32xf32>
    %408 = math.exp %407 : vector<2x32xf32>
    %cst_153 = arith.constant 1.000000e+00 : f32
    %409 = vector.broadcast %cst_153 : f32 to vector<2x32xf32>
    %410 = arith.addf %409, %408 : vector<2x32xf32>
    %411 = arith.divf %409, %410 : vector<2x32xf32>
    %412 = arith.mulf %403, %385 : vector<2x32xf32>
    %413 = arith.mulf %397, %405 : vector<2x32xf32>
    %414 = arith.addf %412, %413 : vector<2x32xf32>
    %415 = math.tanh %414 : vector<2x32xf32>
    %416 = arith.mulf %411, %415 : vector<2x32xf32>
    %417 = vector.extract_strided_slice %268 {offsets = [10, 0], sizes = [2, 128], strides = [1, 1]} : vector<12x128xf32> to vector<2x128xf32>
    %418 = arith.truncf %416 : vector<2x32xf32> to vector<2x32xbf16>
    %cst_154 = arith.constant dense<0.000000e+00> : vector<2x128xf32>
    %419 = tpu.matmul %418, %269, %cst_154 {dimension_numbers = #tpu.dot_dimension_numbers<[1], [0], [0], [1], [0, 0, 1, 1], [], []>} : vector<2x32xbf16>, vector<32x128xbf16>, vector<2x128xf32> -> vector<2x128xf32>
    %420 = arith.addf %417, %419 : vector<2x128xf32>
    %421 = vector.extract_strided_slice %420 {offsets = [0, 0], sizes = [2, 32], strides = [1, 1]} : vector<2x128xf32> to vector<2x32xf32>
    %422 = arith.negf %421 : vector<2x32xf32>
    %423 = math.exp %422 : vector<2x32xf32>
    %cst_155 = arith.constant 1.000000e+00 : f32
    %424 = vector.broadcast %cst_155 : f32 to vector<2x32xf32>
    %425 = arith.addf %424, %423 : vector<2x32xf32>
    %426 = arith.divf %424, %425 : vector<2x32xf32>
    %427 = vector.extract_strided_slice %420 {offsets = [0, 32], sizes = [2, 32], strides = [1, 1]} : vector<2x128xf32> to vector<2x32xf32>
    %428 = arith.negf %427 : vector<2x32xf32>
    %429 = math.exp %428 : vector<2x32xf32>
    %cst_156 = arith.constant 1.000000e+00 : f32
    %430 = vector.broadcast %cst_156 : f32 to vector<2x32xf32>
    %431 = arith.addf %430, %429 : vector<2x32xf32>
    %432 = arith.divf %430, %431 : vector<2x32xf32>
    %433 = vector.extract_strided_slice %420 {offsets = [0, 64], sizes = [2, 32], strides = [1, 1]} : vector<2x128xf32> to vector<2x32xf32>
    %434 = math.tanh %433 : vector<2x32xf32>
    %435 = vector.extract_strided_slice %420 {offsets = [0, 96], sizes = [2, 32], strides = [1, 1]} : vector<2x128xf32> to vector<2x32xf32>
    %436 = arith.negf %435 : vector<2x32xf32>
    %437 = math.exp %436 : vector<2x32xf32>
    %cst_157 = arith.constant 1.000000e+00 : f32
    %438 = vector.broadcast %cst_157 : f32 to vector<2x32xf32>
    %439 = arith.addf %438, %437 : vector<2x32xf32>
    %440 = arith.divf %438, %439 : vector<2x32xf32>
    %441 = arith.mulf %432, %414 : vector<2x32xf32>
    %442 = arith.mulf %426, %434 : vector<2x32xf32>
    %443 = arith.addf %441, %442 : vector<2x32xf32>
    %444 = math.tanh %443 : vector<2x32xf32>
    %445 = arith.mulf %440, %444 : vector<2x32xf32>
    %446 = tpu.concatenate %300, %329, %358, %387, %416, %445 in 0 : vector<2x32xf32>, vector<2x32xf32>, vector<2x32xf32>, vector<2x32xf32>, vector<2x32xf32>, vector<2x32xf32> -> vector<12x32xf32>
    %c0_158 = arith.constant 0 : index
    %c0_159 = arith.constant 0 : index
    %447 = vector.load %arg35[%c0_158, %c0_159] : memref<32x128xbf16, #tpu.memory_space<vmem>>, vector<32x128xbf16>
    %448 = arith.truncf %262 : vector<12x32xf32> to vector<12x32xbf16>
    %cst_160 = arith.constant dense<0.000000e+00> : vector<12x128xf32>
    %449 = tpu.matmul %448, %447, %cst_160 {dimension_numbers = #tpu.dot_dimension_numbers<[1], [0], [0], [1], [0, 0, 1, 1], [], []>} : vector<12x32xbf16>, vector<32x128xbf16>, vector<12x128xf32> -> vector<12x128xf32>
    %c0_161 = arith.constant 0 : index
    %c0_162 = arith.constant 0 : index
    %450 = vector.load %arg37[%c0_161, %c0_162] : memref<1x128xf32, #tpu.memory_space<vmem>>, vector<1x128xf32>
    %451 = vector.broadcast %450 : vector<1x128xf32> to vector<12x128xf32>
    %452 = arith.addf %449, %451 : vector<12x128xf32>
    %c0_163 = arith.constant 0 : index
    %c0_164 = arith.constant 0 : index
    %453 = vector.load %arg36[%c0_163, %c0_164] : memref<32x128xbf16, #tpu.memory_space<vmem>>, vector<32x128xbf16>
    %cst_165 = arith.constant 0.000000e+00 : f32
    %454 = vector.broadcast %cst_165 : f32 to vector<2x32xf32>
    %cst_166 = arith.constant 0.000000e+00 : f32
    %455 = vector.broadcast %cst_166 : f32 to vector<2x32xf32>
    %456 = vector.extract_strided_slice %452 {offsets = [10, 0], sizes = [2, 128], strides = [1, 1]} : vector<12x128xf32> to vector<2x128xf32>
    %457 = arith.truncf %454 : vector<2x32xf32> to vector<2x32xbf16>
    %cst_167 = arith.constant dense<0.000000e+00> : vector<2x128xf32>
    %458 = tpu.matmul %457, %453, %cst_167 {dimension_numbers = #tpu.dot_dimension_numbers<[1], [0], [0], [1], [0, 0, 1, 1], [], []>} : vector<2x32xbf16>, vector<32x128xbf16>, vector<2x128xf32> -> vector<2x128xf32>
    %459 = arith.addf %456, %458 : vector<2x128xf32>
    %460 = vector.extract_strided_slice %459 {offsets = [0, 0], sizes = [2, 32], strides = [1, 1]} : vector<2x128xf32> to vector<2x32xf32>
    %461 = arith.negf %460 : vector<2x32xf32>
    %462 = math.exp %461 : vector<2x32xf32>
    %cst_168 = arith.constant 1.000000e+00 : f32
    %463 = vector.broadcast %cst_168 : f32 to vector<2x32xf32>
    %464 = arith.addf %463, %462 : vector<2x32xf32>
    %465 = arith.divf %463, %464 : vector<2x32xf32>
    %466 = vector.extract_strided_slice %459 {offsets = [0, 32], sizes = [2, 32], strides = [1, 1]} : vector<2x128xf32> to vector<2x32xf32>
    %467 = arith.negf %466 : vector<2x32xf32>
    %468 = math.exp %467 : vector<2x32xf32>
    %cst_169 = arith.constant 1.000000e+00 : f32
    %469 = vector.broadcast %cst_169 : f32 to vector<2x32xf32>
    %470 = arith.addf %469, %468 : vector<2x32xf32>
    %471 = arith.divf %469, %470 : vector<2x32xf32>
    %472 = vector.extract_strided_slice %459 {offsets = [0, 64], sizes = [2, 32], strides = [1, 1]} : vector<2x128xf32> to vector<2x32xf32>
    %473 = math.tanh %472 : vector<2x32xf32>
    %474 = vector.extract_strided_slice %459 {offsets = [0, 96], sizes = [2, 32], strides = [1, 1]} : vector<2x128xf32> to vector<2x32xf32>
    %475 = arith.negf %474 : vector<2x32xf32>
    %476 = math.exp %475 : vector<2x32xf32>
    %cst_170 = arith.constant 1.000000e+00 : f32
    %477 = vector.broadcast %cst_170 : f32 to vector<2x32xf32>
    %478 = arith.addf %477, %476 : vector<2x32xf32>
    %479 = arith.divf %477, %478 : vector<2x32xf32>
    %480 = arith.mulf %471, %455 : vector<2x32xf32>
    %481 = arith.mulf %465, %473 : vector<2x32xf32>
    %482 = arith.addf %480, %481 : vector<2x32xf32>
    %483 = math.tanh %482 : vector<2x32xf32>
    %484 = arith.mulf %479, %483 : vector<2x32xf32>
    %485 = vector.extract_strided_slice %452 {offsets = [8, 0], sizes = [2, 128], strides = [1, 1]} : vector<12x128xf32> to vector<2x128xf32>
    %486 = arith.truncf %484 : vector<2x32xf32> to vector<2x32xbf16>
    %cst_171 = arith.constant dense<0.000000e+00> : vector<2x128xf32>
    %487 = tpu.matmul %486, %453, %cst_171 {dimension_numbers = #tpu.dot_dimension_numbers<[1], [0], [0], [1], [0, 0, 1, 1], [], []>} : vector<2x32xbf16>, vector<32x128xbf16>, vector<2x128xf32> -> vector<2x128xf32>
    %488 = arith.addf %485, %487 : vector<2x128xf32>
    %489 = vector.extract_strided_slice %488 {offsets = [0, 0], sizes = [2, 32], strides = [1, 1]} : vector<2x128xf32> to vector<2x32xf32>
    %490 = arith.negf %489 : vector<2x32xf32>
    %491 = math.exp %490 : vector<2x32xf32>
    %cst_172 = arith.constant 1.000000e+00 : f32
    %492 = vector.broadcast %cst_172 : f32 to vector<2x32xf32>
    %493 = arith.addf %492, %491 : vector<2x32xf32>
    %494 = arith.divf %492, %493 : vector<2x32xf32>
    %495 = vector.extract_strided_slice %488 {offsets = [0, 32], sizes = [2, 32], strides = [1, 1]} : vector<2x128xf32> to vector<2x32xf32>
    %496 = arith.negf %495 : vector<2x32xf32>
    %497 = math.exp %496 : vector<2x32xf32>
    %cst_173 = arith.constant 1.000000e+00 : f32
    %498 = vector.broadcast %cst_173 : f32 to vector<2x32xf32>
    %499 = arith.addf %498, %497 : vector<2x32xf32>
    %500 = arith.divf %498, %499 : vector<2x32xf32>
    %501 = vector.extract_strided_slice %488 {offsets = [0, 64], sizes = [2, 32], strides = [1, 1]} : vector<2x128xf32> to vector<2x32xf32>
    %502 = math.tanh %501 : vector<2x32xf32>
    %503 = vector.extract_strided_slice %488 {offsets = [0, 96], sizes = [2, 32], strides = [1, 1]} : vector<2x128xf32> to vector<2x32xf32>
    %504 = arith.negf %503 : vector<2x32xf32>
    %505 = math.exp %504 : vector<2x32xf32>
    %cst_174 = arith.constant 1.000000e+00 : f32
    %506 = vector.broadcast %cst_174 : f32 to vector<2x32xf32>
    %507 = arith.addf %506, %505 : vector<2x32xf32>
    %508 = arith.divf %506, %507 : vector<2x32xf32>
    %509 = arith.mulf %500, %482 : vector<2x32xf32>
    %510 = arith.mulf %494, %502 : vector<2x32xf32>
    %511 = arith.addf %509, %510 : vector<2x32xf32>
    %512 = math.tanh %511 : vector<2x32xf32>
    %513 = arith.mulf %508, %512 : vector<2x32xf32>
    %514 = vector.extract_strided_slice %452 {offsets = [6, 0], sizes = [2, 128], strides = [1, 1]} : vector<12x128xf32> to vector<2x128xf32>
    %515 = arith.truncf %513 : vector<2x32xf32> to vector<2x32xbf16>
    %cst_175 = arith.constant dense<0.000000e+00> : vector<2x128xf32>
    %516 = tpu.matmul %515, %453, %cst_175 {dimension_numbers = #tpu.dot_dimension_numbers<[1], [0], [0], [1], [0, 0, 1, 1], [], []>} : vector<2x32xbf16>, vector<32x128xbf16>, vector<2x128xf32> -> vector<2x128xf32>
    %517 = arith.addf %514, %516 : vector<2x128xf32>
    %518 = vector.extract_strided_slice %517 {offsets = [0, 0], sizes = [2, 32], strides = [1, 1]} : vector<2x128xf32> to vector<2x32xf32>
    %519 = arith.negf %518 : vector<2x32xf32>
    %520 = math.exp %519 : vector<2x32xf32>
    %cst_176 = arith.constant 1.000000e+00 : f32
    %521 = vector.broadcast %cst_176 : f32 to vector<2x32xf32>
    %522 = arith.addf %521, %520 : vector<2x32xf32>
    %523 = arith.divf %521, %522 : vector<2x32xf32>
    %524 = vector.extract_strided_slice %517 {offsets = [0, 32], sizes = [2, 32], strides = [1, 1]} : vector<2x128xf32> to vector<2x32xf32>
    %525 = arith.negf %524 : vector<2x32xf32>
    %526 = math.exp %525 : vector<2x32xf32>
    %cst_177 = arith.constant 1.000000e+00 : f32
    %527 = vector.broadcast %cst_177 : f32 to vector<2x32xf32>
    %528 = arith.addf %527, %526 : vector<2x32xf32>
    %529 = arith.divf %527, %528 : vector<2x32xf32>
    %530 = vector.extract_strided_slice %517 {offsets = [0, 64], sizes = [2, 32], strides = [1, 1]} : vector<2x128xf32> to vector<2x32xf32>
    %531 = math.tanh %530 : vector<2x32xf32>
    %532 = vector.extract_strided_slice %517 {offsets = [0, 96], sizes = [2, 32], strides = [1, 1]} : vector<2x128xf32> to vector<2x32xf32>
    %533 = arith.negf %532 : vector<2x32xf32>
    %534 = math.exp %533 : vector<2x32xf32>
    %cst_178 = arith.constant 1.000000e+00 : f32
    %535 = vector.broadcast %cst_178 : f32 to vector<2x32xf32>
    %536 = arith.addf %535, %534 : vector<2x32xf32>
    %537 = arith.divf %535, %536 : vector<2x32xf32>
    %538 = arith.mulf %529, %511 : vector<2x32xf32>
    %539 = arith.mulf %523, %531 : vector<2x32xf32>
    %540 = arith.addf %538, %539 : vector<2x32xf32>
    %541 = math.tanh %540 : vector<2x32xf32>
    %542 = arith.mulf %537, %541 : vector<2x32xf32>
    %543 = vector.extract_strided_slice %452 {offsets = [4, 0], sizes = [2, 128], strides = [1, 1]} : vector<12x128xf32> to vector<2x128xf32>
    %544 = arith.truncf %542 : vector<2x32xf32> to vector<2x32xbf16>
    %cst_179 = arith.constant dense<0.000000e+00> : vector<2x128xf32>
    %545 = tpu.matmul %544, %453, %cst_179 {dimension_numbers = #tpu.dot_dimension_numbers<[1], [0], [0], [1], [0, 0, 1, 1], [], []>} : vector<2x32xbf16>, vector<32x128xbf16>, vector<2x128xf32> -> vector<2x128xf32>
    %546 = arith.addf %543, %545 : vector<2x128xf32>
    %547 = vector.extract_strided_slice %546 {offsets = [0, 0], sizes = [2, 32], strides = [1, 1]} : vector<2x128xf32> to vector<2x32xf32>
    %548 = arith.negf %547 : vector<2x32xf32>
    %549 = math.exp %548 : vector<2x32xf32>
    %cst_180 = arith.constant 1.000000e+00 : f32
    %550 = vector.broadcast %cst_180 : f32 to vector<2x32xf32>
    %551 = arith.addf %550, %549 : vector<2x32xf32>
    %552 = arith.divf %550, %551 : vector<2x32xf32>
    %553 = vector.extract_strided_slice %546 {offsets = [0, 32], sizes = [2, 32], strides = [1, 1]} : vector<2x128xf32> to vector<2x32xf32>
    %554 = arith.negf %553 : vector<2x32xf32>
    %555 = math.exp %554 : vector<2x32xf32>
    %cst_181 = arith.constant 1.000000e+00 : f32
    %556 = vector.broadcast %cst_181 : f32 to vector<2x32xf32>
    %557 = arith.addf %556, %555 : vector<2x32xf32>
    %558 = arith.divf %556, %557 : vector<2x32xf32>
    %559 = vector.extract_strided_slice %546 {offsets = [0, 64], sizes = [2, 32], strides = [1, 1]} : vector<2x128xf32> to vector<2x32xf32>
    %560 = math.tanh %559 : vector<2x32xf32>
    %561 = vector.extract_strided_slice %546 {offsets = [0, 96], sizes = [2, 32], strides = [1, 1]} : vector<2x128xf32> to vector<2x32xf32>
    %562 = arith.negf %561 : vector<2x32xf32>
    %563 = math.exp %562 : vector<2x32xf32>
    %cst_182 = arith.constant 1.000000e+00 : f32
    %564 = vector.broadcast %cst_182 : f32 to vector<2x32xf32>
    %565 = arith.addf %564, %563 : vector<2x32xf32>
    %566 = arith.divf %564, %565 : vector<2x32xf32>
    %567 = arith.mulf %558, %540 : vector<2x32xf32>
    %568 = arith.mulf %552, %560 : vector<2x32xf32>
    %569 = arith.addf %567, %568 : vector<2x32xf32>
    %570 = math.tanh %569 : vector<2x32xf32>
    %571 = arith.mulf %566, %570 : vector<2x32xf32>
    %572 = vector.extract_strided_slice %452 {offsets = [2, 0], sizes = [2, 128], strides = [1, 1]} : vector<12x128xf32> to vector<2x128xf32>
    %573 = arith.truncf %571 : vector<2x32xf32> to vector<2x32xbf16>
    %cst_183 = arith.constant dense<0.000000e+00> : vector<2x128xf32>
    %574 = tpu.matmul %573, %453, %cst_183 {dimension_numbers = #tpu.dot_dimension_numbers<[1], [0], [0], [1], [0, 0, 1, 1], [], []>} : vector<2x32xbf16>, vector<32x128xbf16>, vector<2x128xf32> -> vector<2x128xf32>
    %575 = arith.addf %572, %574 : vector<2x128xf32>
    %576 = vector.extract_strided_slice %575 {offsets = [0, 0], sizes = [2, 32], strides = [1, 1]} : vector<2x128xf32> to vector<2x32xf32>
    %577 = arith.negf %576 : vector<2x32xf32>
    %578 = math.exp %577 : vector<2x32xf32>
    %cst_184 = arith.constant 1.000000e+00 : f32
    %579 = vector.broadcast %cst_184 : f32 to vector<2x32xf32>
    %580 = arith.addf %579, %578 : vector<2x32xf32>
    %581 = arith.divf %579, %580 : vector<2x32xf32>
    %582 = vector.extract_strided_slice %575 {offsets = [0, 32], sizes = [2, 32], strides = [1, 1]} : vector<2x128xf32> to vector<2x32xf32>
    %583 = arith.negf %582 : vector<2x32xf32>
    %584 = math.exp %583 : vector<2x32xf32>
    %cst_185 = arith.constant 1.000000e+00 : f32
    %585 = vector.broadcast %cst_185 : f32 to vector<2x32xf32>
    %586 = arith.addf %585, %584 : vector<2x32xf32>
    %587 = arith.divf %585, %586 : vector<2x32xf32>
    %588 = vector.extract_strided_slice %575 {offsets = [0, 64], sizes = [2, 32], strides = [1, 1]} : vector<2x128xf32> to vector<2x32xf32>
    %589 = math.tanh %588 : vector<2x32xf32>
    %590 = vector.extract_strided_slice %575 {offsets = [0, 96], sizes = [2, 32], strides = [1, 1]} : vector<2x128xf32> to vector<2x32xf32>
    %591 = arith.negf %590 : vector<2x32xf32>
    %592 = math.exp %591 : vector<2x32xf32>
    %cst_186 = arith.constant 1.000000e+00 : f32
    %593 = vector.broadcast %cst_186 : f32 to vector<2x32xf32>
    %594 = arith.addf %593, %592 : vector<2x32xf32>
    %595 = arith.divf %593, %594 : vector<2x32xf32>
    %596 = arith.mulf %587, %569 : vector<2x32xf32>
    %597 = arith.mulf %581, %589 : vector<2x32xf32>
    %598 = arith.addf %596, %597 : vector<2x32xf32>
    %599 = math.tanh %598 : vector<2x32xf32>
    %600 = arith.mulf %595, %599 : vector<2x32xf32>
    %601 = vector.extract_strided_slice %452 {offsets = [0, 0], sizes = [2, 128], strides = [1, 1]} : vector<12x128xf32> to vector<2x128xf32>
    %602 = arith.truncf %600 : vector<2x32xf32> to vector<2x32xbf16>
    %cst_187 = arith.constant dense<0.000000e+00> : vector<2x128xf32>
    %603 = tpu.matmul %602, %453, %cst_187 {dimension_numbers = #tpu.dot_dimension_numbers<[1], [0], [0], [1], [0, 0, 1, 1], [], []>} : vector<2x32xbf16>, vector<32x128xbf16>, vector<2x128xf32> -> vector<2x128xf32>
    %604 = arith.addf %601, %603 : vector<2x128xf32>
    %605 = vector.extract_strided_slice %604 {offsets = [0, 0], sizes = [2, 32], strides = [1, 1]} : vector<2x128xf32> to vector<2x32xf32>
    %606 = arith.negf %605 : vector<2x32xf32>
    %607 = math.exp %606 : vector<2x32xf32>
    %cst_188 = arith.constant 1.000000e+00 : f32
    %608 = vector.broadcast %cst_188 : f32 to vector<2x32xf32>
    %609 = arith.addf %608, %607 : vector<2x32xf32>
    %610 = arith.divf %608, %609 : vector<2x32xf32>
    %611 = vector.extract_strided_slice %604 {offsets = [0, 32], sizes = [2, 32], strides = [1, 1]} : vector<2x128xf32> to vector<2x32xf32>
    %612 = arith.negf %611 : vector<2x32xf32>
    %613 = math.exp %612 : vector<2x32xf32>
    %cst_189 = arith.constant 1.000000e+00 : f32
    %614 = vector.broadcast %cst_189 : f32 to vector<2x32xf32>
    %615 = arith.addf %614, %613 : vector<2x32xf32>
    %616 = arith.divf %614, %615 : vector<2x32xf32>
    %617 = vector.extract_strided_slice %604 {offsets = [0, 64], sizes = [2, 32], strides = [1, 1]} : vector<2x128xf32> to vector<2x32xf32>
    %618 = math.tanh %617 : vector<2x32xf32>
    %619 = vector.extract_strided_slice %604 {offsets = [0, 96], sizes = [2, 32], strides = [1, 1]} : vector<2x128xf32> to vector<2x32xf32>
    %620 = arith.negf %619 : vector<2x32xf32>
    %621 = math.exp %620 : vector<2x32xf32>
    %cst_190 = arith.constant 1.000000e+00 : f32
    %622 = vector.broadcast %cst_190 : f32 to vector<2x32xf32>
    %623 = arith.addf %622, %621 : vector<2x32xf32>
    %624 = arith.divf %622, %623 : vector<2x32xf32>
    %625 = arith.mulf %616, %598 : vector<2x32xf32>
    %626 = arith.mulf %610, %618 : vector<2x32xf32>
    %627 = arith.addf %625, %626 : vector<2x32xf32>
    %628 = math.tanh %627 : vector<2x32xf32>
    %629 = arith.mulf %624, %628 : vector<2x32xf32>
    %630 = tpu.concatenate %629, %600, %571, %542, %513, %484 in 0 : vector<2x32xf32>, vector<2x32xf32>, vector<2x32xf32>, vector<2x32xf32>, vector<2x32xf32>, vector<2x32xf32> -> vector<12x32xf32>
    %631 = tpu.concatenate %446, %630 in 1 : vector<12x32xf32>, vector<12x32xf32> -> vector<12x64xf32>
    %c0_191 = arith.constant 0 : index
    %c0_192 = arith.constant 0 : index
    %632 = vector.load %arg13[%c0_191, %c0_192] : memref<12x1xf32, #tpu.memory_space<vmem>>, vector<12x1xf32>
    %633 = vector.broadcast %632 : vector<12x1xf32> to vector<12x64xf32>
    %634 = arith.mulf %631, %633 : vector<12x64xf32>
    %c0_193 = arith.constant 0 : index
    %c0_194 = arith.constant 0 : index
    %635 = vector.load %arg38[%c0_193, %c0_194] : memref<64x64xbf16, #tpu.memory_space<vmem>>, vector<64x64xbf16>
    %636 = arith.truncf %634 : vector<12x64xf32> to vector<12x64xbf16>
    %cst_195 = arith.constant dense<0.000000e+00> : vector<12x64xf32>
    %637 = tpu.matmul %636, %635, %cst_195 {dimension_numbers = #tpu.dot_dimension_numbers<[1], [0], [0], [1], [0, 0, 1, 1], [], []>} : vector<12x64xbf16>, vector<64x64xbf16>, vector<12x64xf32> -> vector<12x64xf32>
    %c0_196 = arith.constant 0 : index
    %c0_197 = arith.constant 0 : index
    %638 = vector.load %arg39[%c0_196, %c0_197] : memref<1x64xf32, #tpu.memory_space<vmem>>, vector<1x64xf32>
    %639 = vector.broadcast %638 : vector<1x64xf32> to vector<12x64xf32>
    %640 = arith.addf %637, %639 : vector<12x64xf32>
    %641 = math.tanh %640 : vector<12x64xf32>
    %c0_198 = arith.constant 0 : index
    %c0_199 = arith.constant 0 : index
    %642 = vector.load %arg40[%c0_198, %c0_199] : memref<64x1xbf16, #tpu.memory_space<vmem>>, vector<64x1xbf16>
    %643 = arith.truncf %641 : vector<12x64xf32> to vector<12x64xbf16>
    %cst_200 = arith.constant dense<0.000000e+00> : vector<12x1xf32>
    %644 = tpu.matmul %643, %642, %cst_200 {dimension_numbers = #tpu.dot_dimension_numbers<[1], [0], [0], [1], [0, 0, 1, 1], [], []>} : vector<12x64xbf16>, vector<64x1xbf16>, vector<12x1xf32> -> vector<12x1xf32>
    %c0_201 = arith.constant 0 : index
    %c0_202 = arith.constant 0 : index
    %645 = vector.load %arg41[%c0_201, %c0_202] : memref<1x1xf32, #tpu.memory_space<vmem>>, vector<1x1xf32>
    %646 = vector.broadcast %645 : vector<1x1xf32> to vector<12x1xf32>
    %647 = arith.addf %644, %646 : vector<12x1xf32>
    %cst_203 = arith.constant dense<0xFF800000> : vector<1xf32>
    %648 = vector.multi_reduction <maximumf>, %647, %cst_203 [0] : vector<12x1xf32> to vector<1xf32>
    %649 = vector.shape_cast %648 : vector<1xf32> to vector<1x1xf32>
    %650 = vector.broadcast %649 : vector<1x1xf32> to vector<12x1xf32>
    %651 = arith.subf %647, %650 : vector<12x1xf32>
    %652 = math.exp %651 : vector<12x1xf32>
    %c0_204 = arith.constant 0 : index
    %c0_205 = arith.constant 0 : index
    %653 = vector.load %arg14[%c0_204, %c0_205] : memref<2x12xbf16, #tpu.memory_space<vmem>>, vector<2x12xbf16>
    %654 = arith.truncf %652 : vector<12x1xf32> to vector<12x1xbf16>
    %cst_206 = arith.constant dense<0.000000e+00> : vector<2x1xf32>
    %655 = tpu.matmul %653, %654, %cst_206 {dimension_numbers = #tpu.dot_dimension_numbers<[1], [0], [0], [1], [0, 0, 1, 1], [], []>} : vector<2x12xbf16>, vector<12x1xbf16>, vector<2x1xf32> -> vector<2x1xf32>
    %656 = vector.broadcast %652 : vector<12x1xf32> to vector<12x64xf32>
    %657 = arith.mulf %656, %634 : vector<12x64xf32>
    %658 = arith.truncf %657 : vector<12x64xf32> to vector<12x64xbf16>
    %cst_207 = arith.constant dense<0.000000e+00> : vector<2x64xf32>
    %659 = tpu.matmul %653, %658, %cst_207 {dimension_numbers = #tpu.dot_dimension_numbers<[1], [0], [0], [1], [0, 0, 1, 1], [], []>} : vector<2x12xbf16>, vector<12x64xbf16>, vector<2x64xf32> -> vector<2x64xf32>
    %660 = vector.broadcast %655 : vector<2x1xf32> to vector<2x64xf32>
    %661 = arith.divf %659, %660 : vector<2x64xf32>
    %c0_208 = arith.constant 0 : index
    %c0_209 = arith.constant 0 : index
    %662 = vector.load %arg42[%c0_208, %c0_209] : memref<64x4xbf16, #tpu.memory_space<vmem>>, vector<64x4xbf16>
    %663 = arith.truncf %661 : vector<2x64xf32> to vector<2x64xbf16>
    %cst_210 = arith.constant dense<0.000000e+00> : vector<2x4xf32>
    %664 = tpu.matmul %663, %662, %cst_210 {dimension_numbers = #tpu.dot_dimension_numbers<[1], [0], [0], [1], [0, 0, 1, 1], [], []>} : vector<2x64xbf16>, vector<64x4xbf16>, vector<2x4xf32> -> vector<2x4xf32>
    %c0_211 = arith.constant 0 : index
    %c0_212 = arith.constant 0 : index
    %665 = vector.load %arg43[%c0_211, %c0_212] : memref<1x4xf32, #tpu.memory_space<vmem>>, vector<1x4xf32>
    %666 = vector.broadcast %665 : vector<1x4xf32> to vector<2x4xf32>
    %667 = arith.addf %664, %666 : vector<2x4xf32>
    %c0_213 = arith.constant 0 : index
    %c0_214 = arith.constant 0 : index
    %668 = vector.load %arg44[%c0_213, %c0_214] : memref<2x4xf32, #tpu.memory_space<vmem>>, vector<2x4xf32>
    tpu.vector_store %arg44[%c0_213, %c0_214], %667 {strides = array<i32>} : memref<2x4xf32, #tpu.memory_space<vmem>>, vector<2x4xf32>,
    return
  }
}

</mosaic_0001>

<bundles_post_ra>
// kernel: fwd.1
= control target key start
LH: loop header
LB: loop body
LE: loop exit
PB: predicated region body
PF: predicated region fallthrough
CT: control target
= control target key end

     0   :  { %s6150_s6 = smov 1   ;;  %s6151_s10 = smov 2   ;;  %s7406_s0 = inlined_call_operand.smem [shape: u32[45], index: -1, kind: input, shape index: {}] }
   0x1   :  { %s6234_s5 = sld [smem:[%s7406_s0]]   ;;  %s6152_s14 = smov 3  }
   0x2   :  { %s6239_s9 = sld [smem:[%s7406_s0 + %s6150_s6]]   ;;  %s6153_s18 = smov 4  }
   0x3   :  { %s6244_s13 = sld [smem:[%s7406_s0 + %s6151_s10]]   ;;  %s6154_s22 = smov 5  }
   0x4   :  { %s6249_s17 = sld [smem:[%s7406_s0 + %s6152_s14]]   ;;  %s6155_s26 = smov 6  }
   0x5   :  { %s6254_s21 = sld [smem:[%s7406_s0 + %s6153_s18]]   ;;  %s6156_s30 = smov 7  }
   0x6   :  { %s6259_s25 = sld [smem:[%s7406_s0 + %s6154_s22]]   ;;  %s6157_s4 = smov 8  }
   0x7   :  { %7431 = sst [smem:[#allocation44_spill]] %s6234_s5  ;;  %s6158_s10 = smov 9  }
   0x8   :  { %s6264_s29 = sld [smem:[%s7406_s0 + %s6155_s26]]   ;;  %s6159_s15 = smov 10  }
   0x9   :  { %7432 = sst [smem:[#allocation45_spill]] %s6244_s13  ;;  %s6160_s20 = smov 11  }
   0xa   :  { %s6269_s3 = sld [smem:[%s7406_s0 + %s6156_s30]]   ;;  %s6161_s26 = smov 12  }
   0xb   :  { %s6274_s8 = sld [smem:[%s7406_s0 + %s6157_s4]]   ;;  %s6162_s1 = smov 13  }
   0xc   :  { %s6279_s14 = sld [smem:[%s7406_s0 + %s6158_s10]]   ;;  %s6163_s7 = smov 14  }
   0xd   :  { %s6284_s19 = sld [smem:[%s7406_s0 + %s6159_s15]]   ;;  %s6164_s15 = smov 15  }
   0xe   :  { %s6289_s24 = sld [smem:[%s7406_s0 + %s6160_s20]]   ;;  %s6165_s22 = smov 16  }
   0xf   :  { %s6294_s30 = sld [smem:[%s7406_s0 + %s6161_s26]]   ;;  %s6166_s28 = smov 17  }
  0x10   :  { %7433 = sst [smem:[#allocation46_spill]] %s6269_s3  ;;  %s6191_s10 = smov 42  }
  0x11   :  { %7434 = sst [smem:[#allocation47_spill]] %s6274_s8  ;;  %s6192_s16 = smov 43  }
  0x12   :  { %7435 = sst [smem:[#allocation48_spill]] %s6279_s14  ;;  %s6193_s23 = smov 44  }
  0x13   :  { %7436 = sst [smem:[#allocation49_spill]] %s6284_s19 }
  0x14   :  { %s6299_s6 = sld [smem:[%s7406_s0 + %s6162_s1]]  }
  0x15   :  { %7437 = sst [smem:[#allocation50_spill]] %s6294_s30 }
  0x16   :  { %s6304_s12 = sld [smem:[%s7406_s0 + %s6163_s7]]   ;;  %s6167_s7 = smov 18  }
  0x17   :  { %s6309_s20 = sld [smem:[%s7406_s0 + %s6164_s15]]   ;;  %s6168_s15 = smov 19  }
  0x18   :  { %s6314_s27 = sld [smem:[%s7406_s0 + %s6165_s22]]   ;;  %s6169_s22 = smov 20  }
  0x19   :  { %s6319_s4 = sld [smem:[%s7406_s0 + %s6166_s28]]   ;;  %s6170_s28 = smov 21  }
  0x1a   :  { %7438 = sst [smem:[#allocation51_spill]] %s6299_s6 }
  0x1b   :  { %s6329_s6 = sld [smem:[%s7406_s0 + %s6168_s15]]   ;;  %s6172_s15 = smov 23  }
  0x1c   :  { %7439 = sst [smem:[#allocation52_spill]] %s6304_s12 }
  0x1d   :  { %7440 = sst [smem:[#allocation53_spill]] %s6309_s20 }
  0x1e   :  { %s6324_s12 = sld [smem:[%s7406_s0 + %s6167_s7]]   ;;  %s6171_s7 = smov 22  }
  0x1f   :  { %7441 = sst [smem:[#allocation54_spill]] %s6319_s4 }
  0x20   :  { %s6334_s30 = sld [smem:[%s7406_s0 + %s6169_s22]]   ;;  %s6173_s22 = smov 24  }
  0x21   :  { %7443 = sst [smem:[#allocation56_spill]] %s6329_s6 }
  0x22   :  { %s6339_s19 = sld [smem:[%s7406_s0 + %s6170_s28]]   ;;  %s6174_s28 = smov 25  }
  0x23   :  { %s6344_s14 = sld [smem:[%s7406_s0 + %s6171_s7]]   ;;  %s6175_s7 = smov 26  }
  0x24   :  { %7442 = sst [smem:[#allocation55_spill]] %s6324_s12 }
  0x25   :  { %s6349_s6 = sld [smem:[%s7406_s0 + %s6172_s15]]   ;;  %s6176_s15 = smov 27  }
  0x26   :  { %s6354_s4 = sld [smem:[%s7406_s0 + %s6173_s22]]   ;;  %s6177_s22 = smov 28  }
  0x27   :  { %s6364_s8 = sld [smem:[%s7406_s0 + %s6175_s7]]   ;;  %s6179_s7 = smov 30  }
  0x28   :  { %7444 = sst [smem:[#allocation57_spill]] %s6339_s19 }
  0x29   :  { %s6359_s19 = sld [smem:[%s7406_s0 + %s6174_s28]]   ;;  %s6178_s28 = smov 29  }
  0x2a   :  { %s6384_s3 = sld [smem:[%s7406_s0 + %s6179_s7]]   ;;  %s6183_s7 = smov 34  }
  0x2b   :  { %7445 = sst [smem:[#allocation58_spill]] %s6349_s6 }
  0x2c   :  { %7446 = sst [smem:[#allocation59_spill]] %s6354_s4 }
  0x2d   :  { %s6369_s6 = sld [smem:[%s7406_s0 + %s6176_s15]]   ;;  %s6180_s15 = smov 31  }
  0x2e   :  { %s6374_s4 = sld [smem:[%s7406_s0 + %s6177_s22]]   ;;  %s6181_s22 = smov 32  }
  0x2f   :  { %7447 = sst [smem:[#allocation60_spill]] %s6359_s19 }
  0x30   :  { %s6379_s19 = sld [smem:[%s7406_s0 + %s6178_s28]]   ;;  %s6182_s28 = smov 33  }
  0x31   :  { %7450 = sst [smem:[#allocation63_spill]] %s6384_s3 }
  0x32   :  { %s6394_s12 = sld [smem:[%s7406_s0 + %s6181_s22]]   ;;  %s6185_s22 = smov 36  }
  0x33   :  { %7448 = sst [smem:[#allocation61_spill]] %s6369_s6 }
  0x34   :  { %s6389_s6 = sld [smem:[%s7406_s0 + %s6180_s15]]   ;;  %s6184_s15 = smov 35  }
  0x35   :  { %s6404_s3 = sld [smem:[%s7406_s0 + %s6183_s7]]   ;;  %s6187_s7 = smov 38  }
  0x36   :  { %7449 = sst [smem:[#allocation62_spill]] %s6379_s19 }
  0x37   :  { %s6399_s19 = sld [smem:[%s7406_s0 + %s6182_s28]]   ;;  %s6186_s28 = smov 37  }
  0x38   :  { %7451 = sst [smem:[#allocation64_spill]] %s6394_s12 }
  0x39   :  { %s6409_s20 = sld [smem:[%s7406_s0 + %s6184_s15]]   ;;  %s6188_s15 = smov 39  }
  0x3a   :  { %s6414_s12 = sld [smem:[%s7406_s0 + %s6185_s22]]   ;;  %s6189_s22 = smov 40  }
  0x3b   :  { %7453 = sst [smem:[#allocation66_spill]] %s6404_s3 }
  0x3c   :  { %s6424_s13 = sld [smem:[%s7406_s0 + %s6187_s7]]  }
  0x3d   :  { %7452 = sst [smem:[#allocation65_spill]] %s6399_s19 }
  0x3e   :  { %s6419_s19 = sld [smem:[%s7406_s0 + %s6186_s28]]   ;;  %s6190_s28 = smov 41  }
  0x3f   :  { %s6429_s5 = sld [smem:[%s7406_s0 + %s6188_s15]]  }
  0x40   :  { %7454 = sst [smem:[#allocation67_spill]] %s6414_s12 }
  0x41   :  { %s6434_s12 = sld [smem:[%s7406_s0 + %s6189_s22]]  }
  0x42   :  { %7455 = sst [smem:[#allocation68_spill]] %s6424_s13 }
  0x43   :  { %s4608_s3 = sld [smem:[%s7406_s0 + %s6190_s28]]  }
  0x44   :  { %s6442_s13 = sld [smem:[%s7406_s0 + %s6191_s10]]  }
  0x45   :  { %7456 = sst [smem:[#allocation69_spill]] %s6429_s5 }
  0x46   :  { %s6447_s5 = sld [smem:[%s7406_s0 + %s6192_s16]]  }
  0x47   :  { %7457 = sst [smem:[#allocation70_spill]] %s6434_s12 }
  0x48   :  { %s6452_s12 = sld [smem:[%s7406_s0 + %s6193_s23]]  }
  0x49   :  { %v94_v0 = vstv %s4608_s3 }
  0x4a   :  { %95 = vst [vmem:[#allocation2] sm:$0x1] %v94_v0 }
  0x4b   :  { %96 = vsyncpa [#allocation4], 0 }
  0x4c   :  { %97 = vsyncpa [#allocation7], 0 }
  0x4d   :  { %98 = vsyncpa [#allocation10], 0 }
  0x4e   :  { %99 = vsyncpa [#allocation13], 0 }
  0x4f   :  { %100 = vsyncpa [#allocation16], 0 }
  0x50   :  { %101 = vsyncpa [#allocation19], 0 }
  0x51   :  { %102 = vsyncpa [#allocation22], 0 }
  0x52   :  { %103 = vsyncpa [#allocation25], 0 }
  0x53   :  { %104 = vsyncpa [#allocation28], 0 }
  0x54   :  { %105 = vsyncpa [#allocation31], 0 }
  0x55   :  { %106 = vsyncpa [#allocation5], 0  ;;  %s6194_s28 = smov [#allocation6]   ;;  %s6195_s0 = smov [#allocation9]  }
  0x56   :  { %s129_s1 = sshll.u32 %s6194_s28, 4  ;;  %s151_s2 = sshll.u32 %s6195_s0, 4  ;;  %s130_s1 = int_to_ptr.vmem [resolvable:$true] %s129_s1  ;;  %s152_s2 = int_to_ptr.vmem [resolvable:$true] %s151_s2 }
  0x57   :  { %s5710_s3 = scalar_lea.hbm %s6249_s17, 16 }
  0x58   :  { %p5711_p0 = scmp.ne.s32.totalorder %s6249_s17, %s5710_s3  ;;  %p5714_p1 = scmp.lt.u32.totalorder %s5710_s3, %s6249_s17 }
  0x5a   :  { %p5716_p2 = pnand %p5714_p1, %p5711_p0 }
  0x5c   :  { %5719 = shalt.err (!%p5716_p2)
}
  0x5d   :  { %s5720_s10 = scalar_lea.vmem %s130_s1, 16  ;;  %s5724_s7 = scalar_lea.vmem %s130_s1, 32 }
  0x5e   :  { %p5721_p3 = scmp.ne.s32.totalorder %s130_s1, %s5720_s10  ;;  %p5725_p4 = scmp.lt.s32.totalorder %s130_s1, %s130_s1 }
  0x5f   :  { %p5726_p5 = scmp.lt.s32.totalorder %s5724_s7, %s5720_s10 }
  0x61   :  { %p5727_p6 = por %p5726_p5, %p5725_p4 }
  0x63   :  { %p5728_p7 = pnand %p5727_p6, %p5721_p3 }
  0x65   :  { %5731 = shalt.err (!%p5728_p7)
}
  0x66   :  { %132 = dma.hbm_to_vmem [thread:$0]  %s6249_s17, 16, %s130_s1, [#allocation7]  }
  0x67   :  { %s5732_s11 = scalar_lea.hbm %s6259_s25, 16 }
  0x68   :  { %p5733_p8 = scmp.ne.s32.totalorder %s6259_s25, %s5732_s11  ;;  %p5736_p9 = scmp.lt.u32.totalorder %s5732_s11, %s6259_s25 }
  0x6a   :  { %p5738_p10 = pnand %p5736_p9, %p5733_p8 }
  0x6c   :  { %5741 = shalt.err (!%p5738_p10)
}
  0x6d   :  { %s5742_s16 = scalar_lea.vmem %s152_s2, 16  ;;  %s5746_s15 = scalar_lea.vmem %s152_s2, 32 }
  0x6e   :  { %p5743_p11 = scmp.ne.s32.totalorder %s152_s2, %s5742_s16  ;;  %p5747_p12 = scmp.lt.s32.totalorder %s152_s2, %s152_s2 }
  0x6f   :  { %p5748_p13 = scmp.lt.s32.totalorder %s5746_s15, %s5742_s16 }
  0x71   :  { %p5749_p0 = por %p5748_p13, %p5747_p12 }
  0x73   :  { %p5750_p1 = pnand %p5749_p0, %p5743_p11 }
  0x75   :  { %5753 = shalt.err (!%p5750_p1)
}
  0x76   :  { %154 = dma.hbm_to_vmem [thread:$0]  %s6259_s25, 16, %s152_s2, [#allocation10]  }
  0x77   :  { %s6196_s18 = smov [#allocation12]   ;;  %s6197_s23 = smov [#allocation15]  }
  0x78   :  { %s180_s17 = sshll.u32 %s6196_s18, 4  ;;  %s217_s22 = sshll.u32 %s6197_s23, 4  ;;  %s181_s17 = int_to_ptr.vmem [resolvable:$true] %s180_s17  ;;  %s218_s22 = int_to_ptr.vmem [resolvable:$true] %s217_s22 }
  0x79   :  { %s5754_s26 = scalar_lea.hbm %s6289_s24, 128 }
  0x7a   :  { %p5755_p2 = scmp.ne.s32.totalorder %s6289_s24, %s5754_s26  ;;  %p5758_p3 = scmp.lt.u32.totalorder %s5754_s26, %s6289_s24 }
  0x7c   :  { %p5760_p4 = pnand %p5758_p3, %p5755_p2 }
  0x7e   :  { %5763 = shalt.err (!%p5760_p4)
}
  0x7f   :  { %s5764_s28 = scalar_lea.vmem %s181_s17, 128  ;;  %p5769_p6 = scmp.lt.s32.totalorder %s181_s17, %s181_s17 }
  0x80   :  { %p5765_p5 = scmp.ne.s32.totalorder %s181_s17, %s5764_s28  ;;  %p5770_p7 = scmp.lt.s32.totalorder %s5764_s28, %s5764_s28 }
  0x82   :  { %p5771_p8 = por %p5770_p7, %p5769_p6 }
  0x84   :  { %p5772_p9 = pnand %p5771_p8, %p5765_p5 }
  0x86   :  { %5775 = shalt.err (!%p5772_p9)
}
  0x87   :  { %s6198_s1 = smov 64   ;;  %s6199_s25 = smov 4  }
  0x88   :  { %186 = dma.hbm_to_vmem [thread:$0]  %s6289_s24, 128, %s181_s17, [#allocation13], %s6198_s1, %s6198_s1, %s6199_s25  }
  0x89   :  { %s5776_s0 = scalar_lea.hbm %s6334_s30, 32 }
  0x8a   :  { %p5777_p10 = scmp.ne.s32.totalorder %s6334_s30, %s5776_s0  ;;  %p5780_p11 = scmp.lt.u32.totalorder %s5776_s0, %s6334_s30 }
  0x8c   :  { %p5782_p12 = pnand %p5780_p11, %p5777_p10 }
  0x8e   :  { %5785 = shalt.err (!%p5782_p12)
}
  0x8f   :  { %s5786_s2 = scalar_lea.vmem %s218_s22, 32  ;;  %p5791_p0 = scmp.lt.s32.totalorder %s218_s22, %s218_s22 }
  0x90   :  { %p5787_p13 = scmp.ne.s32.totalorder %s218_s22, %s5786_s2  ;;  %p5792_p1 = scmp.lt.s32.totalorder %s5786_s2, %s5786_s2 }
  0x92   :  { %p5793_p2 = por %p5792_p1, %p5791_p0 }
  0x94   :  { %p5794_p3 = pnand %p5793_p2, %p5787_p13 }
  0x96   :  { %5797 = shalt.err (!%p5794_p3)
}
  0x97   :  { %220 = dma.hbm_to_vmem [thread:$0]  %s6334_s30, 32, %s218_s22, [#allocation16]  }
  0x98   :  { %s6200_s3 = smov [#allocation18]   ;;  %s6201_s24 = smov [#allocation21]  }
  0x99   :  { %s245_s10 = sshll.u32 %s6200_s3, 4  ;;  %s271_s7 = sshll.u32 %s6201_s24, 4  ;;  %s246_s10 = int_to_ptr.vmem [resolvable:$true] %s245_s10  ;;  %s272_s7 = int_to_ptr.vmem [resolvable:$true] %s271_s7 }
  0x9a   :  { %s5798_s11 = scalar_lea.hbm %s6364_s8, 32 }
  0x9b   :  { %p5799_p4 = scmp.ne.s32.totalorder %s6364_s8, %s5798_s11  ;;  %p5802_p5 = scmp.lt.u32.totalorder %s5798_s11, %s6364_s8 }
  0x9d   :  { %p5804_p6 = pnand %p5802_p5, %p5799_p4 }
  0x9f   :  { %5807 = shalt.err (!%p5804_p6)
}
  0xa0   :  { %s5808_s16 = scalar_lea.vmem %s246_s10, 32  ;;  %p5813_p8 = scmp.lt.s32.totalorder %s246_s10, %s246_s10 }
  0xa1   :  { %p5809_p7 = scmp.ne.s32.totalorder %s246_s10, %s5808_s16  ;;  %p5814_p9 = scmp.lt.s32.totalorder %s5808_s16, %s5808_s16 }
  0xa3   :  { %p5815_p10 = por %p5814_p9, %p5813_p8 }
  0xa5   :  { %p5816_p11 = pnand %p5815_p10, %p5809_p7 }
  0xa7   :  { %5819 = shalt.err (!%p5816_p11)
}
  0xa8   :  { %248 = dma.hbm_to_vmem [thread:$0]  %s6364_s8, 32, %s246_s10, [#allocation19]  }
  0xa9   :  { %s5820_s30 = scalar_lea.hbm %s6389_s6, 16 }
  0xaa   :  { %p5821_p12 = scmp.ne.s32.totalorder %s6389_s6, %s5820_s30  ;;  %p5824_p13 = scmp.lt.u32.totalorder %s5820_s30, %s6389_s6 }
  0xac   :  { %p5826_p0 = pnand %p5824_p13, %p5821_p12 }
  0xae   :  { %5829 = shalt.err (!%p5826_p0)
}
  0xaf   :  { %s5830_s15 = scalar_lea.vmem %s272_s7, 16  ;;  %s5834_s18 = scalar_lea.vmem %s272_s7, 32 }
  0xb0   :  { %p5831_p1 = scmp.ne.s32.totalorder %s272_s7, %s5830_s15  ;;  %p5835_p2 = scmp.lt.s32.totalorder %s272_s7, %s272_s7 }
  0xb1   :  { %p5836_p3 = scmp.lt.s32.totalorder %s5834_s18, %s5830_s15 }
  0xb3   :  { %p5837_p4 = por %p5836_p3, %p5835_p2 }
  0xb5   :  { %p5838_p5 = pnand %p5837_p4, %p5831_p1 }
  0xb7   :  { %5841 = shalt.err (!%p5838_p5)
}
  0xb8   :  { %274 = dma.hbm_to_vmem [thread:$0]  %s6389_s6, 16, %s272_s7, [#allocation22]  }
  0xb9   :  { %s6202_s17 = smov [#allocation24]   ;;  %s6203_s23 = smov [#allocation27]  }
  0xba   :  { %s294_s8 = sshll.u32 %s6202_s17, 4  ;;  %s319_s22 = sshll.u32 %s6203_s23, 4  ;;  %s295_s8 = int_to_ptr.vmem [resolvable:$true] %s294_s8  ;;  %s320_s22 = int_to_ptr.vmem [resolvable:$true] %s319_s22 }
  0xbb   :  { %s5842_s26 = scalar_lea.hbm %s6409_s20, 256 }
  0xbc   :  { %p5843_p6 = scmp.ne.s32.totalorder %s6409_s20, %s5842_s26  ;;  %p5846_p7 = scmp.lt.u32.totalorder %s5842_s26, %s6409_s20 }
  0xbe   :  { %p5848_p8 = pnand %p5846_p7, %p5843_p6 }
  0xc0   :  { %5851 = shalt.err (!%p5848_p8)
}
  0xc1   :  { %s5852_s28 = scalar_lea.vmem %s295_s8, 256  ;;  %p5857_p10 = scmp.lt.s32.totalorder %s295_s8, %s295_s8 }
  0xc2   :  { %p5853_p9 = scmp.ne.s32.totalorder %s295_s8, %s5852_s28  ;;  %p5858_p11 = scmp.lt.s32.totalorder %s5852_s28, %s5852_s28 }
  0xc4   :  { %p5859_p12 = por %p5858_p11, %p5857_p10 }
  0xc6   :  { %p5860_p13 = pnand %p5859_p12, %p5853_p9 }
  0xc8   :  { %5863 = shalt.err (!%p5860_p13)
}
  0xc9   :  { %300 = dma.hbm_to_vmem [thread:$0]  %s6409_s20, 256, %s295_s8, [#allocation25], %s6198_s1, %s6198_s1, %s6199_s25  }
  0xca   :  { %s5864_s6 = scalar_lea.hbm %s6419_s19, 16 }
  0xcb   :  { %p5865_p0 = scmp.ne.s32.totalorder %s6419_s19, %s5864_s6  ;;  %p5868_p1 = scmp.lt.u32.totalorder %s5864_s6, %s6419_s19 }
  0xcd   :  { %p5870_p2 = pnand %p5868_p1, %p5865_p0 }
  0xcf   :  { %5873 = shalt.err (!%p5870_p2)
}
  0xd0   :  { %s5874_s0 = scalar_lea.vmem %s320_s22, 16  ;;  %s5878_s2 = scalar_lea.vmem %s320_s22, 32 }
  0xd1   :  { %p5875_p3 = scmp.ne.s32.totalorder %s320_s22, %s5874_s0  ;;  %p5879_p4 = scmp.lt.s32.totalorder %s320_s22, %s320_s22 }
  0xd2   :  { %p5880_p5 = scmp.lt.s32.totalorder %s5878_s2, %s5874_s0 }
  0xd4   :  { %p5881_p6 = por %p5880_p5, %p5879_p4 }
  0xd6   :  { %p5882_p7 = pnand %p5881_p6, %p5875_p3 }
  0xd8   :  { %5885 = shalt.err (!%p5882_p7)
}
  0xd9   :  { %322 = dma.hbm_to_vmem [thread:$0]  %s6419_s19, 16, %s320_s22, [#allocation28]  }
  0xda   :  { %s6204_s3 = smov [#allocation3]   ;;  %s6205_s10 = smov [#allocation8]  }
  0xdb   :  { %s114_s20 = sshll.u32 %s6204_s3, 4  ;;  %s138_s24 = sshll.u32 %s6205_s10, 4  ;;  %s115_s20 = int_to_ptr.vmem [resolvable:$true] %s114_s20  ;;  %s6492_s24 = int_to_ptr.vmem [resolvable:$true] %s138_s24 }
  0xdc   :  { %s5886_s7 = scalar_lea.hbm %s6239_s9, 192 }
  0xdd   :  { %p5887_p8 = scmp.ne.s32.totalorder %s6239_s9, %s5886_s7  ;;  %p5890_p9 = scmp.lt.u32.totalorder %s5886_s7, %s6239_s9 }
  0xdf   :  { %p5892_p10 = pnand %p5890_p9, %p5887_p8 }
  0xe1   :  { %5895 = shalt.err (!%p5892_p10)
}
  0xe2   :  { %s5896_s11 = scalar_lea.vmem %s115_s20, 192  ;;  %p5901_p12 = scmp.lt.s32.totalorder %s115_s20, %s115_s20 }
  0xe3   :  { %p5897_p11 = scmp.ne.s32.totalorder %s115_s20, %s5896_s11  ;;  %p5902_p13 = scmp.lt.s32.totalorder %s5896_s11, %s5896_s11 }
  0xe5   :  { %p5903_p0 = por %p5902_p13, %p5901_p12 }
  0xe7   :  { %p5904_p1 = pnand %p5903_p0, %p5897_p11 }
  0xe9   :  { %5907 = shalt.err (!%p5904_p1)
}
  0xea   :  { %120 = dma.hbm_to_vmem [thread:$0]  %s6239_s9, 192, %s115_s20, [#allocation4], %s6198_s1, %s6198_s1, %s6199_s25  }
  0xeb   :  { %s5908_s19 = scalar_lea.hbm %s6254_s21, 256 }
  0xec   :  { %p5909_p2 = scmp.ne.s32.totalorder %s6254_s21, %s5908_s19  ;;  %p5912_p3 = scmp.lt.u32.totalorder %s5908_s19, %s6254_s21 }
  0xee   :  { %p5914_p4 = pnand %p5912_p3, %p5909_p2 }
  0xf0   :  { %5917 = shalt.err (!%p5914_p4)
}
  0xf1   :  { %s5918_s16 = scalar_lea.vmem %s6492_s24, 256  ;;  %p5923_p6 = scmp.lt.s32.totalorder %s6492_s24, %s6492_s24 }
  0xf2   :  { %p5919_p5 = scmp.ne.s32.totalorder %s6492_s24, %s5918_s16  ;;  %p5924_p7 = scmp.lt.s32.totalorder %s5918_s16, %s5918_s16 }
  0xf4   :  { %p5925_p8 = por %p5924_p7, %p5923_p6 }
  0xf6   :  { %p5926_p9 = pnand %p5925_p8, %p5919_p5 }
  0xf8   :  { %5929 = shalt.err (!%p5926_p9)
}
  0xf9   :  { %s6206_s30 = smov 128   ;;  %s6207_s9 = smov 8  }
  0xfa   :  { %144 = dma.hbm_to_vmem [thread:$0]  %s6254_s21, 256, %s6492_s24, [#allocation7], %s6206_s30, %s6206_s30, %s6207_s9  }
  0xfb   :  { %s6208_s15 = smov [#allocation11]   ;;  %s6209_s17 = smov [#allocation14]  }
  0xfc   :  { %s160_s18 = sshll.u32 %s6208_s15, 4  ;;  %s201_s8 = sshll.u32 %s6209_s17, 4  ;;  %s161_s18 = int_to_ptr.vmem [resolvable:$true] %s160_s18  ;;  %s202_s8 = int_to_ptr.vmem [resolvable:$true] %s201_s8 }
  0xfd   :  { %s5930_s23 = scalar_lea.hbm %s6264_s29, 128 }
  0xfe   :  { %p5931_p10 = scmp.ne.s32.totalorder %s6264_s29, %s5930_s23  ;;  %p5934_p11 = scmp.lt.u32.totalorder %s5930_s23, %s6264_s29 }
 0x100   :  { %p5936_p12 = pnand %p5934_p11, %p5931_p10 }
 0x102   :  { %5939 = shalt.err (!%p5936_p12)
}
 0x103   :  { %s5940_s22 = scalar_lea.vmem %s161_s18, 128  ;;  %p5945_p0 = scmp.lt.s32.totalorder %s161_s18, %s161_s18 }
 0x104   :  { %p5941_p13 = scmp.ne.s32.totalorder %s161_s18, %s5940_s22  ;;  %p5946_p1 = scmp.lt.s32.totalorder %s5940_s22, %s5940_s22 }
 0x106   :  { %p5947_p2 = por %p5946_p1, %p5945_p0 }
 0x108   :  { %p5948_p3 = pnand %p5947_p2, %p5941_p13 }
 0x10a   :  { %5951 = shalt.err (!%p5948_p3)
}
 0x10b   :  { %166 = dma.hbm_to_vmem [thread:$0]  %s6264_s29, 128, %s161_s18, [#allocation10], %s6198_s1, %s6198_s1, %s6199_s25  }
 0x10c   :  { %s5952_s21 = scalar_lea.hbm %s6314_s27, 16 }
 0x10d   :  { %p5953_p4 = scmp.ne.s32.totalorder %s6314_s27, %s5952_s21  ;;  %p5956_p5 = scmp.lt.u32.totalorder %s5952_s21, %s6314_s27 }
 0x10f   :  { %p5958_p6 = pnand %p5956_p5, %p5953_p4 }
 0x111   :  { %5961 = shalt.err (!%p5958_p6)
}
 0x112   :  { %s5962_s26 = scalar_lea.vmem %s202_s8, 16  ;;  %s5966_s28 = scalar_lea.vmem %s202_s8, 32 }
 0x113   :  { %p5963_p7 = scmp.ne.s32.totalorder %s202_s8, %s5962_s26  ;;  %p5967_p8 = scmp.lt.s32.totalorder %s202_s8, %s202_s8 }
 0x114   :  { %p5968_p9 = scmp.lt.s32.totalorder %s5966_s28, %s5962_s26 }
 0x116   :  { %p5969_p10 = por %p5968_p9, %p5967_p8 }
 0x118   :  { %p5970_p11 = pnand %p5969_p10, %p5963_p7 }
 0x11a   :  { %5973 = shalt.err (!%p5970_p11)
}
 0x11b   :  { %204 = dma.hbm_to_vmem [thread:$0]  %s6314_s27, 16, %s202_s8, [#allocation13]  }
 0x11c   :  { %s6210_s6 = smov [#allocation17]   ;;  %s6211_s0 = smov [#allocation20]  }
 0x11d   :  { %s229_s29 = sshll.u32 %s6210_s6, 4  ;;  %s257_s2 = sshll.u32 %s6211_s0, 4  ;;  %s230_s29 = int_to_ptr.vmem [resolvable:$true] %s229_s29  ;;  %s258_s2 = int_to_ptr.vmem [resolvable:$true] %s257_s2 }
 0x11e   :  { %s5974_s3 = scalar_lea.hbm %s6344_s14, 16 }
 0x11f   :  { %p5975_p12 = scmp.ne.s32.totalorder %s6344_s14, %s5974_s3  ;;  %p5978_p13 = scmp.lt.u32.totalorder %s5974_s3, %s6344_s14 }
 0x121   :  { %p5980_p0 = pnand %p5978_p13, %p5975_p12 }
 0x123   :  { %5983 = shalt.err (!%p5980_p0)
}
 0x124   :  { %s5984_s20 = scalar_lea.vmem %s230_s29, 16  ;;  %s5988_s10 = scalar_lea.vmem %s230_s29, 32 }
 0x125   :  { %p5985_p1 = scmp.ne.s32.totalorder %s230_s29, %s5984_s20  ;;  %p5989_p2 = scmp.lt.s32.totalorder %s230_s29, %s230_s29 }
 0x126   :  { %p5990_p3 = scmp.lt.s32.totalorder %s5988_s10, %s5984_s20 }
 0x128   :  { %p5991_p4 = por %p5990_p3, %p5989_p2 }
 0x12a   :  { %p5992_p5 = pnand %p5991_p4, %p5985_p1 }
 0x12c   :  { %5995 = shalt.err (!%p5992_p5)
}
 0x12d   :  { %232 = dma.hbm_to_vmem [thread:$0]  %s6344_s14, 16, %s230_s29, [#allocation16]  }
 0x12e   :  { %s5996_s27 = scalar_lea.hbm %s6374_s4, 16 }
 0x12f   :  { %p5997_p6 = scmp.ne.s32.totalorder %s6374_s4, %s5996_s27  ;;  %p6000_p7 = scmp.lt.u32.totalorder %s5996_s27, %s6374_s4 }
 0x131   :  { %p6002_p8 = pnand %p6000_p7, %p5997_p6 }
 0x133   :  { %6005 = shalt.err (!%p6002_p8)
}
 0x134   :  { %s6006_s24 = scalar_lea.vmem %s258_s2, 16  ;;  %s6010_s7 = scalar_lea.vmem %s258_s2, 32 }
 0x135   :  { %p6007_p9 = scmp.ne.s32.totalorder %s258_s2, %s6006_s24  ;;  %p6011_p10 = scmp.lt.s32.totalorder %s258_s2, %s258_s2 }
 0x136   :  { %p6012_p11 = scmp.lt.s32.totalorder %s6010_s7, %s6006_s24 }
 0x138   :  { %p6013_p12 = por %p6012_p11, %p6011_p10 }
 0x13a   :  { %p6014_p13 = pnand %p6013_p12, %p6007_p9 }
 0x13c   :  { %6017 = shalt.err (!%p6014_p13)
}
 0x13d   :  { %s7458_s11 = sld [smem:[#allocation66_spill]]  ;;  %s6212_s19 = smov [#allocation23]  }
 0x13e   :  { %260 = dma.hbm_to_vmem [thread:$0]  %s6374_s4, 16, %s258_s2, [#allocation19]  }
 0x13f   :  { %s285_s14 = sshll.u32 %s6212_s19, 4  ;;  %s6213_s16 = smov [#allocation26]   ;;  %s286_s14 = int_to_ptr.vmem [resolvable:$true] %s285_s14 }
 0x140   :  { %s306_s30 = sshll.u32 %s6213_s16, 4  ;;  %s6529_s30 = int_to_ptr.vmem [resolvable:$true] %s306_s30 }
 0x143   :  { %s6018_s9 = scalar_lea.hbm %s7458_s11, 16 }
 0x144   :  { %p6019_p0 = scmp.ne.s32.totalorder %s7458_s11, %s6018_s9  ;;  %p6022_p1 = scmp.lt.u32.totalorder %s6018_s9, %s7458_s11 }
 0x146   :  { %p6024_p2 = pnand %p6022_p1, %p6019_p0 }
 0x148   :  { %6027 = shalt.err (!%p6024_p2)
}
 0x149   :  { %s6028_s15 = scalar_lea.vmem %s286_s14, 16  ;;  %s6032_s18 = scalar_lea.vmem %s286_s14, 32 }
 0x14a   :  { %p6029_p3 = scmp.ne.s32.totalorder %s286_s14, %s6028_s15  ;;  %p6033_p4 = scmp.lt.s32.totalorder %s286_s14, %s286_s14 }
 0x14b   :  { %p6034_p5 = scmp.lt.s32.totalorder %s6032_s18, %s6028_s15 }
 0x14d   :  { %p6035_p6 = por %p6034_p5, %p6033_p4 }
 0x14f   :  { %p6036_p7 = pnand %p6035_p6, %p6029_p3 }
 0x151   :  { %6039 = shalt.err (!%p6036_p7)
}
 0x152   :  { %s7459_s4 = sld [smem:[#allocation67_spill]] }
 0x153   :  { %288 = dma.hbm_to_vmem [thread:$0]  %s7458_s11, 16, %s286_s14, [#allocation22]  }
 0x158   :  { %s6040_s17 = scalar_lea.hbm %s7459_s4, 256 }
 0x159   :  { %p6041_p8 = scmp.ne.s32.totalorder %s7459_s4, %s6040_s17  ;;  %p6044_p9 = scmp.lt.u32.totalorder %s6040_s17, %s7459_s4 }
 0x15b   :  { %p6046_p10 = pnand %p6044_p9, %p6041_p8 }
 0x15d   :  { %6049 = shalt.err (!%p6046_p10)
}
 0x15e   :  { %s6050_s8 = scalar_lea.vmem %s6529_s30, 256  ;;  %p6055_p12 = scmp.lt.s32.totalorder %s6529_s30, %s6529_s30 }
 0x15f   :  { %p6051_p11 = scmp.ne.s32.totalorder %s6529_s30, %s6050_s8  ;;  %p6056_p13 = scmp.lt.s32.totalorder %s6050_s8, %s6050_s8 }
 0x161   :  { %p6057_p0 = por %p6056_p13, %p6055_p12 }
 0x163   :  { %p6058_p1 = pnand %p6057_p0, %p6051_p11 }
 0x165   :  { %6061 = shalt.err (!%p6058_p1)
}
 0x166   :  { %s7460_s23 = sld [smem:[#allocation69_spill]]  ;;  %s6214_s22 = smov [#allocation29]  }
 0x167   :  { %312 = dma.hbm_to_vmem [thread:$0]  %s7459_s4, 256, %s6529_s30, [#allocation25], %s6198_s1, %s6198_s1, %s6199_s25  }
 0x168   :  { %s331_s21 = sshll.u32 %s6214_s22, 4  ;;  %s6215_s26 = smov [#allocation30]   ;;  %s332_s21 = int_to_ptr.vmem [resolvable:$true] %s331_s21 }
 0x169   :  { %s347_s28 = sshll.u32 %s6215_s26, 4  ;;  %s348_s28 = int_to_ptr.vmem [resolvable:$true] %s347_s28 }
 0x16c   :  { %s6062_s6 = scalar_lea.hbm %s7460_s23, 16 }
 0x16d   :  { %p6063_p2 = scmp.ne.s32.totalorder %s7460_s23, %s6062_s6  ;;  %p6066_p3 = scmp.lt.u32.totalorder %s6062_s6, %s7460_s23 }
 0x16f   :  { %p6068_p4 = pnand %p6066_p3, %p6063_p2 }
 0x171   :  { %6071 = shalt.err (!%p6068_p4)
}
 0x172   :  { %s6072_s29 = scalar_lea.vmem %s332_s21, 16  ;;  %s6076_s0 = scalar_lea.vmem %s332_s21, 32 }
 0x173   :  { %p6073_p5 = scmp.ne.s32.totalorder %s332_s21, %s6072_s29  ;;  %p6077_p6 = scmp.lt.s32.totalorder %s332_s21, %s332_s21 }
 0x174   :  { %p6078_p7 = scmp.lt.s32.totalorder %s6076_s0, %s6072_s29 }
 0x176   :  { %p6079_p8 = por %p6078_p7, %p6077_p6 }
 0x178   :  { %p6080_p9 = pnand %p6079_p8, %p6073_p5 }
 0x17a   :  { %6083 = shalt.err (!%p6080_p9)
}
 0x17b   :  { %334 = dma.hbm_to_vmem [thread:$0]  %s7460_s23, 16, %s332_s21, [#allocation28]  }
 0x17c   :  { %s6084_s25 = scalar_lea.hbm %s6447_s5, 16 }
 0x17d   :  { %p6085_p10 = scmp.ne.s32.totalorder %s6447_s5, %s6084_s25  ;;  %p6088_p11 = scmp.lt.u32.totalorder %s6084_s25, %s6447_s5 }
 0x17f   :  { %p6090_p12 = pnand %p6088_p11, %p6085_p10 }
 0x181   :  { %6093 = shalt.err (!%p6090_p12)
}
 0x182   :  { %s6094_s2 = scalar_lea.vmem %s348_s28, 16  ;;  %s6098_s3 = scalar_lea.vmem %s348_s28, 32 }
 0x183   :  { %p6095_p13 = scmp.ne.s32.totalorder %s348_s28, %s6094_s2  ;;  %p6099_p0 = scmp.lt.s32.totalorder %s348_s28, %s348_s28 }
 0x184   :  { %p6100_p1 = scmp.lt.s32.totalorder %s6098_s3, %s6094_s2 }
 0x186   :  { %p6101_p2 = por %p6100_p1, %p6099_p0 }
 0x188   :  { %p6102_p3 = pnand %p6101_p2, %p6095_p13 }
 0x18a   :  { %6105 = shalt.err (!%p6102_p3)
}
 0x18b   :  { %350 = dma.hbm_to_vmem [thread:$0]  %s6447_s5, 16, %s348_s28, [#allocation31]  }
 0x18c   :  { %6128 = dma.done.wait [#allocation4], 192  }
 0x18d   :  { %6129 = vsyncadd [#allocation4], 4294967104 }
 0x18e   :  { %6130 = dma.done.wait [#allocation7], 272  }
 0x18f   :  { %6131 = vsyncadd [#allocation7], 4294967024 }
 0x190   :  { %6132 = dma.done.wait [#allocation10], 144  }
 0x191   :  { %6133 = vsyncadd [#allocation10], 4294967152 }
 0x192   :  { %6134 = dma.done.wait [#allocation13], 144  }
 0x193   :  { %6135 = vsyncadd [#allocation13], 4294967152 }
 0x194   :  { %6136 = dma.done.wait [#allocation16], 48  }
 0x195   :  { %6137 = vsyncadd [#allocation16], 4294967248 }
 0x196   :  { %6138 = dma.done.wait [#allocation19], 48  }
 0x197   :  { %6139 = vsyncadd [#allocation19], 4294967248 }
 0x198   :  { %6140 = dma.done.wait [#allocation22], 32  }
 0x199   :  { %6141 = vsyncadd [#allocation22], 4294967264 }
 0x19a   :  { %6142 = dma.done.wait [#allocation25], 512  }
 0x19b   :  { %6143 = vsyncadd [#allocation25], 4294966784 }
 0x19c   :  { %6144 = dma.done.wait [#allocation28], 32  }
 0x19d   :  { %6145 = vsyncadd [#allocation28], 4294967264 }
 0x19e   :  { %6146 = dma.done.wait [#allocation31], 16  }
 0x19f   :  { %6147 = vsyncadd [#allocation31], 4294967280  ;;  %s7461_s5 = sld [smem:[#allocation44_spill]]  ;;  %v6216_v1 = vmov 0   ;;  %v6217_v2 = vmov 0.0   ;;  %s7462_s20 = sld [smem:[#allocation45_spill]]  ;;  %v408_v12 = vlaneseq }
 0x1a0   :  { %5442 = vset.pattern.permute.xlu0 %v6216_v1  ;;  %4928 = vmatprep.subr.bf16.mxu0 %v6217_v2  ;;  %v5484_v5 = vld [vmem:[#allocation3] sm:$0xff]   ;;  %vm437_vm0 = vcmask 1041408   ;;  %v5485_v6 = vld [vmem:[#allocation3 + $0x8] ss:$0 sps:$4 sm:$0x77]   ;;  %vm438_vm1 = vcmask 1042432  }
 0x1a1   :  { %4936 = vmatprep.subr.bf16.mxu1 %v6217_v2  ;;  %5443 = vset.pattern.permute.xlu1 %v6216_v1  ;;  %v6218_v7 = vmov 65535   ;;  %vm6219_vm2 = vmmov 0   ;;  %v409_v13 = vand.u32 127, %v408_v12  ;;  %vm433_vm5 = vcmask 171008   ;;  %v4615_v25 = vld [vmem:[#allocation6] ss:$0 sm:$0xff] }
 0x1a2   :  { %4929 = vmatpush3.bf16.msra.mxu0 %v5484_v5  ;;  %v439_v8 = vsel %vm437_vm0, 4294967295, %v6218_v7  ;;  %4932 = vmatprep.mubr.msk.bf16.mxu0 %vm6219_vm2, %v6217_v2  ;;  %vm509_vm6 = vcmask 261120   ;;  %vm685_vm7 = vcmask 1044480   ;;  %vm686_vm8 = vcmask 1045504   ;;  %v6601_v39 = vld [vmem:[#allocation8] sm:$0xff]  ;;  %s7463_s10 = sld [smem:[#allocation53_spill]] }
 0x1a3   :  { %4930 = vmatprep.subr.bf16.mxu0 %v6217_v2  ;;  %v440_v9 = vsel %vm438_vm1, %v439_v8, 0  ;;  %4940 = vmatprep.mubr.msk.bf16.mxu1 %vm6219_vm2, %v6217_v2  ;;  %v687_v32 = vsel %vm685_vm7, 4294967295, %v6218_v7  ;;  %v6603_v40 = vld [vmem:[#allocation8 + $0x8] sm:$0x7]  ;;  %vm645_vm9 = vcmp.gt.f32.partialorder %v6601_v39, 0.5  ;;  %vm649_vm10 = vcmask 89088  }
 0x1a4   :  { %v442_v10 = vand.u32 %v5485_v6, %v440_v9  ;;  %v6585_v35 = vsel %vm686_vm8, %v687_v32, 0  ;;  %vm646_vm11 = vcmp.gt.f32.partialorder %v6603_v40, 0.5  ;;  %vm653_vm12 = vcmask 83968   ;;  %s7464_s27 = sld [smem:[#allocation55_spill]]  ;;  %v6619_v0 = vld [vmem:[#allocation9] sm:$0x1] }
 0x1a5   :  { %v406_v3 = vld [vmem:[%s7461_s5] sm:$0xff]  ;;  %v407_v4 = vld [vmem:[%s7461_s5 + $0x8] sm:$0x7]  ;;  %s7465_s24 = sld [smem:[#allocation46_spill]]  ;;  %s7466_s7 = sld [smem:[#allocation47_spill]]  ;;  %vm852_vm13 = vcmask 1040384  }
 0x1a6   :  { %411 = vperm.xlu0 %5442, %v406_v3   ;;  %4931 = vmatpush3.bf16.msra.mxu0 %v442_v10  ;;  %v5486_v11 = vld [vmem:[%s7462_s20] sm:$0xff]   ;;  %v5487_v19 = vld [vmem:[%s7462_s20 + $0x8] sm:$0xff]   ;;  %s7467_s11 = sld [smem:[#allocation54_spill]]  ;;  %s7468_s19 = sld [smem:[#allocation56_spill]]  ;;  %vm848_vm14 = vcmask 15360   ;;  %vm1331_vm15 = vcmask 162816  }
 0x1a7   :  { %4944 = vmatprep.subr.bf16.mxu0 %v6217_v2  ;;  %4937 = vmatpush3.bf16.msra.mxu1 %v5486_v11  ;;  %s7469_s14 = sld [smem:[#allocation48_spill]]  ;;  %s7470_s16 = sld [smem:[#allocation49_spill]]  ;;  %vm1609_vm1 = vcmask 523264  }
 0x1a8   :  { %4938 = vmatprep.subr.bf16.mxu1 %v6217_v2  ;;  %v5488_v3 = vld [vmem:[%s7463_s10] sm:$0xff]   ;;  %s6220_s30 = smov 96   ;;  %s6221_s9 = smov 108  }
 0x1a9   :  { %s6222_s15 = smov 88   ;;  %s6223_s18 = smov 32  }
 0x1aa   :  { %414 = vperm.xlu0 %5442, %v407_v4   ;;  %v5489_v4 = vld [vmem:[%s7463_s10 + $0x8] sm:$0xff]   ;;  %v5490_v5 = vld [vmem:[%s7464_s27] sm:$0xff]   ;;  %s6224_s4 = smov 68   ;;  %s7471_s17 = sld [smem:[#allocation61_spill]] }
 0x1ab   :  { %4939 = vmatpush3.bf16.msra.mxu1 %v5487_v19  ;;  %v5491_v6 = vld [vmem:[%s7464_s27 + $0x8] sm:$0xff]   ;;  %s7472_s8 = sld [smem:[#allocation63_spill]]  ;;  %s7473_s23 = sld [smem:[#allocation62_spill]] }
 0x1ac   :  { %4950 = vmatprep.subr.bf16.mxu1 %v6217_v2  ;;  %s7474_s22 = sld [smem:[#allocation57_spill]]  ;;  %s7475_s21 = sld [smem:[#allocation59_spill]] }
 0x1ad   :  { %s7476_s26 = sld [smem:[#allocation58_spill]]  ;;  %s7477_s28 = sld [smem:[#allocation60_spill]] }
 0x1ae   :  { %s7478_s6 = sld [smem:[#allocation64_spill]]  ;;  %s7479_s29 = sld [smem:[#allocation50_spill]] }
 0x1af   :  { %s7480_s0 = sld [smem:[#allocation65_spill]]  ;;  %s7481_s25 = sld [smem:[#allocation51_spill]] }
 0x1b0   :  { %s7482_s2 = sld [smem:[#allocation68_spill]]  ;;  %s7483_s3 = sld [smem:[#allocation70_spill]] }
 0x1b1   :  { %s6225_s5 = smov [#allocation32]  }
 0x1b2   :  { %s4550_s20 = sshll.u32 %s6225_s5, 4  ;;  %s4551_s20 = int_to_ptr.vmem [resolvable:$true] %s4550_s20 }
 0x1b3   :  { %p6111_p5 = scmp.lt.s32.totalorder %s4551_s20, %s4551_s20 }
 0x225   :  { %v412_v14 = vpop.permute.xlu0 %411 }
 0x226   :  { %vm416_vm3 = vcmp.eq.s32.totalorder %v409_v13, %v412_v14 }
 0x227   :  { %v418_v16 = vsel %vm416_vm3, 1.0, %v6217_v2  ;;  %vm1655_vm3 = vcmask 785408  }
 0x229   :  { %v415_v15 = vpop.permute.xlu0 %414 }
 0x22a   :  { %vm417_vm4 = vcmp.eq.s32.totalorder %v409_v13, %v415_v15  ;;  %v6639_v13 = vld [vmem:[%s7465_s24] sm:$0xff] }
 0x22b   :  { %v419_v17 = vsel %vm417_vm4, 1.0, %v6217_v2  ;;  %vm3584_vm4 = vcmask 1043456  }
 0x22c   :  { %v423_v18 = vpack.c.bf16 %v419_v17, %v418_v16  ;;  %v6643_v17 = vld [vmem:[%s7465_s24 + $0x8] sm:$0x7] }
 0x22e   :  { %4933 = vmatmul.mubr.msk.bf16.vlgmr.msra.gmra.mrb[0].mxu0 %vm433_vm5, %v423_v18  ;;  %vm4332_vm5 = vcmask 3072  }
 0x22f   :  { %4946 = vmatprep.mubr.msk.bf16.mxu0 %vm6219_vm2, %v6217_v2 }
 0x301   :  { %v478_v20 = vpop.f32.mrb[0].mxu0 }
 0x302   :  { %v4934_v21 = vpop.f32.mrb[1].mxu0 }
 0x303   :  { %v481_v22 = vpop.f32.mrb[2].mxu0 }
 0x304   :  { %v489_v23 = vpack.c.bf16 %v481_v22, %v478_v20  ;;  %v4935_v24 = vpop.f32.mrb[3].mxu0  ;;  %v560_v22 = vld [vmem:[%s7466_s7] sm:$0x3] }
 0x306   :  { %4941 = vmatmul.mubr.msk.bf16.vlgmr.msra.gmra.mrb[0].mxu1 %vm509_vm6, %v489_v23 }
 0x307   :  { %4952 = vmatprep.mubr.msk.bf16.mxu1 %vm6219_vm2, %v6217_v2 }
 0x3d9   :  { %v547_v26 = vpop.f32.mrb[0].mxu1 }
 0x3da   :  { %v548_v27 = vadd.f32 %v4615_v25, %v547_v26  ;;  %v4942_v28 = vpop.f32.mrb[1].mxu1 }
 0x3db   :  { %v550_v29 = vpop.f32.mrb[2].mxu1 }
 0x3dc   :  { %v551_v30 = vadd.f32 %v4615_v25, %v550_v29  ;;  %v4943_v31 = vpop.f32.mrb[3].mxu1  ;;  %5551 = vtanh.f32 %v548_v27 }
 0x3de   :  { %5553 = vtanh.f32 %v551_v30 }
 0x3e6   :  { %v6580_v33 = vpop.eup %5551 }
 0x3e8   :  { %v6582_v34 = vpop.eup %5553 }
 0x3e9   :  { %v6589_v36 = vpack.c.bf16 %v6582_v34, %v6580_v33 }
 0x3eb   :  { %v600_v37 = vsel %vm509_vm6, %v6589_v36, 0  ;;  %v689_v38 = vand.u32 %v6585_v35, %v6589_v36 }
 0x3ec   :  { %4945 = vmatpush3.bf16.xpose.msra.mxu0 %v600_v37 }
 0x3ed   :  { %4951 = vmatpush3.bf16.msra.mxu1 %v689_v38  ;;  %4956 = vmatprep.subr.bf16.mxu0 %v6217_v2 }
 0x3ee   :  { %4962 = vmatprep.subr.bf16.mxu1 %v6217_v2 }
 0x3f3   :  { %4947 = vmatmul.mubr.msk.bf16.vlgmr.msra.gmra.mrb[4].mxu0 %vm509_vm6, %v6589_v36 }
 0x3f4   :  { %4958 = vmatprep.mubr.msk.bf16.mxu0 %vm6219_vm2, %v6217_v2 }
 0x4c6   :  { %v636_v41 = vpop.f32.mrb[4].mxu0 }
 0x4c7   :  { %v643_v42 = vmul.f32 0.17677669, %v636_v41  ;;  %v4948_v43 = vpop.f32.mrb[5].mxu0 }
 0x4c8   :  { %v639_v44 = vpop.f32.mrb[6].mxu0 }
 0x4c9   :  { %v644_v45 = vmul.f32 0.17677669, %v639_v44  ;;  %v4949_v46 = vpop.f32.mrb[7].mxu0  ;;  %v647_v47 = vsel %vm645_vm9, %v643_v42, -1e+30 }
 0x4ca   :  { %v650_v48 = vsel %vm649_vm10, %v647_v47, -inf }
 0x4cb   :  { %651 = vmax.xlane.f32.xlu1 %v650_v48  ;;  %v648_v49 = vsel %vm646_vm11, %v644_v45, -1e+30 }
 0x4cc   :  { %v654_v50 = vsel %vm653_vm12, %v648_v49, -inf }
 0x4cf   :  { %655 = vmax.xlane.f32.xlu1 %v654_v50 }
 0x558   :  { %v652_v51 = vpop.xlane.xlu1 %651 }
 0x559   :  { %v657_v52 = vmax.f32 %v652_v51, 0.0 }
 0x55b   :  { %v659_v53 = vsub.f32 %v647_v47, %v657_v52  ;;  %v671_v7 = vsub.f32 0.0, %v657_v52 }
 0x55c   :  { %v656_v54 = vpop.xlane.xlu1 %655 }
 0x55d   :  { %v661_v55 = vmul.f32 1.442695, %v659_v53  ;;  %v658_v56 = vmax.f32 %v656_v54, 0.0  ;;  %v673_v8 = vmul.f32 1.442695, %v671_v7  ;;  %v5494_v7 = vld [vmem:[%s7467_s11 + $0x8] sm:$0xff]  }
 0x55f   :  { %5555 = vpow2.f32 %v661_v55  ;;  %v660_v57 = vsub.f32 %v648_v49, %v658_v56  ;;  %v672_v9 = vsub.f32 0.0, %v658_v56 }
 0x561   :  { %v663_v58 = vmul.f32 1.442695, %v660_v57  ;;  %v675_v10 = vmul.f32 1.442695, %v672_v9  ;;  %v5495_v9 = vld [vmem:[%s7468_s19] ss:$8 sps:$4 sm:$0xff]  }
 0x563   :  { %5557 = vpow2.f32 %v663_v58 }
 0x564   :  { %5559 = vpow2.f32 %v673_v8  ;;  %v5497_v8 = vld [vmem:[%s7468_s19 + $0x4] ss:$8 sps:$4 sm:$0xff]  }
 0x565   :  { %5561 = vpow2.f32 %v675_v10  ;;  %v5500_v10 = vld [vmem:[%s7468_s19 + $0x14] ss:$8 sps:$4 sm:$0xff]  }
 0x569   :  { %v5556_v59 = vpop.eup %5555 }
 0x56a   :  { %v665_v60 = vsel %vm649_vm10, %v5556_v59, 0.0 }
 0x56b   :  { %666 = vadd.xlane.f32.xlu0 %v665_v60 }
 0x56d   :  { %v5558_v61 = vpop.eup %5557 }
 0x56e   :  { %v668_v62 = vsel %vm653_vm12, %v5558_v61, 0.0  ;;  %v681_v63 = vpack.c.bf16 %v5558_v61, %v5556_v59  ;;  %v5560_v11 = vpop.eup %5559 }
 0x56f   :  { %669 = vadd.xlane.f32.xlu1 %v668_v62  ;;  %v677_v14 = vmul.f32 %v5560_v11, %v6639_v13  ;;  %v5562_v15 = vpop.eup %5561  ;;  %v5498_v11 = vld [vmem:[%s7468_s19 + $0x10] ss:$8 sps:$4 sm:$0xff]  }
 0x570   :  { %4953 = vmatmul.mubr.msk.bf16.vlgmr.msra.gmra.mrb[4].mxu1 %vm649_vm10, %v681_v63  ;;  %v678_v19 = vmul.f32 %v5562_v15, %v6643_v17  ;;  %v6689_v15 = vld [vmem:[%s7469_s14 + $0x8] ss:$0 sps:$4 sm:$0x33]  }
 0x571   :  { %4963 = vmatpush3.bf16.msra.mxu1 %v689_v38  ;;  %4964 = vmatprep.mubr.msk.bf16.mxu1 %vm6219_vm2, %v6217_v2 }
 0x572   :  { %4974 = vmatprep.subr.bf16.mxu1 %v6217_v2 }
 0x578   :  { %4965 = vmatmul.mubr.msk.bf16.vlgmr.msra.gmra.mrb[8].mxu1 %vm649_vm10, %v6619_v0 }
 0x579   :  { %4975 = vmatpush3.bf16.msra.mxu1 %v5488_v3  ;;  %4978 = vmatprep.mubr.msk.bf16.mxu1 %vm6219_vm2, %v6217_v2 }
 0x57a   :  { %4976 = vmatprep.subr.bf16.mxu1 %v6217_v2 }
 0x57d   :  { %4977 = vmatpush3.bf16.msra.mxu1 %v5489_v4 }
 0x57e   :  { %4990 = vmatprep.subr.bf16.mxu1 %v6217_v2 }
 0x580   :  { %4979 = vmatmul.mubr.msk.bf16.vlgmr.msra.gmra.mrb[12].mxu1 %vm509_vm6, %v6589_v36 }
 0x581   :  { %4991 = vmatpush3.bf16.msra.mxu1 %v5490_v5  ;;  %4994 = vmatprep.mubr.msk.bf16.mxu1 %vm6219_vm2, %v6217_v2  ;;  %v6663_v5 = vld [vmem:[#allocation11] sm:$0x3f]  }
 0x582   :  { %4992 = vmatprep.subr.bf16.mxu1 %v6217_v2 }
 0x585   :  { %4993 = vmatpush3.bf16.msra.mxu1 %v5491_v6  ;;  %v5493_v6 = vld [vmem:[%s7467_s11] sm:$0xff]  }
 0x588   :  { %4995 = vmatmul.mubr.msk.bf16.vlgmr.msra.gmra.mrb[16].mxu1 %vm509_vm6, %v6589_v36 }
 0x5f8   :  { %v667_v16 = vpop.xlane.xlu0 %666 }
 0x5f9   :  { %v679_v18 = vadd.f32 %v677_v14, %v667_v16  ;;  %v6684_v14 = vld [vmem:[%s7469_s14] sm:$0xff]  }
 0x5fa   :  { %5000 = vmatprep.mubr.msk.bf16.mxu1 %vm649_vm10, %v6684_v14 }
 0x5fb   :  { %734 = vperm.xlu1 %5443, %v679_v18  }
 0x5fc   :  { %v670_v20 = vpop.xlane.xlu1 %669 }
 0x5fd   :  { %v680_v21 = vadd.f32 %v678_v19, %v670_v20 }
 0x5ff   :  { %739 = vperm.xlu1 %5443, %v680_v21   ;;  %v6698_v21 = vshrl.u32 %v408_v12, 7 }
 0x603   :  { %836 = vperm.xlu1 %5443, %v560_v22  }
 0x643   :  { %v725_v23 = vpop.f32.mrb[4].mxu1 }
 0x644   :  { %v4954_v24 = vpop.f32.mrb[5].mxu1 }
 0x645   :  { %v728_v25 = vpop.f32.mrb[6].mxu1 }
 0x646   :  { %v4955_v26 = vpop.f32.mrb[7].mxu1 }
 0x647   :  { %v1105_v26 = vsub.s32 0, %v6698_v21 }
 0x64b   :  { %v828_v27 = vpop.f32.mrb[8].mxu1 }
 0x64c   :  { %v4966_v28 = vpop.f32.mrb[9].mxu1 }
 0x64d   :  { %v831_v29 = vpop.f32.mrb[10].mxu1  ;;  %v1109_v28 = vsub.s32 1, %v6698_v21 }
 0x64e   :  { %v4967_v30 = vpop.f32.mrb[11].mxu1 }
 0x653   :  { %v6647_v31 = vpop.f32.mrb[12].mxu1 }
 0x654   :  { %v4980_v32 = vpop.f32.mrb[13].mxu1 }
 0x655   :  { %v6649_v37 = vpop.f32.mrb[14].mxu1 }
 0x656   :  { %v4981_v38 = vpop.f32.mrb[15].mxu1 }
 0x65b   :  { %v1090_v41 = vpop.f32.mrb[16].mxu1 }
 0x65c   :  { %v4996_v42 = vpop.f32.mrb[17].mxu1 }
 0x65d   :  { %v1093_v43 = vpop.f32.mrb[18].mxu1 }
 0x65e   :  { %v1176_v44 = vpack.c.bf16 %v1093_v43, %v1090_v41  ;;  %v4997_v45 = vpop.f32.mrb[19].mxu1 }
 0x660   :  { %v1192_v46 = vand.u32 %v1176_v44, %v6585_v35 }
 0x662   :  { %4998 = vmatprep.subr.bf16.mxu1 %v1192_v46 }
 0x663   :  { %4999 = vmatpush3.bf16.msra.mxu1 %v1192_v46 }
 0x664   :  { %5004 = vmatprep.subr.bf16.mxu1 %v6217_v2 }
 0x666   :  { %5001 = vmatmul.mubr.msk.bf16.vlgmr.msra.gmra.mrb[20].mxu1 %vm649_vm10, %v6689_v15 }
 0x667   :  { %5008 = vmatprep.mubr.msk.bf16.mxu1 %vm6219_vm2, %v6217_v2 }
 0x67a   :  { %v735_v47 = vpop.permute.xlu1 %734 }
 0x67b   :  { %5563 = vrcp.f32 %v735_v47 }
 0x67e   :  { %v740_v48 = vpop.permute.xlu1 %739 }
 0x67f   :  { %5565 = vrcp.f32 %v740_v48 }
 0x682   :  { %v6659_v55 = vpop.permute.xlu1 %836 }
 0x683   :  { %v839_v56 = vmul.f32 %v6659_v55, %v828_v27  ;;  %v1101_v27 = vld [vmem:[#allocation15] sm:$0x3] }
 0x684   :  { %v1106_v29 = vrot.slane %v1101_v27, %v1105_v26  ;;  %v1110_v12 = vrot.slane %v1101_v27, %v1109_v28  ;;  %v4625_v27 = vld [vmem:[#allocation14] ss:$0 sm:$0xff] }
 0x685   :  { %v5564_v49 = vpop.eup %5563  ;;  %v840_v58 = vmul.f32 0.027777778, %v839_v56 }
 0x686   :  { %v743_v51 = vmul.f32 %v5564_v49, %v725_v23 }
 0x689   :  { %v5566_v50 = vpop.eup %5565 }
 0x68a   :  { %v745_v52 = vmul.f32 %v5566_v50, %v728_v25  ;;  %v6713_v50 = vld [vmem:[%s7470_s16] sm:$0xff]  }
 0x68c   :  { %v746_v53 = vpack.c.bf16 %v745_v52, %v743_v51  ;;  %v6720_v51 = vld [vmem:[%s7470_s16 + $0x8] ss:$0 sps:$4 sm:$0x33]  }
 0x68e   :  { %v751_v54 = vand.u32 %v746_v53, %v6585_v35 }
 0x690   :  { %4957 = vmatpush3.bf16.msra.mxu0 %v751_v54 }
 0x691   :  { %4968 = vmatprep.subr.bf16.mxu0 %v6217_v2 }
 0x693   :  { %4959 = vmatmul.mubr.msk.bf16.vlgmr.msra.gmra.mrb[8].mxu0 %vm649_vm10, %v6619_v0 }
 0x694   :  { %4970 = vmatprep.mubr.msk.bf16.mxu0 %vm6219_vm2, %v6217_v2 }
 0x739   :  { %v5002_v52 = vpop.f32.mrb[20].mxu1 }
 0x73a   :  { %v1228_v53 = vpop.f32.mrb[21].mxu1 }
 0x73b   :  { %v5003_v54 = vpop.f32.mrb[22].mxu1 }
 0x73c   :  { %v1231_v56 = vpop.f32.mrb[23].mxu1 }
 0x766   :  { %v787_v57 = vpop.f32.mrb[8].mxu0 }
 0x767   :  { %v793_v59 = vmul.f32 0.16666667, %v787_v57  ;;  %v4960_v60 = vpop.f32.mrb[9].mxu0 }
 0x768   :  { %v790_v61 = vpop.f32.mrb[10].mxu0 }
 0x769   :  { %v841_v62 = vadd.f32 %v840_v58, %v793_v59  ;;  %v4961_v63 = vpop.f32.mrb[11].mxu0 }
 0x76b   :  { %v842_v3 = vpack.c.bf16 %v841_v62, %v841_v62 }
 0x76d   :  { %v854_v4 = vsel %vm852_vm13, %v842_v3, 0 }
 0x76e   :  { %4969 = vmatpush3.bf16.msra.mxu0 %v854_v4 }
 0x76f   :  { %4982 = vmatprep.subr.bf16.mxu0 %v6217_v2 }
 0x771   :  { %4971 = vmatmul.mubr.msk.bf16.vlgmr.msra.gmra.mrb[12].mxu0 %vm848_vm14, %v6663_v5 }
 0x772   :  { %4983 = vmatpush3.bf16.msra.mxu0 %v5493_v6  ;;  %4986 = vmatprep.mubr.msk.bf16.mxu0 %vm6219_vm2, %v6217_v2 }
 0x773   :  { %4984 = vmatprep.subr.bf16.mxu0 %v6217_v2 }
 0x776   :  { %4985 = vmatpush3.bf16.msra.mxu0 %v5494_v7 }
 0x777   :  { %1133 = vmatprep.subr.bf16.mxu0 %v5497_v8 }
 0x779   :  { %4987 = vmatmul.mubr.msk.bf16.vlgmr.msra.gmra.mrb[16].mxu0 %vm509_vm6, %v6589_v36 }
 0x77a   :  { %1134 = vmatpush1.bf16.msra.mxu0 %v5495_v9  ;;  %1165 = vmatprep.mubr.bf16.mxu0 %v6216_v1 }
 0x77b   :  { %1135 = vmatprep.subr.bf16.mxu0 %v5500_v10 }
 0x77e   :  { %1136 = vmatpush1.bf16.msra.mxu0 %v5498_v11 }
 0x781   :  { %4639 = vmatmul.mubr.msk.bf16.vlgmr.msra.gmra.mrb[20].mxu0 %vm509_vm6, %v6589_v36 }
 0x782   :  { %1296 = vmatprep.mubr.bf16.mxu0 %v6216_v1 }
 0x844   :  { %v890_v16 = vpop.f32.mrb[12].mxu0 }
 0x845   :  { %v4972_v18 = vpop.f32.mrb[13].mxu0 }
 0x846   :  { %v893_v19 = vpop.f32.mrb[14].mxu0 }
 0x847   :  { %v6695_v20 = vpack.i.bf16 %v893_v19, %v890_v16  ;;  %v4973_v36 = vpop.f32.mrb[15].mxu0 }
 0x84c   :  { %v6700_v22 = vpop.f32.mrb[16].mxu0 }
 0x84d   :  { %v4988_v23 = vpop.f32.mrb[17].mxu0 }
 0x84e   :  { %v6702_v24 = vpop.f32.mrb[18].mxu0  ;;  %v6729_v23 = vld [vmem:[#allocation12] sm:$0x3f]  }
 0x84f   :  { %v4989_v25 = vpop.f32.mrb[19].mxu0 }
 0x854   :  { %v1167_v30 = vpop.f32.mrb[20].mxu0 }
 0x855   :  { %v1169_v32 = vpop.f32.mrb[21].mxu0  ;;  %v1168_v41 = vadd.f32 %v1167_v30, %v1106_v29  ;;  %v6754_v30 = vadd.f32 %v4625_v27, %v6649_v37 }
 0x856   :  { %v1171_v38 = vpop.f32.mrb[22].mxu0  ;;  %v1170_v44 = vadd.f32 %v1169_v32, %v1110_v12 }
 0x857   :  { %v1172_v42 = vadd.f32 %v1171_v38, %v1106_v29  ;;  %v1173_v43 = vpop.f32.mrb[23].mxu0  ;;  %v6744_v29 = vadd.f32 %v4625_v27, %v6647_v31 }
 0x858   :  { %v1174_v45 = vadd.f32 %v1173_v43, %v1110_v12 }
 0x859   :  { %v1242_v46 = vpack.c.bf16 %v1172_v42, %v1168_v41 }
 0x85a   :  { %v1243_v47 = vpack.c.bf16 %v1174_v45, %v1170_v44 }
 0x85b   :  { %v1259_v49 = vand.u32 %v1242_v46, %v6585_v35 }
 0x85c   :  { %v1262_v48 = vand.u32 %v1243_v47, %v6585_v35 }
 0x85e   :  { %1264 = vmatprep.subr.bf16.mxu0 %v1262_v48 }
 0x85f   :  { %1265 = vmatpush1.bf16.msra.mxu0 %v1259_v49 }
 0x860   :  { %5020 = vmatprep.subr.bf16.mxu0 %v6217_v2 }
 0x862   :  { %4646 = vmatmul.mubr.msk.bf16.vlgmr.msra.gmra.mrb[24].mxu0 %vm649_vm10, %v6713_v50 }
 0x863   :  { %1306 = vmatprep.mubr.bf16.mxu0 %v6216_v1 }
 0x86a   :  { %4647 = vmatmul.mubr.msk.bf16.gmra.mrb[28].mxu0 %vm649_vm10, %v6720_v51 }
 0x86b   :  { %5024 = vmatprep.mubr.msk.bf16.mxu0 %vm6219_vm2, %v6217_v2 }
 0x935   :  { %v1298_v57 = vpop.f32.mrb[24].mxu0 }
 0x936   :  { %v1300_v58 = vpop.f32.mrb[25].mxu0 }
 0x937   :  { %v1315_v59 = vmul.f32 %v1300_v58, %v1228_v53  ;;  %v1302_v60 = vpop.f32.mrb[26].mxu0 }
 0x938   :  { %v1304_v61 = vpop.f32.mrb[27].mxu0 }
 0x939   :  { %v1318_v62 = vadd.f32 %v1315_v59, %v1298_v57  ;;  %v1316_v63 = vmul.f32 %v1304_v61, %v1231_v56 }
 0x93b   :  { %v1319_v3 = vadd.f32 %v1316_v63, %v1302_v60  ;;  %v1321_v4 = vmax.f32 %v1318_v62, 0.0  ;;  %v6791_v60 = vld [vmem:[%s7471_s17] sm:$0xff]   ;;  %v6796_v63 = vld [vmem:[%s7471_s17 + $0x8] sm:$0xff]  }
 0x93d   :  { %v1322_v6 = vmax.f32 %v1319_v3, 0.0  ;;  %v1308_v7 = vpop.f32.mrb[28].mxu0 }
 0x93e   :  { %v1310_v8 = vpop.f32.mrb[29].mxu0 }
 0x93f   :  { %v1324_v9 = vpack.c.bf16 %v1322_v6, %v1321_v4  ;;  %v1317_v10 = vmul.f32 %v5002_v52, %v1310_v8  ;;  %v1312_v11 = vpop.f32.mrb[30].mxu0  ;;  %v5444_v8 = vpack.i.bf16 %v6582_v34, %v6580_v33 }
 0x940   :  { %v1313_v16 = vpop.f32.mrb[31].mxu0 }
 0x941   :  { %v1320_v18 = vadd.f32 %v1317_v10, %v1308_v7  ;;  %1393 = vrot.lane.b32.xlu1 %v1324_v9, %s6220_s30  ;;  %5005 = vmatpush3.bf16.msra.mxu1 %v1324_v9  ;;  %v6803_v7 = vld [vmem:[%s7471_s17 + $0x10] sm:$0xff]  }
 0x942   :  { %5006 = vmatprep.subr.bf16.mxu1 %v6217_v2 }
 0x943   :  { %v1323_v19 = vmax.f32 %v1320_v18, 0.0 }
 0x945   :  { %v1325_v36 = vpack.c.bf16 %v1323_v19, %v1323_v19  ;;  %1457 = vrot.lane.b32.xlu1 %v1324_v9, %s6198_s1 }
 0x947   :  { %1395 = vrot.lane.b32.xlu0 %v1325_v36, %s6220_s30  ;;  %v1336_v25 = vsel %vm437_vm0, %v1325_v36, 0 }
 0x948   :  { %5007 = vmatpush3.bf16.msra.mxu1 %v1336_v25 }
 0x949   :  { %1389 = vrot.lane.b32.xlu1 %v6729_v23, %s6221_s9  ;;  %5012 = vmatprep.subr.bf16.mxu1 %v6217_v2 }
 0x94b   :  { %1455 = vrot.lane.b32.xlu0 %v6729_v23, %s6222_s15  ;;  %5009 = vmatmul.mubr.msk.bf16.vlgmr.msra.gmra.mrb[24].mxu1 %vm1331_vm15, %v6729_v23 }
 0x94c   :  { %5016 = vmatprep.mubr.msk.bf16.mxu1 %vm6219_vm2, %v6217_v2 }
 0x94d   :  { %1521 = vrot.lane.b32.xlu1 %v1324_v9, %s6223_s18  ;;  %v6811_v9 = vld [vmem:[%s7471_s17 + $0x18] sm:$0xff]  }
 0x94f   :  { %1020 = vrot.lane.b32.xlu0 %v6700_v22, %s6223_s18 }
 0x951   :  { %1459 = vrot.lane.b32.xlu1 %v1325_v36, %s6198_s1 }
 0x953   :  { %1030 = vrot.lane.b32.xlu0 %v6744_v29, %s6223_s18 }
 0x955   :  { %1523 = vrot.lane.b32.xlu1 %v1325_v36, %s6223_s18 }
 0x959   :  { %1519 = vrot.lane.b32.xlu1 %v6729_v23, %s6224_s4 }
 0x95d   :  { %1022 = vrot.lane.b32.xlu1 %v6702_v24, %s6223_s18 }
 0x961   :  { %1032 = vrot.lane.b32.xlu1 %v6754_v30, %s6223_s18 }
 0x9b3   :  { %v1394_v31 = vpop.permute.xlu1 %1393 }
 0x9b4   :  { %5013 = vmatpush3.bf16.msra.mxu1 %v1394_v31 }
 0x9b5   :  { %5014 = vmatprep.subr.bf16.mxu1 %v6217_v2 }
 0x9b7   :  { %v1458_v22 = vpop.permute.xlu1 %1457 }
 0x9b8   :  { %5021 = vmatpush3.bf16.msra.mxu0 %v1458_v22 }
 0x9b9   :  { %v1396_v12 = vpop.permute.xlu0 %1395  ;;  %5022 = vmatprep.subr.bf16.mxu0 %v6217_v2 }
 0x9ba   :  { %v1402_v32 = vsel %vm437_vm0, %v1396_v12, 0 }
 0x9bb   :  { %v6761_v38 = vpop.permute.xlu1 %1389  ;;  %5015 = vmatpush3.bf16.msra.mxu1 %v1402_v32 }
 0x9bc   :  { %5028 = vmatprep.subr.bf16.mxu1 %v6217_v2 }
 0x9bd   :  { %v6771_v42 = vpop.permute.xlu0 %1455 }
 0x9be   :  { %5017 = vmatmul.mubr.msk.bf16.vlgmr.msra.gmra.mrb[28].mxu1 %vm1331_vm15, %v6761_v38 }
 0x9bf   :  { %v1522_v37 = vpop.permute.xlu1 %1521  ;;  %5032 = vmatprep.mubr.msk.bf16.mxu1 %vm6219_vm2, %v6217_v2 }
 0x9c0   :  { %5029 = vmatpush3.bf16.msra.mxu1 %v1522_v37 }
 0x9c1   :  { %5030 = vmatprep.subr.bf16.mxu1 %v6217_v2  ;;  %v1021_v10 = vpop.permute.xlu0 %1020 }
 0x9c2   :  { %v1026_v36 = vmul.f32 %v1021_v10, %v6744_v29 }
 0x9c3   :  { %v1460_v24 = vpop.permute.xlu1 %1459 }
 0x9c4   :  { %v1466_v41 = vsel %vm437_vm0, %v1460_v24, 0 }
 0x9c5   :  { %5023 = vmatpush3.bf16.msra.mxu0 %v1466_v41  ;;  %v1031_v16 = vpop.permute.xlu0 %1030  ;;  %v6819_v41 = vld [vmem:[%s7471_s17 + $0x20] sm:$0xff]  }
 0x9c6   :  { %5036 = vmatprep.subr.bf16.mxu0 %v6217_v2  ;;  %v1036_v31 = vadd.f32 %v1031_v16, %v1026_v36 }
 0x9c7   :  { %v1524_v43 = vpop.permute.xlu1 %1523 }
 0x9c8   :  { %v1530_v44 = vsel %vm437_vm0, %v1524_v43, 0  ;;  %5025 = vmatmul.mubr.msk.bf16.vlgmr.msra.gmra.mrb[32].mxu0 %vm1331_vm15, %v6771_v42  ;;  %v1038_v37 = vmax.f32 %v1036_v31, 0.0  ;;  %v6851_v31 = vld [vmem:[#allocation20] ss:$0 sm:$0xff] }
 0x9c9   :  { %5031 = vmatpush3.bf16.msra.mxu1 %v1530_v44  ;;  %5048 = vmatprep.mubr.msk.bf16.mxu0 %vm6219_vm2, %v6217_v2 }
 0x9ca   :  { %5052 = vmatprep.subr.bf16.mxu1 %v6217_v2  ;;  %5037 = vmatpush3.bf16.msra.mxu0 %v6791_v60 }
 0x9cb   :  { %v6779_v45 = vpop.permute.xlu1 %1519  ;;  %5038 = vmatprep.subr.bf16.mxu0 %v6217_v2 }
 0x9cc   :  { %5033 = vmatmul.mubr.msk.bf16.vlgmr.msra.gmra.mrb[32].mxu1 %vm1331_vm15, %v6779_v45 }
 0x9cd   :  { %5056 = vmatprep.mubr.msk.bf16.mxu1 %vm6219_vm2, %v6217_v2 }
 0x9ce   :  { %5039 = vmatpush3.bf16.msra.mxu0 %v6796_v63 }
 0x9cf   :  { %5040 = vmatprep.subr.bf16.mxu0 %v6217_v2  ;;  %v1023_v11 = vpop.permute.xlu1 %1022 }
 0x9d0   :  { %v1027_v25 = vmul.f32 %v1023_v11, %v6754_v30 }
 0x9d2   :  { %5041 = vmatpush3.bf16.msra.mxu0 %v6803_v7 }
 0x9d3   :  { %5042 = vmatprep.subr.bf16.mxu0 %v6217_v2  ;;  %v1033_v18 = vpop.permute.xlu1 %1032 }
 0x9d4   :  { %v1037_v22 = vadd.f32 %v1033_v18, %v1027_v25 }
 0x9d6   :  { %5043 = vmatpush3.bf16.msra.mxu0 %v6811_v9  ;;  %v1039_v24 = vmax.f32 %v1037_v22, 0.0 }
 0x9d7   :  { %5044 = vmatprep.subr.bf16.mxu0 %v6217_v2 }
 0x9da   :  { %5045 = vmatpush3.bf16.msra.mxu0 %v6819_v41 }
 0x9db   :  { %5046 = vmatprep.subr.bf16.mxu0 %v6217_v2 }
 0xa1e   :  { %v1372_v46 = vpop.f32.mrb[24].mxu1 }
 0xa1f   :  { %1381 = vrot.lane.b32.xlu0 %v1372_v46, %s6223_s18  ;;  %v5010_v47 = vpop.f32.mrb[25].mxu1 }
 0xa20   :  { %v1375_v48 = vpop.f32.mrb[26].mxu1 }
 0xa21   :  { %1383 = vrot.lane.b32.xlu1 %v1375_v48, %s6223_s18  ;;  %v5011_v49 = vpop.f32.mrb[27].mxu1  ;;  %v6824_v48 = vld [vmem:[%s7471_s17 + $0x28] sm:$0xff]  }
 0xa22   :  { %5047 = vmatpush3.bf16.msra.mxu0 %v6824_v48 }
 0xa23   :  { %5072 = vmatprep.subr.bf16.mxu0 %v6217_v2 }
 0xa91   :  { %v1438_v52 = vpop.f32.mrb[28].mxu1  ;;  %v1382_v19 = vpop.permute.xlu0 %1381 }
 0xa92   :  { %1447 = vrot.lane.b32.xlu0 %v1438_v52, %s6223_s18  ;;  %v5018_v53 = vpop.f32.mrb[29].mxu1  ;;  %v1387_v44 = vadd.f32 %v1382_v19, %v1038_v37 }
 0xa93   :  { %v1441_v54 = vpop.f32.mrb[30].mxu1  ;;  %v1384_v27 = vpop.permute.xlu1 %1383 }
 0xa94   :  { %1449 = vrot.lane.b32.xlu1 %v1441_v54, %s6223_s18  ;;  %v5019_v56 = vpop.f32.mrb[31].mxu1  ;;  %v1388_v46 = vadd.f32 %v1384_v27, %v1039_v24  ;;  %v6847_v27 = vld [vmem:[%s7472_s8] sm:$0xff]  }
 0xa95   :  { %5053 = vmatpush3.bf16.msra.mxu1 %v6847_v27 }
 0xa96   :  { %5054 = vmatprep.subr.bf16.mxu1 %v6217_v2 }
 0xa9b   :  { %v1502_v57 = vpop.f32.mrb[32].mxu0 }
 0xa9c   :  { %1511 = vrot.lane.b32.xlu0 %v1502_v57, %s6223_s18  ;;  %v5026_v58 = vpop.f32.mrb[33].mxu0 }
 0xa9d   :  { %v1505_v59 = vpop.f32.mrb[34].mxu0 }
 0xa9e   :  { %1513 = vrot.lane.b32.xlu1 %v1505_v59, %s6223_s18  ;;  %v5027_v61 = vpop.f32.mrb[35].mxu0 }
 0xa9f   :  { %v1566_v62 = vpop.f32.mrb[32].mxu1 }
 0xaa0   :  { %v5034_v3 = vpop.f32.mrb[33].mxu1  ;;  %1575 = vrot.lane.b32.xlu0 %v1566_v62, %s6223_s18 }
 0xaa1   :  { %v1569_v4 = vpop.f32.mrb[34].mxu1 }
 0xaa2   :  { %v5035_v6 = vpop.f32.mrb[35].mxu1  ;;  %1577 = vrot.lane.b32.xlu1 %v1569_v4, %s6223_s18 }
 0xaa6   :  { %5445 = vrot.lane.b32.xlu1 %v5444_v8, %s6223_s18 }
 0xb04   :  { %v1448_v12 = vpop.permute.xlu0 %1447 }
 0xb05   :  { %v1453_v29 = vadd.f32 %v1448_v12, %v1387_v44 }
 0xb06   :  { %v1450_v32 = vpop.permute.xlu1 %1449 }
 0xb07   :  { %v1454_v30 = vadd.f32 %v1450_v32, %v1388_v46 }
 0xb0e   :  { %v1512_v43 = vpop.permute.xlu0 %1511 }
 0xb0f   :  { %v1517_v52 = vadd.f32 %v1512_v43, %v1453_v29 }
 0xb10   :  { %v1514_v47 = vpop.permute.xlu1 %1513 }
 0xb11   :  { %v1518_v53 = vadd.f32 %v1514_v47, %v1454_v30 }
 0xb12   :  { %v1576_v49 = vpop.permute.xlu0 %1575 }
 0xb13   :  { %v1581_v56 = vadd.f32 %v1576_v49, %v1517_v52  ;;  %v6856_v49 = vld [vmem:[%s7472_s8 + $0x8] sm:$0xff]  }
 0xb14   :  { %v1578_v54 = vpop.permute.xlu1 %1577  ;;  %5055 = vmatpush3.bf16.msra.mxu1 %v6856_v49 }
 0xb15   :  { %v1582_v57 = vadd.f32 %v1578_v54, %v1518_v53  ;;  %5060 = vmatprep.subr.bf16.mxu1 %v6217_v2 }
 0xb17   :  { %v5449_v58 = vpack.i.bf16 %v1582_v57, %v1581_v56 }
 0xb18   :  { %v5446_v61 = vpop.permute.xlu1 %5445 }
 0xb19   :  { %5450 = vrot.lane.b32.xlu0 %v5449_v58, %s6220_s30  ;;  %v5448_v4 = vunpack.i.h.bf16 %v5446_v61  ;;  %v5447_v6 = vunpack.i.l.bf16 %v5446_v61 }
 0xb1d   :  { %5455 = vrot.lane.b32.xlu0 %v6695_v20, %s6198_s1 }
 0xb8b   :  { %v6831_v59 = vpop.permute.xlu0 %5450 }
 0xb8c   :  { %v5453_v62 = vunpack.i.h.bf16 %v6831_v59  ;;  %v5452_v3 = vunpack.i.l.bf16 %v6831_v59 }
 0xb8e   :  { %v1607_v16 = vsel %vm509_vm6, %v5452_v3, %v5447_v6  ;;  %v1608_v18 = vsel %vm509_vm6, %v5453_v62, %v5448_v4  ;;  %v6867_v4 = vld [vmem:[%s7473_s23] sm:$0xff]  }
 0xb8f   :  { %v5456_v8 = vpop.permute.xlu0 %5455 }
 0xb90   :  { %v5458_v10 = vunpack.i.h.bf16 %v5456_v8  ;;  %v5457_v11 = vunpack.i.l.bf16 %v5456_v8  ;;  %v6872_v8 = vld [vmem:[%s7473_s23 + $0x8] sm:$0xff]  }
 0xb92   :  { %v1610_v19 = vsel %vm1609_vm1, %v1607_v16, %v5457_v11  ;;  %v1611_v36 = vsel %vm1609_vm1, %v1608_v18, %v5458_v10  ;;  %v6879_v10 = vld [vmem:[%s7473_s23 + $0x10] sm:$0xff]   ;;  %v6884_v18 = vld [vmem:[%s7473_s23 + $0x18] sm:$0xff]  }
 0xb93   :  { %v1612_v25 = vpack.c.bf16 %v1611_v36, %v1610_v19 }
 0xb95   :  { %5049 = vmatmul.mubr.msk.bf16.vlgmr.msra.gmra.mrb[36].mxu0 %vm1655_vm3, %v1612_v25 }
 0xb96   :  { %5074 = vmatprep.mubr.msk.bf16.mxu0 %vm6219_vm2, %v6217_v2 }
 0xc68   :  { %v1693_v22 = vpop.f32.mrb[36].mxu0 }
 0xc69   :  { %v1694_v12 = vadd.f32 %v6851_v31, %v1693_v22  ;;  %v5050_v32 = vpop.f32.mrb[37].mxu0 }
 0xc6a   :  { %v1696_v37 = vpop.f32.mrb[38].mxu0 }
 0xc6b   :  { %v4661_v24 = vmul.f32 -1.442695, %v1694_v12  ;;  %v1697_v43 = vadd.f32 %v6851_v31, %v1696_v37  ;;  %v5051_v44 = vpop.f32.mrb[39].mxu0 }
 0xc6d   :  { %5567 = vpow2.f32 %v4661_v24  ;;  %v4662_v46 = vmul.f32 -1.442695, %v1697_v43  ;;  %v6898_v24 = vld [vmem:[#allocation21] ss:$0 sm:$0xff] }
 0xc6f   :  { %5569 = vpow2.f32 %v4662_v46 }
 0xc77   :  { %v5568_v47 = vpop.eup %5567 }
 0xc78   :  { %v1706_v29 = vadd.f32 1.0, %v5568_v47 }
 0xc79   :  { %v5570_v30 = vpop.eup %5569 }
 0xc7a   :  { %5571 = vrcp.f32 %v1706_v29  ;;  %v1707_v52 = vadd.f32 1.0, %v5570_v30 }
 0xc7c   :  { %5573 = vrcp.f32 %v1707_v52 }
 0xc84   :  { %v5572_v53 = vpop.eup %5571 }
 0xc85   :  { %1723 = vrot.lane.b32.xlu1 %v5572_v53, %s6220_s30  ;;  %v1868_v30 = vsub.f32 1.0, %v5572_v53 }
 0xc86   :  { %v5574_v54 = vpop.eup %5573 }
 0xc87   :  { %1725 = vrot.lane.b32.xlu0 %v5574_v54, %s6220_s30  ;;  %v1869_v52 = vsub.f32 1.0, %v5574_v54 }
 0xc89   :  { %5460 = vrot.lane.b32.xlu1 %v6695_v20, %s6223_s18 }
 0xcf7   :  { %v1724_v56 = vpop.permute.xlu1 %1723 }
 0xcf8   :  { %v1729_v58 = vmul.f32 %v6580_v33, %v1724_v56 }
 0xcf9   :  { %v1726_v57 = vpop.permute.xlu0 %1725 }
 0xcfa   :  { %v1730_v61 = vmul.f32 %v6582_v34, %v1726_v57 }
 0xcfb   :  { %v5461_v20 = vpop.permute.xlu1 %5460 }
 0xcfc   :  { %v1731_v6 = vpack.c.bf16 %v1730_v61, %v1729_v58  ;;  %v5463_v11 = vunpack.i.h.bf16 %v5461_v20  ;;  %v5462_v16 = vunpack.i.l.bf16 %v5461_v20  ;;  %v1870_v61 = vmul.f32 %v6580_v33, %v1868_v30 }
 0xcfd   :  { %v1871_v20 = vmul.f32 %v6582_v34, %v1869_v52 }
 0xcfe   :  { %5057 = vmatmul.mubr.msk.bf16.vlgmr.msra.gmra.mrb[36].mxu1 %vm509_vm6, %v1731_v6  ;;  %v1719_v19 = vsel %vm509_vm6, %v5453_v62, %v5463_v11  ;;  %v1718_v36 = vsel %vm509_vm6, %v5452_v3, %v5462_v16 }
 0xcff   :  { %5061 = vmatpush3.bf16.msra.mxu1 %v6867_v4  ;;  %5068 = vmatprep.mubr.msk.bf16.mxu1 %vm6219_vm2, %v6217_v2  ;;  %v1720_v25 = vpack.c.bf16 %v1719_v19, %v1718_v36 }
 0xd00   :  { %5062 = vmatprep.subr.bf16.mxu1 %v6217_v2 }
 0xd03   :  { %5063 = vmatpush3.bf16.msra.mxu1 %v6872_v8 }
 0xd04   :  { %5064 = vmatprep.subr.bf16.mxu1 %v6217_v2 }
 0xd07   :  { %5065 = vmatpush3.bf16.msra.mxu1 %v6879_v10 }
 0xd08   :  { %5066 = vmatprep.subr.bf16.mxu1 %v6217_v2 }
 0xd0b   :  { %5067 = vmatpush3.bf16.msra.mxu1 %v6884_v18 }
 0xd0c   :  { %5078 = vmatprep.subr.bf16.mxu1 %v6217_v2 }
 0xd0e   :  { %5069 = vmatmul.mubr.msk.bf16.vlgmr.msra.gmra.mrb[40].mxu1 %vm1609_vm1, %v1720_v25 }
 0xd0f   :  { %5080 = vmatprep.mubr.msk.bf16.mxu1 %vm6219_vm2, %v6217_v2 }
 0xdd1   :  { %v1781_v22 = vpop.f32.mrb[36].mxu1 }
 0xdd2   :  { %v5058_v12 = vpop.f32.mrb[37].mxu1 }
 0xdd3   :  { %v1784_v32 = vpop.f32.mrb[38].mxu1 }
 0xdd4   :  { %v5059_v37 = vpop.f32.mrb[39].mxu1 }
 0xde1   :  { %v1849_v62 = vpop.f32.mrb[40].mxu1 }
 0xde2   :  { %v1850_v59 = vadd.f32 %v1849_v62, %v1781_v22  ;;  %v5070_v43 = vpop.f32.mrb[41].mxu1 }
 0xde3   :  { %v1852_v3 = vpop.f32.mrb[42].mxu1 }
 0xde4   :  { %v1862_v44 = vadd.f32 %v6898_v24, %v1850_v59  ;;  %v1853_v46 = vadd.f32 %v1852_v3, %v1784_v32  ;;  %v5071_v47 = vpop.f32.mrb[43].mxu1 }
 0xde6   :  { %5575 = vtanh.f32 %v1862_v44  ;;  %v1863_v29 = vadd.f32 %v6898_v24, %v1853_v46 }
 0xde8   :  { %5577 = vtanh.f32 %v1863_v29 }
 0xdf0   :  { %v5576_v56 = vpop.eup %5575 }
 0xdf1   :  { %v1866_v57 = vmul.f32 %v5576_v56, %v5572_v53 }
 0xdf2   :  { %v5578_v58 = vpop.eup %5577 }
 0xdf3   :  { %v1867_v6 = vmul.f32 %v5578_v58, %v5574_v54  ;;  %v6904_v11 = vadd.f32 %v1870_v61, %v1866_v57  ;;  %v5518_v61 = vld [vmem:[%s7474_s22] sm:$0xff]  }
 0xdf5   :  { %v6906_v16 = vadd.f32 %v1871_v20, %v1867_v6  ;;  %v5519_v6 = vld [vmem:[%s7474_s22 + $0x8] sm:$0xff]   ;;  %v5520_v20 = vld [vmem:[%s7475_s21] sm:$0xff]  }
 0xdf7   :  { %v6910_v19 = vpack.c.bf16 %v6906_v16, %v6904_v11 }
 0xdf9   :  { %v1876_v36 = vsel %vm509_vm6, %v6910_v19, 0  ;;  %v1957_v53 = vand.u32 %v6910_v19, %v6585_v35 }
 0xdfa   :  { %5073 = vmatpush3.bf16.xpose.msra.mxu0 %v1876_v36  ;;  %v5521_v36 = vld [vmem:[%s7475_s21 + $0x8] sm:$0xff]  }
 0xdfb   :  { %5079 = vmatpush3.bf16.msra.mxu1 %v1957_v53  ;;  %5084 = vmatprep.subr.bf16.mxu0 %v6217_v2 }
 0xdfc   :  { %5090 = vmatprep.subr.bf16.mxu1 %v6217_v2 }
 0xe01   :  { %5075 = vmatmul.mubr.msk.bf16.vlgmr.msra.gmra.mrb[40].mxu0 %vm509_vm6, %v6910_v19 }
 0xe02   :  { %5086 = vmatprep.mubr.msk.bf16.mxu0 %vm6219_vm2, %v6217_v2 }
 0xed4   :  { %v1912_v33 = vpop.f32.mrb[40].mxu0 }
 0xed5   :  { %v1919_v34 = vmul.f32 0.17677669, %v1912_v33  ;;  %v5076_v54 = vpop.f32.mrb[41].mxu0 }
 0xed6   :  { %v1915_v25 = vpop.f32.mrb[42].mxu0 }
 0xed7   :  { %v1920_v22 = vmul.f32 0.17677669, %v1915_v25  ;;  %v5077_v12 = vpop.f32.mrb[43].mxu0  ;;  %v1921_v32 = vsel %vm645_vm9, %v1919_v34, -1e+30 }
 0xed8   :  { %v1923_v37 = vsel %vm649_vm10, %v1921_v32, -inf }
 0xed9   :  { %1924 = vmax.xlane.f32.xlu0 %v1923_v37  ;;  %v1922_v62 = vsel %vm646_vm11, %v1920_v22, -1e+30 }
 0xeda   :  { %v1926_v59 = vsel %vm653_vm12, %v1922_v62, -inf }
 0xedb   :  { %1927 = vmax.xlane.f32.xlu1 %v1926_v59 }
 0xf66   :  { %v1925_v43 = vpop.xlane.xlu0 %1924 }
 0xf67   :  { %v1929_v3 = vmax.f32 %v1925_v43, 0.0 }
 0xf68   :  { %v1928_v44 = vpop.xlane.xlu1 %1927 }
 0xf69   :  { %v1931_v46 = vsub.f32 %v1921_v32, %v1929_v3  ;;  %v1930_v47 = vmax.f32 %v1928_v44, 0.0 }
 0xf6b   :  { %v1933_v29 = vmul.f32 1.442695, %v1931_v46  ;;  %v1932_v30 = vsub.f32 %v1922_v62, %v1930_v47  ;;  %v1944_v33 = vsub.f32 0.0, %v1930_v47 }
 0xf6d   :  { %5579 = vpow2.f32 %v1933_v29  ;;  %v1935_v39 = vmul.f32 1.442695, %v1932_v30  ;;  %v1947_v34 = vmul.f32 1.442695, %v1944_v33 }
 0xf6f   :  { %5581 = vpow2.f32 %v1935_v39 }
 0xf77   :  { %v5580_v52 = vpop.eup %5579 }
 0xf78   :  { %v1937_v56 = vsel %vm649_vm10, %v5580_v52, 0.0 }
 0xf79   :  { %v5582_v40 = vpop.eup %5581  ;;  %1938 = vadd.xlane.f32.xlu0 %v1937_v56 }
 0xf7a   :  { %v1953_v57 = vpack.c.bf16 %v5582_v40, %v5580_v52  ;;  %v1940_v58 = vsel %vm653_vm12, %v5582_v40, 0.0 }
 0xf7c   :  { %5081 = vmatmul.mubr.msk.bf16.vlgmr.msra.gmra.mrb[44].mxu1 %vm649_vm10, %v1953_v57 }
 0xf7d   :  { %5091 = vmatpush3.bf16.msra.mxu1 %v1957_v53  ;;  %1941 = vadd.xlane.f32.xlu0 %v1940_v58 }
 0xf7e   :  { %5092 = vmatprep.mubr.msk.bf16.mxu1 %vm6219_vm2, %v6217_v2  ;;  %5102 = vmatprep.subr.bf16.mxu1 %v6217_v2 }
 0xf84   :  { %5093 = vmatmul.mubr.msk.bf16.vlgmr.msra.gmra.mrb[48].mxu1 %vm649_vm10, %v6619_v0  ;;  %v1943_v0 = vsub.f32 0.0, %v1929_v3 }
 0xf85   :  { %5103 = vmatpush3.bf16.msra.mxu1 %v5518_v61  ;;  %5106 = vmatprep.mubr.msk.bf16.mxu1 %vm6219_vm2, %v6217_v2 }
 0xf86   :  { %5104 = vmatprep.subr.bf16.mxu1 %v6217_v2  ;;  %v1945_v53 = vmul.f32 1.442695, %v1943_v0 }
 0xf88   :  { %5583 = vpow2.f32 %v1945_v53 }
 0xf89   :  { %5105 = vmatpush3.bf16.msra.mxu1 %v5519_v6  ;;  %5585 = vpow2.f32 %v1947_v34 }
 0xf8a   :  { %5118 = vmatprep.subr.bf16.mxu1 %v6217_v2 }
 0xf8c   :  { %5107 = vmatmul.mubr.msk.bf16.vlgmr.msra.gmra.mrb[52].mxu1 %vm509_vm6, %v6910_v19 }
 0xf8d   :  { %5119 = vmatpush3.bf16.msra.mxu1 %v5520_v20  ;;  %5122 = vmatprep.mubr.msk.bf16.mxu1 %vm6219_vm2, %v6217_v2 }
 0xf8e   :  { %5120 = vmatprep.subr.bf16.mxu1 %v6217_v2 }
 0xf91   :  { %5121 = vmatpush3.bf16.msra.mxu1 %v5521_v36 }
 0xf92   :  { %v5584_v54 = vpop.eup %5583 }
 0xf93   :  { %v1949_v25 = vmul.f32 %v5584_v54, %v6639_v13  ;;  %v5586_v22 = vpop.eup %5585 }
 0xf94   :  { %5123 = vmatmul.mubr.msk.bf16.vlgmr.msra.gmra.mrb[56].mxu1 %vm509_vm6, %v6910_v19  ;;  %v1950_v37 = vmul.f32 %v5586_v22, %v6643_v17  ;;  %v5709_v22 = vld [vmem:[#allocation9] sm:$0x1] }
 0xf95   :  { %5128 = vmatprep.mubr.msk.bf16.mxu1 %vm649_vm10, %v6684_v14 }
0x1006   :  { %v1939_v12 = vpop.xlane.xlu0 %1938 }
0x1007   :  { %v1951_v32 = vadd.f32 %v1949_v25, %v1939_v12 }
0x1009   :  { %2002 = vperm.xlu1 %5443, %v1951_v32  }
0x100a   :  { %v1942_v62 = vpop.xlane.xlu0 %1941 }
0x100b   :  { %v1952_v59 = vadd.f32 %v1950_v37, %v1942_v62 }
0x100d   :  { %2007 = vperm.xlu0 %5442, %v1952_v59  }
0x104f   :  { %v1993_v43 = vpop.f32.mrb[44].mxu1 }
0x1050   :  { %v5082_v14 = vpop.f32.mrb[45].mxu1 }
0x1051   :  { %v1996_v3 = vpop.f32.mrb[46].mxu1 }
0x1052   :  { %v5083_v44 = vpop.f32.mrb[47].mxu1 }
0x1057   :  { %v2093_v46 = vpop.f32.mrb[48].mxu1 }
0x1058   :  { %v5094_v47 = vpop.f32.mrb[49].mxu1 }
0x1059   :  { %v2096_v29 = vpop.f32.mrb[50].mxu1  ;;  %v5522_v47 = vld [vmem:[%s7476_s26] sm:$0xff]  }
0x105a   :  { %v5095_v30 = vpop.f32.mrb[51].mxu1  ;;  %v5524_v29 = vld [vmem:[%s7477_s28] ss:$8 sps:$4 sm:$0xff]  }
0x105b   :  { %v5529_v30 = vld [vmem:[%s7477_s28 + $0x14] ss:$8 sps:$4 sm:$0xff]  }
0x105f   :  { %v6955_v39 = vpop.f32.mrb[52].mxu1 }
0x1060   :  { %v5108_v13 = vpop.f32.mrb[53].mxu1 }
0x1061   :  { %v6957_v52 = vpop.f32.mrb[54].mxu1  ;;  %v5527_v13 = vld [vmem:[%s7477_s28 + $0x10] ss:$8 sps:$4 sm:$0xff]  }
0x1062   :  { %v5109_v56 = vpop.f32.mrb[55].mxu1 }
0x1067   :  { %v2340_v40 = vpop.f32.mrb[56].mxu1 }
0x1068   :  { %v5124_v57 = vpop.f32.mrb[57].mxu1 }
0x1069   :  { %v2343_v17 = vpop.f32.mrb[58].mxu1 }
0x106a   :  { %v2426_v58 = vpack.c.bf16 %v2343_v17, %v2340_v40  ;;  %v5125_v61 = vpop.f32.mrb[59].mxu1 }
0x106c   :  { %v2428_v6 = vand.u32 %v2426_v58, %v6585_v35 }
0x106e   :  { %5126 = vmatprep.subr.bf16.mxu1 %v2428_v6 }
0x106f   :  { %5127 = vmatpush3.bf16.msra.mxu1 %v2428_v6 }
0x1070   :  { %5132 = vmatprep.subr.bf16.mxu1 %v6217_v2 }
0x1072   :  { %5129 = vmatmul.mubr.msk.bf16.vlgmr.msra.gmra.mrb[60].mxu1 %vm649_vm10, %v6689_v15  ;;  %v2099_v15 = vmul.f32 %v2093_v46, %v6659_v55  ;;  %v5523_v55 = vld [vmem:[%s7476_s26 + $0x8] sm:$0xff]  }
0x1073   :  { %5136 = vmatprep.mubr.msk.bf16.mxu1 %vm6219_vm2, %v6217_v2  ;;  %v5526_v46 = vld [vmem:[%s7477_s28 + $0x4] ss:$8 sps:$4 sm:$0xff]  }
0x1074   :  { %v2100_v32 = vmul.f32 0.027777778, %v2099_v15 }
0x1088   :  { %v2003_v20 = vpop.permute.xlu1 %2002 }
0x1089   :  { %5587 = vrcp.f32 %v2003_v20 }
0x108c   :  { %v2008_v36 = vpop.permute.xlu0 %2007 }
0x108d   :  { %5589 = vrcp.f32 %v2008_v36 }
0x1093   :  { %v5588_v0 = vpop.eup %5587 }
0x1094   :  { %v2011_v33 = vmul.f32 %v5588_v0, %v1993_v43 }
0x1097   :  { %v5590_v53 = vpop.eup %5589 }
0x1098   :  { %v2013_v34 = vmul.f32 %v5590_v53, %v1996_v3 }
0x109a   :  { %v2014_v54 = vpack.c.bf16 %v2013_v34, %v2011_v33  ;;  %v2351_v33 = vld [vmem:[#allocation18] sm:$0x3] }
0x109b   :  { %v2356_v34 = vrot.slane %v2351_v33, %v1105_v26 }
0x109c   :  { %v2016_v25 = vand.u32 %v2014_v54, %v6585_v35  ;;  %v2360_v54 = vrot.slane %v2351_v33, %v1109_v28 }
0x109e   :  { %5085 = vmatpush3.bf16.msra.mxu0 %v2016_v25 }
0x109f   :  { %5096 = vmatprep.subr.bf16.mxu0 %v6217_v2 }
0x10a1   :  { %5087 = vmatmul.mubr.msk.bf16.vlgmr.msra.gmra.mrb[44].mxu0 %vm649_vm10, %v5709_v22 }
0x10a2   :  { %5098 = vmatprep.mubr.msk.bf16.mxu0 %vm6219_vm2, %v6217_v2 }
0x1174   :  { %v2052_v12 = vpop.f32.mrb[44].mxu0 }
0x1175   :  { %v2058_v37 = vmul.f32 0.16666667, %v2052_v12  ;;  %v5088_v62 = vpop.f32.mrb[45].mxu0 }
0x1176   :  { %v2055_v59 = vpop.f32.mrb[46].mxu0 }
0x1177   :  { %v2101_v43 = vadd.f32 %v2100_v32, %v2058_v37  ;;  %v5089_v14 = vpop.f32.mrb[47].mxu0 }
0x1179   :  { %v2102_v3 = vpack.c.bf16 %v2101_v43, %v2101_v43 }
0x117b   :  { %v2104_v44 = vsel %vm852_vm13, %v2102_v3, 0 }
0x117c   :  { %5097 = vmatpush3.bf16.msra.mxu0 %v2104_v44 }
0x117d   :  { %5110 = vmatprep.subr.bf16.mxu0 %v6217_v2 }
0x117f   :  { %5099 = vmatmul.mubr.msk.bf16.vlgmr.msra.gmra.mrb[48].mxu0 %vm848_vm14, %v6663_v5  ;;  %v5130_v5 = vpop.f32.mrb[60].mxu1 }
0x1180   :  { %5111 = vmatpush3.bf16.msra.mxu0 %v5522_v47  ;;  %5114 = vmatprep.mubr.msk.bf16.mxu0 %vm6219_vm2, %v6217_v2  ;;  %v2464_v56 = vpop.f32.mrb[61].mxu1 }
0x1181   :  { %5112 = vmatprep.subr.bf16.mxu0 %v6217_v2  ;;  %v5131_v40 = vpop.f32.mrb[62].mxu1 }
0x1182   :  { %v2467_v21 = vpop.f32.mrb[63].mxu1 }
0x1184   :  { %5113 = vmatpush3.bf16.msra.mxu0 %v5523_v55 }
0x1185   :  { %2383 = vmatprep.subr.bf16.mxu0 %v5526_v46 }
0x1187   :  { %5115 = vmatmul.mubr.msk.bf16.vlgmr.msra.gmra.mrb[52].mxu0 %vm509_vm6, %v6910_v19 }
0x1188   :  { %2384 = vmatpush1.bf16.msra.mxu0 %v5524_v29  ;;  %2415 = vmatprep.mubr.bf16.mxu0 %v6216_v1 }
0x1189   :  { %2385 = vmatprep.subr.bf16.mxu0 %v5529_v30 }
0x118c   :  { %2386 = vmatpush1.bf16.msra.mxu0 %v5527_v13 }
0x118f   :  { %4691 = vmatmul.mubr.msk.bf16.vlgmr.msra.gmra.mrb[56].mxu0 %vm509_vm6, %v6910_v19 }
0x1190   :  { %2518 = vmatprep.mubr.bf16.mxu0 %v6216_v1 }
0x1252   :  { %v2140_v57 = vpop.f32.mrb[48].mxu0 }
0x1253   :  { %v5100_v17 = vpop.f32.mrb[49].mxu0 }
0x1254   :  { %v2143_v58 = vpop.f32.mrb[50].mxu0 }
0x1255   :  { %v6990_v61 = vpack.i.bf16 %v2143_v58, %v2140_v57  ;;  %v5101_v6 = vpop.f32.mrb[51].mxu0 }
0x125a   :  { %v2261_v20 = vpop.f32.mrb[52].mxu0 }
0x125b   :  { %v5116_v36 = vpop.f32.mrb[53].mxu0 }
0x125c   :  { %v2264_v0 = vpop.f32.mrb[54].mxu0 }
0x125d   :  { %v5117_v53 = vpop.f32.mrb[55].mxu0 }
0x1262   :  { %v2417_v19 = vpop.f32.mrb[56].mxu0 }
0x1263   :  { %v2419_v25 = vpop.f32.mrb[57].mxu0  ;;  %v2418_v15 = vadd.f32 %v2417_v19, %v2356_v34 }
0x1264   :  { %v2421_v22 = vpop.f32.mrb[58].mxu0  ;;  %v2420_v37 = vadd.f32 %v2419_v25, %v2360_v54 }
0x1265   :  { %v2422_v12 = vadd.f32 %v2421_v22, %v2356_v34  ;;  %v2423_v32 = vpop.f32.mrb[59].mxu0 }
0x1266   :  { %v2424_v62 = vadd.f32 %v2423_v32, %v2360_v54 }
0x1267   :  { %v2478_v59 = vpack.c.bf16 %v2422_v12, %v2418_v15 }
0x1268   :  { %v2479_v43 = vpack.c.bf16 %v2424_v62, %v2420_v37 }
0x1269   :  { %v2481_v3 = vand.u32 %v2478_v59, %v6585_v35 }
0x126a   :  { %v2484_v14 = vand.u32 %v2479_v43, %v6585_v35  ;;  %v5464_v43 = vpack.i.bf16 %v6906_v16, %v6904_v11 }
0x126c   :  { %2486 = vmatprep.subr.bf16.mxu0 %v2484_v14 }
0x126d   :  { %2487 = vmatpush1.bf16.msra.mxu0 %v2481_v3 }
0x126e   :  { %5148 = vmatprep.subr.bf16.mxu0 %v6217_v2 }
0x1270   :  { %4694 = vmatmul.mubr.msk.bf16.vlgmr.msra.gmra.mrb[60].mxu0 %vm649_vm10, %v6713_v50 }
0x1271   :  { %2528 = vmatprep.mubr.bf16.mxu0 %v6216_v1 }
0x1278   :  { %4695 = vmatmul.mubr.msk.bf16.gmra.mrb[64].mxu0 %vm649_vm10, %v6720_v51 }
0x1279   :  { %5152 = vmatprep.mubr.msk.bf16.mxu0 %vm6219_vm2, %v6217_v2 }
0x1343   :  { %v2520_v26 = vpop.f32.mrb[60].mxu0 }
0x1344   :  { %v2522_v28 = vpop.f32.mrb[61].mxu0 }
0x1345   :  { %v2537_v44 = vmul.f32 %v2522_v28, %v2464_v56  ;;  %v2524_v47 = vpop.f32.mrb[62].mxu0 }
0x1346   :  { %v2526_v55 = vpop.f32.mrb[63].mxu0 }
0x1347   :  { %v2540_v46 = vadd.f32 %v2537_v44, %v2520_v26  ;;  %v2538_v29 = vmul.f32 %v2526_v55, %v2467_v21 }
0x1349   :  { %v2541_v30 = vadd.f32 %v2538_v29, %v2524_v47  ;;  %v2543_v13 = vmax.f32 %v2540_v46, 0.0 }
0x134b   :  { %v2544_v40 = vmax.f32 %v2541_v30, 0.0  ;;  %v2530_v50 = vpop.f32.mrb[64].mxu0 }
0x134c   :  { %v2532_v57 = vpop.f32.mrb[65].mxu0 }
0x134d   :  { %v2546_v17 = vpack.c.bf16 %v2544_v40, %v2543_v13  ;;  %v2539_v58 = vmul.f32 %v5130_v5, %v2532_v57  ;;  %v2534_v6 = vpop.f32.mrb[66].mxu0  ;;  %v4677_v5 = vld [vmem:[#allocation17] ss:$0 sm:$0xff] }
0x134e   :  { %v2535_v51 = vpop.f32.mrb[67].mxu0  ;;  %v7018_v34 = vadd.f32 %v4677_v5, %v6955_v39 }
0x134f   :  { %v2542_v36 = vadd.f32 %v2539_v58, %v2530_v50  ;;  %2663 = vrot.lane.b32.xlu0 %v2546_v17, %s6198_s1  ;;  %2604 = vrot.lane.b32.xlu1 %v2546_v17, %s6220_s30 }
0x1350   :  { %5133 = vmatpush3.bf16.msra.mxu1 %v2546_v17 }
0x1351   :  { %v2545_v56 = vmax.f32 %v2542_v36, 0.0  ;;  %5134 = vmatprep.subr.bf16.mxu1 %v6217_v2 }
0x1353   :  { %v2547_v53 = vpack.c.bf16 %v2545_v56, %v2545_v56 }
0x1355   :  { %2665 = vrot.lane.b32.xlu0 %v2547_v53, %s6198_s1  ;;  %2606 = vrot.lane.b32.xlu1 %v2547_v53, %s6220_s30  ;;  %v2549_v33 = vsel %vm437_vm0, %v2547_v53, 0 }
0x1356   :  { %5135 = vmatpush3.bf16.msra.mxu1 %v2549_v33 }
0x1357   :  { %5140 = vmatprep.subr.bf16.mxu1 %v6217_v2 }
0x1359   :  { %2270 = vrot.lane.b32.xlu0 %v2261_v20, %s6223_s18  ;;  %2722 = vrot.lane.b32.xlu1 %v2546_v17, %s6223_s18  ;;  %v7027_v20 = vadd.f32 %v4677_v5, %v6957_v52 }
0x135a   :  { %5137 = vmatmul.mubr.msk.bf16.vlgmr.msra.gmra.mrb[64].mxu1 %vm1331_vm15, %v6729_v23 }
0x135b   :  { %5144 = vmatprep.mubr.msk.bf16.mxu1 %vm6219_vm2, %v6217_v2 }
0x135d   :  { %2280 = vrot.lane.b32.xlu0 %v7018_v34, %s6223_s18  ;;  %2724 = vrot.lane.b32.xlu1 %v2547_v53, %s6223_s18 }
0x1361   :  { %2272 = vrot.lane.b32.xlu1 %v2264_v0, %s6223_s18 }
0x1365   :  { %2282 = vrot.lane.b32.xlu1 %v7027_v20, %s6223_s18 }
0x13c1   :  { %v2664_v23 = vpop.permute.xlu0 %2663  ;;  %v2605_v19 = vpop.permute.xlu1 %2604 }
0x13c2   :  { %5141 = vmatpush3.bf16.msra.mxu1 %v2605_v19  ;;  %5149 = vmatpush3.bf16.msra.mxu0 %v2664_v23 }
0x13c3   :  { %5142 = vmatprep.subr.bf16.mxu1 %v6217_v2  ;;  %5150 = vmatprep.subr.bf16.mxu0 %v6217_v2 }
0x13c7   :  { %v2666_v39 = vpop.permute.xlu0 %2665  ;;  %v2607_v54 = vpop.permute.xlu1 %2606 }
0x13c8   :  { %v2669_v25 = vsel %vm437_vm0, %v2666_v39, 0  ;;  %v2610_v0 = vsel %vm437_vm0, %v2607_v54, 0 }
0x13c9   :  { %5143 = vmatpush3.bf16.msra.mxu1 %v2610_v0  ;;  %5151 = vmatpush3.bf16.msra.mxu0 %v2669_v25 }
0x13ca   :  { %5156 = vmatprep.subr.bf16.mxu1 %v6217_v2  ;;  %5164 = vmatprep.subr.bf16.mxu0 %v6217_v2 }
0x13cb   :  { %v2723_v52 = vpop.permute.xlu1 %2722  ;;  %v2271_v14 = vpop.permute.xlu0 %2270 }
0x13cc   :  { %5145 = vmatmul.mubr.msk.bf16.vlgmr.msra.gmra.mrb[68].mxu1 %vm1331_vm15, %v6761_v38  ;;  %5153 = vmatmul.mubr.msk.bf16.vlgmr.msra.gmra.mrb[68].mxu0 %vm1331_vm15, %v6771_v42  ;;  %v2276_v44 = vmul.f32 %v2271_v14, %v7018_v34 }
0x13cd   :  { %5157 = vmatpush3.bf16.msra.mxu1 %v2723_v52  ;;  %5160 = vmatprep.mubr.msk.bf16.mxu1 %vm6219_vm2, %v6217_v2 }
0x13ce   :  { %5158 = vmatprep.subr.bf16.mxu1 %v6217_v2  ;;  %5165 = vmatpush3.bf16.msra.mxu0 %v6791_v60 }
0x13cf   :  { %v2725_v22 = vpop.permute.xlu1 %2724  ;;  %5166 = vmatprep.subr.bf16.mxu0 %v6217_v2  ;;  %5176 = vmatprep.mubr.msk.bf16.mxu0 %vm6219_vm2, %v6217_v2  ;;  %v2281_v21 = vpop.permute.xlu0 %2280 }
0x13d0   :  { %v2728_v15 = vsel %vm437_vm0, %v2725_v22, 0  ;;  %v2286_v46 = vadd.f32 %v2281_v21, %v2276_v44 }
0x13d1   :  { %5159 = vmatpush3.bf16.msra.mxu1 %v2728_v15 }
0x13d2   :  { %5167 = vmatpush3.bf16.msra.mxu0 %v6796_v63  ;;  %5180 = vmatprep.subr.bf16.mxu1 %v6217_v2  ;;  %v2288_v40 = vmax.f32 %v2286_v46, 0.0 }
0x13d3   :  { %5168 = vmatprep.subr.bf16.mxu0 %v6217_v2  ;;  %v2273_v3 = vpop.permute.xlu1 %2272 }
0x13d4   :  { %5161 = vmatmul.mubr.msk.bf16.vlgmr.msra.gmra.mrb[72].mxu1 %vm1331_vm15, %v6779_v45  ;;  %v2277_v47 = vmul.f32 %v2273_v3, %v7027_v20 }
0x13d5   :  { %5181 = vmatpush3.bf16.msra.mxu1 %v6847_v27  ;;  %5184 = vmatprep.mubr.msk.bf16.mxu1 %vm6219_vm2, %v6217_v2 }
0x13d6   :  { %5169 = vmatpush3.bf16.msra.mxu0 %v6803_v7  ;;  %5182 = vmatprep.subr.bf16.mxu1 %v6217_v2 }
0x13d7   :  { %5170 = vmatprep.subr.bf16.mxu0 %v6217_v2  ;;  %v2283_v26 = vpop.permute.xlu1 %2282 }
0x13d8   :  { %v2287_v29 = vadd.f32 %v2283_v26, %v2277_v47 }
0x13d9   :  { %5183 = vmatpush3.bf16.msra.mxu1 %v6856_v49 }
0x13da   :  { %5171 = vmatpush3.bf16.msra.mxu0 %v6811_v9  ;;  %5188 = vmatprep.subr.bf16.mxu1 %v6217_v2  ;;  %v2289_v50 = vmax.f32 %v2287_v29, 0.0 }
0x13db   :  { %5172 = vmatprep.subr.bf16.mxu0 %v6217_v2 }
0x13de   :  { %5173 = vmatpush3.bf16.msra.mxu0 %v6819_v41 }
0x13df   :  { %5174 = vmatprep.subr.bf16.mxu0 %v6217_v2 }
0x13e2   :  { %5175 = vmatpush3.bf16.msra.mxu0 %v6824_v48 }
0x13e3   :  { %5200 = vmatprep.subr.bf16.mxu0 %v6217_v2 }
0x142d   :  { %v2585_v38 = vpop.f32.mrb[64].mxu1 }
0x142e   :  { %2594 = vrot.lane.b32.xlu0 %v2585_v38, %s6223_s18  ;;  %v5138_v42 = vpop.f32.mrb[65].mxu1 }
0x142f   :  { %v2588_v45 = vpop.f32.mrb[66].mxu1 }
0x1430   :  { %2596 = vrot.lane.b32.xlu1 %v2588_v45, %s6223_s18  ;;  %v5139_v60 = vpop.f32.mrb[67].mxu1 }
0x149f   :  { %v2646_v63 = vpop.f32.mrb[68].mxu1  ;;  %v2705_v7 = vpop.f32.mrb[68].mxu0 }
0x14a0   :  { %2655 = vrot.lane.b32.xlu0 %v2646_v63, %s6223_s18  ;;  %v5146_v9 = vpop.f32.mrb[69].mxu1  ;;  %v5154_v41 = vpop.f32.mrb[69].mxu0 }
0x14a1   :  { %v2649_v27 = vpop.f32.mrb[70].mxu1  ;;  %v2708_v49 = vpop.f32.mrb[70].mxu0 }
0x14a2   :  { %2657 = vrot.lane.b32.xlu1 %v2649_v27, %s6223_s18  ;;  %v5147_v48 = vpop.f32.mrb[71].mxu1  ;;  %v5155_v12 = vpop.f32.mrb[71].mxu0 }
0x14a3   :  { %v2595_v28 = vpop.permute.xlu0 %2594  ;;  %v2597_v55 = vpop.permute.xlu1 %2596 }
0x14a4   :  { %2714 = vrot.lane.b32.xlu0 %v2705_v7, %s6223_s18  ;;  %v2600_v17 = vadd.f32 %v2595_v28, %v2288_v40  ;;  %v2601_v58 = vadd.f32 %v2597_v55, %v2289_v50 }
0x14a6   :  { %2716 = vrot.lane.b32.xlu1 %v2708_v49, %s6223_s18 }
0x14a7   :  { %v2764_v32 = vpop.f32.mrb[72].mxu1 }
0x14a8   :  { %v5162_v37 = vpop.f32.mrb[73].mxu1  ;;  %2773 = vrot.lane.b32.xlu0 %v2764_v32, %s6223_s18 }
0x14a9   :  { %v2767_v62 = vpop.f32.mrb[74].mxu1 }
0x14aa   :  { %v5163_v59 = vpop.f32.mrb[75].mxu1  ;;  %2775 = vrot.lane.b32.xlu1 %v2767_v62, %s6223_s18 }
0x14ae   :  { %5465 = vrot.lane.b32.xlu1 %v5464_v43, %s6223_s18 }
0x1512   :  { %v2656_v30 = vpop.permute.xlu0 %2655 }
0x1513   :  { %v2661_v51 = vadd.f32 %v2656_v30, %v2600_v17 }
0x1514   :  { %v2658_v13 = vpop.permute.xlu1 %2657 }
0x1515   :  { %v2662_v36 = vadd.f32 %v2658_v13, %v2601_v58 }
0x1516   :  { %v2715_v57 = vpop.permute.xlu0 %2714 }
0x1517   :  { %v2720_v53 = vadd.f32 %v2715_v57, %v2661_v51 }
0x1518   :  { %v2717_v6 = vpop.permute.xlu1 %2716 }
0x1519   :  { %v2721_v33 = vadd.f32 %v2717_v6, %v2662_v36 }
0x151a   :  { %v2774_v56 = vpop.permute.xlu0 %2773 }
0x151b   :  { %v2779_v34 = vadd.f32 %v2774_v56, %v2720_v53 }
0x151c   :  { %v2776_v5 = vpop.permute.xlu1 %2775 }
0x151d   :  { %v2780_v23 = vadd.f32 %v2776_v5, %v2721_v33 }
0x151f   :  { %v5469_v20 = vpack.i.bf16 %v2780_v23, %v2779_v34 }
0x1520   :  { %v5466_v39 = vpop.permute.xlu1 %5465 }
0x1521   :  { %5470 = vrot.lane.b32.xlu0 %v5469_v20, %s6220_s30  ;;  %v5468_v0 = vunpack.i.h.bf16 %v5466_v39  ;;  %v5467_v52 = vunpack.i.l.bf16 %v5466_v39 }
0x1525   :  { %5475 = vrot.lane.b32.xlu0 %v6990_v61, %s6198_s1 }
0x1593   :  { %v5471_v19 = vpop.permute.xlu0 %5470 }
0x1594   :  { %v5473_v54 = vunpack.i.h.bf16 %v5471_v19  ;;  %v5472_v25 = vunpack.i.l.bf16 %v5471_v19 }
0x1596   :  { %v2805_v42 = vsel %vm509_vm6, %v5472_v25, %v5467_v52  ;;  %v2806_v45 = vsel %vm509_vm6, %v5473_v54, %v5468_v0 }
0x1597   :  { %v5476_v22 = vpop.permute.xlu0 %5475 }
0x1598   :  { %v5478_v15 = vunpack.i.h.bf16 %v5476_v22  ;;  %v5477_v38 = vunpack.i.l.bf16 %v5476_v22  ;;  %v7124_v22 = vld [vmem:[%s7480_s0] sm:$0xff]  }
0x159a   :  { %v2807_v60 = vsel %vm1609_vm1, %v2805_v42, %v5477_v38  ;;  %v2808_v63 = vsel %vm1609_vm1, %v2806_v45, %v5478_v15 }
0x159b   :  { %v2809_v7 = vpack.c.bf16 %v2808_v63, %v2807_v60 }
0x159d   :  { %5177 = vmatmul.mubr.msk.bf16.vlgmr.msra.gmra.mrb[72].mxu0 %vm1655_vm3, %v2809_v7 }
0x159e   :  { %5202 = vmatprep.mubr.msk.bf16.mxu0 %vm6219_vm2, %v6217_v2 }
0x1670   :  { %v2847_v9 = vpop.f32.mrb[72].mxu0 }
0x1671   :  { %v2848_v41 = vadd.f32 %v6851_v31, %v2847_v9  ;;  %v5178_v27 = vpop.f32.mrb[73].mxu0 }
0x1672   :  { %v2850_v49 = vpop.f32.mrb[74].mxu0 }
0x1673   :  { %v4701_v48 = vmul.f32 -1.442695, %v2848_v41  ;;  %v2851_v12 = vadd.f32 %v6851_v31, %v2850_v49  ;;  %v5179_v32 = vpop.f32.mrb[75].mxu0  ;;  %v4707_v41 = vld [vmem:[#allocation23] ss:$0 sm:$0xff] }
0x1675   :  { %5591 = vpow2.f32 %v4701_v48  ;;  %v4702_v37 = vmul.f32 -1.442695, %v2851_v12 }
0x1677   :  { %5593 = vpow2.f32 %v4702_v37 }
0x167f   :  { %v5592_v62 = vpop.eup %5591 }
0x1680   :  { %v2860_v59 = vadd.f32 1.0, %v5592_v62 }
0x1681   :  { %v5594_v43 = vpop.eup %5593 }
0x1682   :  { %5595 = vrcp.f32 %v2860_v59  ;;  %v2861_v14 = vadd.f32 1.0, %v5594_v43 }
0x1684   :  { %5597 = vrcp.f32 %v2861_v14 }
0x168c   :  { %v5596_v3 = vpop.eup %5595 }
0x168d   :  { %2877 = vrot.lane.b32.xlu1 %v5596_v3, %s6220_s30  ;;  %v2980_v53 = vsub.f32 1.0, %v5596_v3 }
0x168e   :  { %v5598_v21 = vpop.eup %5597 }
0x168f   :  { %2879 = vrot.lane.b32.xlu0 %v5598_v21, %s6220_s30  ;;  %v2981_v33 = vsub.f32 1.0, %v5598_v21  ;;  %v2982_v19 = vmul.f32 %v2980_v53, %v6904_v11 }
0x1691   :  { %5480 = vrot.lane.b32.xlu1 %v6990_v61, %s6223_s18  ;;  %v2983_v39 = vmul.f32 %v2981_v33, %v6906_v16 }
0x16ff   :  { %v2878_v31 = vpop.permute.xlu1 %2877 }
0x1700   :  { %v2883_v28 = vmul.f32 %v2878_v31, %v6904_v11  ;;  %v7133_v11 = vld [vmem:[%s7480_s0 + $0x8] sm:$0xff]  }
0x1701   :  { %v2880_v26 = vpop.permute.xlu0 %2879 }
0x1702   :  { %v2884_v44 = vmul.f32 %v2880_v26, %v6906_v16  ;;  %v5534_v16 = vld [vmem:[%s7478_s6 + $0x8] sm:$0xff]  }
0x1703   :  { %v5481_v55 = vpop.permute.xlu1 %5480 }
0x1704   :  { %v2885_v47 = vpack.c.bf16 %v2884_v44, %v2883_v28  ;;  %v5483_v61 = vunpack.i.h.bf16 %v5481_v55  ;;  %v5482_v46 = vunpack.i.l.bf16 %v5481_v55 }
0x1706   :  { %5185 = vmatmul.mubr.msk.bf16.vlgmr.msra.gmra.mrb[76].mxu1 %vm509_vm6, %v2885_v47  ;;  %v2873_v29 = vsel %vm509_vm6, %v5473_v54, %v5483_v61 }
0x1707   :  { %5189 = vmatpush3.bf16.msra.mxu1 %v6867_v4  ;;  %5196 = vmatprep.mubr.msk.bf16.mxu1 %vm6219_vm2, %v6217_v2  ;;  %v2872_v4 = vsel %vm509_vm6, %v5472_v25, %v5482_v46 }
0x1708   :  { %5190 = vmatprep.subr.bf16.mxu1 %v6217_v2  ;;  %v2874_v30 = vpack.c.bf16 %v2873_v29, %v2872_v4 }
0x170b   :  { %5191 = vmatpush3.bf16.msra.mxu1 %v6872_v8  ;;  %v5532_v8 = vld [vmem:[%s7478_s6] sm:$0xff]  }
0x170c   :  { %5192 = vmatprep.subr.bf16.mxu1 %v6217_v2 }
0x170f   :  { %5193 = vmatpush3.bf16.msra.mxu1 %v6879_v10 }
0x1710   :  { %5194 = vmatprep.subr.bf16.mxu1 %v6217_v2 }
0x1713   :  { %5195 = vmatpush3.bf16.msra.mxu1 %v6884_v18 }
0x1714   :  { %5206 = vmatprep.subr.bf16.mxu1 %v6217_v2 }
0x1716   :  { %5197 = vmatmul.mubr.msk.bf16.vlgmr.msra.gmra.mrb[80].mxu1 %vm1609_vm1, %v2874_v30 }
0x1717   :  { %5210 = vmatprep.mubr.msk.bf16.mxu1 %vm6219_vm2, %v6217_v2  ;;  %5207 = vmatpush3.bf16.msra.mxu1 %v5532_v8 }
0x1718   :  { %5208 = vmatprep.subr.bf16.mxu1 %v6217_v2 }
0x171b   :  { %5209 = vmatpush3.bf16.msra.mxu1 %v5534_v16 }
0x171c   :  { %5222 = vmatprep.subr.bf16.mxu1 %v6217_v2 }
0x17d9   :  { %v2923_v10 = vpop.f32.mrb[76].mxu1 }
0x17da   :  { %v5186_v13 = vpop.f32.mrb[77].mxu1 }
0x17db   :  { %v2926_v40 = vpop.f32.mrb[78].mxu1 }
0x17dc   :  { %v5187_v50 = vpop.f32.mrb[79].mxu1 }
0x17e9   :  { %v2967_v57 = vpop.f32.mrb[80].mxu1 }
0x17ea   :  { %v2968_v17 = vadd.f32 %v2967_v57, %v2923_v10  ;;  %v5198_v58 = vpop.f32.mrb[81].mxu1 }
0x17eb   :  { %v2970_v18 = vpop.f32.mrb[82].mxu1 }
0x17ec   :  { %v2974_v6 = vadd.f32 %v6898_v24, %v2968_v17  ;;  %v2971_v51 = vadd.f32 %v2970_v18, %v2926_v40  ;;  %v5199_v36 = vpop.f32.mrb[83].mxu1 }
0x17ee   :  { %5599 = vtanh.f32 %v2974_v6  ;;  %v2975_v56 = vadd.f32 %v6898_v24, %v2971_v51  ;;  %v5530_v24 = vld [vmem:[%s7479_s29] sm:$0x3f]  }
0x17f0   :  { %5601 = vtanh.f32 %v2975_v56 }
0x17f8   :  { %v5600_v5 = vpop.eup %5599 }
0x17f9   :  { %v2978_v34 = vmul.f32 %v5600_v5, %v5596_v3 }
0x17fa   :  { %v5602_v23 = vpop.eup %5601 }
0x17fb   :  { %v2979_v20 = vmul.f32 %v5602_v23, %v5598_v21  ;;  %v2984_v54 = vadd.f32 %v2982_v19, %v2978_v34 }
0x17fd   :  { %v2985_v25 = vadd.f32 %v2983_v39, %v2979_v20 }
0x17ff   :  { %v2988_v0 = vpack.c.bf16 %v2985_v25, %v2984_v54 }
0x1801   :  { %v2998_v52 = vand.u32 %v2988_v0, %v6585_v35 }
0x1803   :  { %5201 = vmatpush3.bf16.msra.mxu0 %v2998_v52 }
0x1804   :  { %5214 = vmatprep.subr.bf16.mxu0 %v6217_v2 }
0x1806   :  { %5203 = vmatmul.mubr.msk.bf16.vlgmr.msra.gmra.mrb[76].mxu0 %vm649_vm10, %v5530_v24 }
0x1807   :  { %5215 = vmatpush3.bf16.msra.mxu0 %v7124_v22  ;;  %5218 = vmatprep.mubr.msk.bf16.mxu0 %vm6219_vm2, %v6217_v2 }
0x1808   :  { %5216 = vmatprep.subr.bf16.mxu0 %v6217_v2 }
0x180b   :  { %5217 = vmatpush3.bf16.msra.mxu0 %v7133_v11 }
0x180c   :  { %5230 = vmatprep.subr.bf16.mxu0 %v6217_v2 }
0x180e   :  { %5219 = vmatmul.mubr.bf16.vlgmr.msra.gmra.mrb[80].mxu0 %v6216_v1 }
0x180f   :  { %5231 = vmatpush3.bf16.msra.mxu0 %v7124_v22  ;;  %5234 = vmatprep.mubr.msk.bf16.mxu0 %vm6219_vm2, %v6217_v2 }
0x1810   :  { %5232 = vmatprep.subr.bf16.mxu0 %v6217_v2 }
0x1813   :  { %5233 = vmatpush3.bf16.msra.mxu0 %v7133_v11 }
0x1814   :  { %5246 = vmatprep.subr.bf16.mxu0 %v6217_v2 }
0x18d9   :  { %v3034_v35 = vpop.f32.mrb[76].mxu0 }
0x18da   :  { %v5204_v15 = vpop.f32.mrb[77].mxu0 }
0x18db   :  { %v3037_v38 = vpop.f32.mrb[78].mxu0 }
0x18dc   :  { %v7146_v42 = vpack.c.bf16 %v3037_v38, %v3034_v35  ;;  %v5205_v45 = vpop.f32.mrb[79].mxu0 }
0x18de   :  { %5211 = vmatmul.mubr.msk.bf16.vlgmr.msra.gmra.mrb[84].mxu1 %vm509_vm6, %v7146_v42 }
0x18df   :  { %5223 = vmatpush3.bf16.msra.mxu1 %v7124_v22  ;;  %5226 = vmatprep.mubr.msk.bf16.mxu1 %vm6219_vm2, %v6217_v2 }
0x18e0   :  { %5224 = vmatprep.subr.bf16.mxu1 %v6217_v2 }
0x18e1   :  { %v3162_v60 = vpop.f32.mrb[80].mxu0 }
0x18e2   :  { %v5220_v63 = vpop.f32.mrb[81].mxu0 }
0x18e3   :  { %5225 = vmatpush3.bf16.msra.mxu1 %v7133_v11  ;;  %v3165_v7 = vpop.f32.mrb[82].mxu0 }
0x18e4   :  { %5238 = vmatprep.subr.bf16.mxu1 %v6217_v2  ;;  %v5221_v9 = vpop.f32.mrb[83].mxu0 }
0x19b1   :  { %v3102_v27 = vpop.f32.mrb[84].mxu1 }
0x19b2   :  { %v7156_v49 = vadd.f32 %v4707_v41, %v3102_v27  ;;  %v5212_v48 = vpop.f32.mrb[85].mxu1 }
0x19b3   :  { %v3105_v12 = vpop.f32.mrb[86].mxu1 }
0x19b4   :  { %v3168_v32 = vadd.f32 %v3162_v60, %v7156_v49  ;;  %v7159_v37 = vadd.f32 %v4707_v41, %v3105_v12  ;;  %v5213_v62 = vpop.f32.mrb[87].mxu1 }
0x19b6   :  { %5603 = vtanh.f32 %v3168_v32  ;;  %v4713_v43 = vmul.f32 -1.442695, %v3168_v32 }
0x19b8   :  { %5605 = vpow2.f32 %v4713_v43 }
0x19c0   :  { %v5604_v59 = vpop.eup %5603 }
0x19c1   :  { %3178 = vrot.lane.b32.xlu0 %v5604_v59, %s6198_s1 }
0x19c2   :  { %v5606_v14 = vpop.eup %5605 }
0x19c3   :  { %v3172_v3 = vadd.f32 1.0, %v5606_v14 }
0x19c5   :  { %5607 = vrcp.f32 %v3172_v3 }
0x19cf   :  { %v5608_v21 = vpop.eup %5607 }
0x19d0   :  { %v3176_v28 = vmul.f32 0.0, %v5608_v21 }
0x1a33   :  { %v3179_v31 = vpop.permute.xlu0 %3178 }
0x1a34   :  { %v3181_v26 = vmul.f32 %v5608_v21, %v3179_v31 }
0x1a36   :  { %3183 = vrot.lane.b32.xlu1 %v3181_v26, %s6223_s18 }
0x1aa8   :  { %v3184_v44 = vpop.permute.xlu1 %3183 }
0x1aa9   :  { %v3186_v47 = vadd.f32 %v3184_v44, %v3176_v28 }
0x1aab   :  { %5609 = vtanh.f32 %v3186_v47  ;;  %v3252_v56 = vrot.slane %v3186_v47, 6 }
0x1ab5   :  { %v5610_v55 = vpop.eup %5609 }
0x1ab6   :  { %3189 = vrot.lane.b32.xlu0 %v5610_v55, %s6198_s1 }
0x1b28   :  { %v3190_v61 = vpop.permute.xlu0 %3189 }
0x1b29   :  { %v7164_v46 = vmul.f32 %v5608_v21, %v3190_v61 }
0x1b2b   :  { %v3193_v29 = vpack.c.bf16 %v7164_v46, %v7164_v46 }
0x1b2d   :  { %3195 = vrot.lane.b32.xlu1 %v3193_v29, %s6223_s18 }
0x1b9f   :  { %v3196_v4 = vpop.permute.xlu1 %3195 }
0x1ba0   :  { %5227 = vmatmul.mubr.msk.bf16.vlgmr.msra.gmra.mrb[88].mxu1 %vm509_vm6, %v3196_v4 }
0x1ba1   :  { %5239 = vmatpush3.bf16.msra.mxu1 %v7124_v22  ;;  %5242 = vmatprep.mubr.msk.bf16.mxu1 %vm6219_vm2, %v6217_v2 }
0x1ba2   :  { %5240 = vmatprep.subr.bf16.mxu1 %v6217_v2 }
0x1ba5   :  { %5241 = vmatpush3.bf16.msra.mxu1 %v7133_v11 }
0x1ba6   :  { %5254 = vmatprep.subr.bf16.mxu1 %v6217_v2 }
0x1c73   :  { %v3234_v30 = vpop.f32.mrb[88].mxu1 }
0x1c74   :  { %v3241_v8 = vrot.slane %v3234_v30, 6  ;;  %v5228_v10 = vpop.f32.mrb[89].mxu1 }
0x1c75   :  { %v3237_v13 = vpop.f32.mrb[90].mxu1 }
0x1c76   :  { %v3243_v40 = vadd.f32 %v3241_v8, %v7156_v49  ;;  %v5229_v50 = vpop.f32.mrb[91].mxu1 }
0x1c78   :  { %5611 = vtanh.f32 %v3243_v40  ;;  %v4715_v17 = vmul.f32 -1.442695, %v3243_v40 }
0x1c7a   :  { %5613 = vpow2.f32 %v4715_v17 }
0x1c82   :  { %v5612_v57 = vpop.eup %5611 }
0x1c83   :  { %3256 = vrot.lane.b32.xlu0 %v5612_v57, %s6198_s1 }
0x1c84   :  { %v5614_v58 = vpop.eup %5613 }
0x1c85   :  { %v3247_v18 = vadd.f32 1.0, %v5614_v58 }
0x1c87   :  { %5615 = vrcp.f32 %v3247_v18 }
0x1c91   :  { %v5616_v6 = vpop.eup %5615 }
0x1c92   :  { %v3254_v53 = vmul.f32 %v5616_v6, %v3252_v56  ;;  %v5536_v56 = vld [vmem:[#allocation24 + $0x8] sm:$0xff]  }
0x1cf5   :  { %v3257_v51 = vpop.permute.xlu0 %3256 }
0x1cf6   :  { %v3259_v36 = vmul.f32 %v5616_v6, %v3257_v51  ;;  %v5535_v51 = vld [vmem:[#allocation24] sm:$0xff]  }
0x1cf8   :  { %3261 = vrot.lane.b32.xlu1 %v3259_v36, %s6223_s18 }
0x1d6a   :  { %v3262_v33 = vpop.permute.xlu1 %3261 }
0x1d6b   :  { %v3264_v5 = vadd.f32 %v3262_v33, %v3254_v53 }
0x1d6d   :  { %5617 = vtanh.f32 %v3264_v5  ;;  %v3331_v41 = vrot.slane %v3264_v5, 6 }
0x1d77   :  { %v5618_v34 = vpop.eup %5617 }
0x1d78   :  { %3267 = vrot.lane.b32.xlu0 %v5618_v34, %s6198_s1 }
0x1dea   :  { %v3268_v23 = vpop.permute.xlu0 %3267 }
0x1deb   :  { %v3270_v20 = vmul.f32 %v5616_v6, %v3268_v23 }
0x1ded   :  { %v3271_v19 = vpack.c.bf16 %v3270_v20, %v3270_v20  ;;  %v3583_v43 = vsel %vm437_vm0, %v7164_v46, %v3270_v20  ;;  %v4724_v20 = vld [vmem:[#allocation27] ss:$0 sm:$0xff] }
0x1def   :  { %v3273_v39 = vrot.slane %v3271_v19, 1 }
0x1df1   :  { %3274 = vrot.lane.b32.xlu1 %v3273_v39, %s6223_s18 }
0x1e63   :  { %v3275_v54 = vpop.permute.xlu1 %3274 }
0x1e64   :  { %5235 = vmatmul.mubr.msk.bf16.vlgmr.msra.gmra.mrb[84].mxu0 %vm509_vm6, %v3275_v54 }
0x1e65   :  { %5247 = vmatpush3.bf16.msra.mxu0 %v7124_v22  ;;  %5250 = vmatprep.mubr.msk.bf16.mxu0 %vm6219_vm2, %v6217_v2 }
0x1e66   :  { %5248 = vmatprep.subr.bf16.mxu0 %v6217_v2 }
0x1e69   :  { %5249 = vmatpush3.bf16.msra.mxu0 %v7133_v11 }
0x1e6a   :  { %5262 = vmatprep.subr.bf16.mxu0 %v6217_v2 }
0x1f37   :  { %v3313_v25 = vpop.f32.mrb[84].mxu0 }
0x1f38   :  { %v3320_v0 = vrot.slane %v3313_v25, 4  ;;  %v5236_v52 = vpop.f32.mrb[85].mxu0 }
0x1f39   :  { %v3316_v24 = vpop.f32.mrb[86].mxu0 }
0x1f3a   :  { %v3322_v16 = vadd.f32 %v3320_v0, %v7156_v49  ;;  %v5237_v35 = vpop.f32.mrb[87].mxu0 }
0x1f3c   :  { %5619 = vtanh.f32 %v3322_v16  ;;  %v4717_v38 = vmul.f32 -1.442695, %v3322_v16 }
0x1f3e   :  { %5621 = vpow2.f32 %v4717_v38 }
0x1f46   :  { %v5620_v15 = vpop.eup %5619 }
0x1f47   :  { %3335 = vrot.lane.b32.xlu0 %v5620_v15, %s6198_s1 }
0x1f48   :  { %v5622_v45 = vpop.eup %5621 }
0x1f49   :  { %v3326_v60 = vadd.f32 1.0, %v5622_v45 }
0x1f4b   :  { %5623 = vrcp.f32 %v3326_v60 }
0x1f55   :  { %v5624_v63 = vpop.eup %5623 }
0x1f56   :  { %v3333_v27 = vmul.f32 %v5624_v63, %v3331_v41  ;;  %v7229_v41 = vld [vmem:[#allocation26] sm:$0xff]  }
0x1fb9   :  { %v3336_v7 = vpop.permute.xlu0 %3335 }
0x1fba   :  { %v3338_v9 = vmul.f32 %v5624_v63, %v3336_v7 }
0x1fbc   :  { %3340 = vrot.lane.b32.xlu1 %v3338_v9, %s6223_s18 }
0x202e   :  { %v3341_v48 = vpop.permute.xlu1 %3340 }
0x202f   :  { %v3343_v12 = vadd.f32 %v3341_v48, %v3333_v27  ;;  %v7233_v27 = vld [vmem:[#allocation26 + $0x8] sm:$0xff]  }
0x2031   :  { %5625 = vtanh.f32 %v3343_v12  ;;  %v3410_v10 = vrot.slane %v3343_v12, 6 }
0x203b   :  { %v5626_v32 = vpop.eup %5625 }
0x203c   :  { %3346 = vrot.lane.b32.xlu0 %v5626_v32, %s6198_s1 }
0x20ae   :  { %v3347_v62 = vpop.permute.xlu0 %3346 }
0x20af   :  { %v3349_v59 = vmul.f32 %v5624_v63, %v3347_v62 }
0x20b1   :  { %v3350_v14 = vpack.c.bf16 %v3349_v59, %v3349_v59  ;;  %v3585_v3 = vsel %vm3584_vm4, %v3583_v43, %v3349_v59 }
0x20b3   :  { %v3352_v21 = vrot.slane %v3350_v14, 2 }
0x20b5   :  { %3353 = vrot.lane.b32.xlu1 %v3352_v21, %s6223_s18 }
0x2127   :  { %v3354_v31 = vpop.permute.xlu1 %3353 }
0x2128   :  { %5243 = vmatmul.mubr.msk.bf16.vlgmr.msra.gmra.mrb[92].mxu1 %vm509_vm6, %v3354_v31 }
0x2129   :  { %5255 = vmatpush3.bf16.msra.mxu1 %v7124_v22  ;;  %5258 = vmatprep.mubr.msk.bf16.mxu1 %vm6219_vm2, %v6217_v2 }
0x212a   :  { %5256 = vmatprep.subr.bf16.mxu1 %v6217_v2 }
0x212d   :  { %5257 = vmatpush3.bf16.msra.mxu1 %v7133_v11 }
0x212e   :  { %5270 = vmatprep.subr.bf16.mxu1 %v6217_v2 }
0x21fb   :  { %v3392_v26 = vpop.f32.mrb[92].mxu1 }
0x21fc   :  { %v3399_v28 = vrot.slane %v3392_v26, 2  ;;  %v5244_v44 = vpop.f32.mrb[93].mxu1 }
0x21fd   :  { %v3395_v47 = vpop.f32.mrb[94].mxu1 }
0x21fe   :  { %v3401_v55 = vadd.f32 %v3399_v28, %v7156_v49  ;;  %v5245_v61 = vpop.f32.mrb[95].mxu1 }
0x2200   :  { %5627 = vtanh.f32 %v3401_v55  ;;  %v4719_v22 = vmul.f32 -1.442695, %v3401_v55 }
0x2202   :  { %5629 = vpow2.f32 %v4719_v22 }
0x220a   :  { %v5628_v46 = vpop.eup %5627 }
0x220b   :  { %3414 = vrot.lane.b32.xlu0 %v5628_v46, %s6198_s1 }
0x220c   :  { %v5630_v29 = vpop.eup %5629 }
0x220d   :  { %v3405_v4 = vadd.f32 1.0, %v5630_v29 }
0x220f   :  { %5631 = vrcp.f32 %v3405_v4 }
0x2219   :  { %v5632_v30 = vpop.eup %5631 }
0x221a   :  { %v3412_v13 = vmul.f32 %v5632_v30, %v3410_v10 }
0x227d   :  { %v3415_v11 = vpop.permute.xlu0 %3414 }
0x227e   :  { %v3417_v8 = vmul.f32 %v5632_v30, %v3415_v11 }
0x2280   :  { %3419 = vrot.lane.b32.xlu1 %v3417_v8, %s6223_s18 }
0x22f2   :  { %v3420_v40 = vpop.permute.xlu1 %3419 }
0x22f3   :  { %v3422_v50 = vadd.f32 %v3420_v40, %v3412_v13 }
0x22f5   :  { %5633 = vtanh.f32 %v3422_v50  ;;  %v3486_v45 = vrot.slane %v3422_v50, 6 }
0x22ff   :  { %v5634_v49 = vpop.eup %5633 }
0x2300   :  { %3425 = vrot.lane.b32.xlu0 %v5634_v49, %s6198_s1 }
0x2372   :  { %v3426_v57 = vpop.permute.xlu0 %3425 }
0x2373   :  { %v3428_v17 = vmul.f32 %v5632_v30, %v3426_v57 }
0x2375   :  { %v3429_v58 = vpack.c.bf16 %v3428_v17, %v3428_v17  ;;  %v7208_v18 = vsel %vm686_vm8, %v3585_v3, %v3428_v17 }
0x2377   :  { %v3431_v6 = vrot.slane %v3429_v58, 3 }
0x2379   :  { %3432 = vrot.lane.b32.xlu1 %v3431_v6, %s6223_s18 }
0x23eb   :  { %v3433_v36 = vpop.permute.xlu1 %3432 }
0x23ec   :  { %5251 = vmatmul.mubr.msk.bf16.vlgmr.msra.gmra.mrb[88].mxu0 %vm509_vm6, %v3433_v36 }
0x23ed   :  { %5263 = vmatpush3.bf16.msra.mxu0 %v5535_v51  ;;  %5266 = vmatprep.mubr.msk.bf16.mxu0 %vm6219_vm2, %v6217_v2 }
0x23ee   :  { %5264 = vmatprep.subr.bf16.mxu0 %v6217_v2 }
0x23f1   :  { %5265 = vmatpush3.bf16.msra.mxu0 %v5536_v56 }
0x23f2   :  { %5278 = vmatprep.subr.bf16.mxu0 %v6217_v2 }
0x23f4   :  { %5267 = vmatmul.mubr.msk.bf16.vlgmr.msra.gmra.mrb[92].mxu0 %vm509_vm6, %v7146_v42 }
0x23f5   :  { %5282 = vmatprep.mubr.msk.bf16.mxu0 %vm6219_vm2, %v6217_v2  ;;  %5279 = vmatpush3.bf16.msra.mxu0 %v7229_v41 }
0x23f6   :  { %5280 = vmatprep.subr.bf16.mxu0 %v6217_v2 }
0x23f9   :  { %5281 = vmatpush3.bf16.msra.mxu0 %v7233_v27 }
0x23fa   :  { %5294 = vmatprep.subr.bf16.mxu0 %v6217_v2 }
0x24bf   :  { %v3471_v53 = vpop.f32.mrb[88].mxu0 }
0x24c0   :  { %v3477_v33 = vadd.f32 %v3471_v53, %v7159_v37  ;;  %v5252_v5 = vpop.f32.mrb[89].mxu0 }
0x24c1   :  { %v3474_v34 = vpop.f32.mrb[90].mxu0 }
0x24c2   :  { %5635 = vtanh.f32 %v3477_v33  ;;  %v5253_v23 = vpop.f32.mrb[91].mxu0  ;;  %v4721_v42 = vmul.f32 -1.442695, %v3477_v33 }
0x24c4   :  { %5637 = vpow2.f32 %v4721_v42 }
0x24c7   :  { %v3645_v19 = vpop.f32.mrb[92].mxu0 }
0x24c8   :  { %v7221_v39 = vadd.f32 %v4724_v20, %v3645_v19  ;;  %v5268_v54 = vpop.f32.mrb[93].mxu0 }
0x24c9   :  { %v3648_v25 = vpop.f32.mrb[94].mxu0 }
0x24ca   :  { %v5269_v0 = vpop.f32.mrb[95].mxu0  ;;  %v3649_v31 = vadd.f32 %v4724_v20, %v3648_v25 }
0x24cc   :  { %v5636_v52 = vpop.eup %5635 }
0x24cd   :  { %3490 = vrot.lane.b32.xlu0 %v5636_v52, %s6198_s1 }
0x24ce   :  { %v5638_v24 = vpop.eup %5637 }
0x24cf   :  { %v3481_v16 = vadd.f32 1.0, %v5638_v24 }
0x24d1   :  { %5639 = vrcp.f32 %v3481_v16 }
0x24db   :  { %v5640_v35 = vpop.eup %5639 }
0x24dc   :  { %v3488_v60 = vmul.f32 %v5640_v35, %v3486_v45 }
0x253f   :  { %v3491_v15 = vpop.permute.xlu0 %3490 }
0x2540   :  { %v3493_v38 = vmul.f32 %v5640_v35, %v3491_v15 }
0x2542   :  { %3495 = vrot.lane.b32.xlu1 %v3493_v38, %s6223_s18 }
0x25b4   :  { %v3496_v63 = vpop.permute.xlu1 %3495 }
0x25b5   :  { %v7225_v7 = vadd.f32 %v3496_v63, %v3488_v60 }
0x25b7   :  { %5641 = vtanh.f32 %v7225_v7 }
0x25c1   :  { %v5642_v9 = vpop.eup %5641 }
0x25c2   :  { %3501 = vrot.lane.b32.xlu0 %v5642_v9, %s6198_s1 }
0x2634   :  { %v3502_v48 = vpop.permute.xlu0 %3501 }
0x2635   :  { %v7237_v12 = vmul.f32 %v5640_v35, %v3502_v48 }
0x2637   :  { %v3505_v32 = vpack.c.bf16 %v7237_v12, %v7237_v12 }
0x2639   :  { %3507 = vrot.lane.b32.xlu1 %v3505_v32, %s6223_s18 }
0x26ab   :  { %v3508_v62 = vpop.permute.xlu1 %3507 }
0x26ac   :  { %5259 = vmatmul.mubr.msk.bf16.vlgmr.msra.gmra.mrb[96].mxu1 %vm509_vm6, %v3508_v62 }
0x26ad   :  { %5271 = vmatpush3.bf16.msra.mxu1 %v7229_v41  ;;  %5274 = vmatprep.mubr.msk.bf16.mxu1 %vm6219_vm2, %v6217_v2 }
0x26ae   :  { %5272 = vmatprep.subr.bf16.mxu1 %v6217_v2 }
0x26b1   :  { %5273 = vmatpush3.bf16.msra.mxu1 %v7233_v27 }
0x26b2   :  { %5286 = vmatprep.subr.bf16.mxu1 %v6217_v2 }
0x26b4   :  { %5275 = vmatmul.mubr.bf16.vlgmr.msra.gmra.mrb[100].mxu1 %v6216_v1 }
0x26b5   :  { %5287 = vmatpush3.bf16.msra.mxu1 %v7229_v41  ;;  %5290 = vmatprep.mubr.msk.bf16.mxu1 %vm6219_vm2, %v6217_v2 }
0x26b6   :  { %5288 = vmatprep.subr.bf16.mxu1 %v6217_v2 }
0x26b9   :  { %5289 = vmatpush3.bf16.msra.mxu1 %v7233_v27 }
0x26ba   :  { %5302 = vmatprep.subr.bf16.mxu1 %v6217_v2 }
0x277f   :  { %v7256_v59 = vpop.f32.mrb[96].mxu1 }
0x2780   :  { %v5260_v43 = vpop.f32.mrb[97].mxu1 }
0x2781   :  { %v3549_v14 = vpop.f32.mrb[98].mxu1 }
0x2782   :  { %v5261_v3 = vpop.f32.mrb[99].mxu1 }
0x2787   :  { %v3702_v21 = vpop.f32.mrb[100].mxu1 }
0x2788   :  { %v3709_v26 = vrot.slane %v3702_v21, 6  ;;  %v5276_v1 = vpop.f32.mrb[101].mxu1 }
0x2789   :  { %v3705_v28 = vpop.f32.mrb[102].mxu1 }
0x278a   :  { %v3711_v44 = vadd.f32 %v3709_v26, %v3649_v31  ;;  %v5277_v47 = vpop.f32.mrb[103].mxu1 }
0x278c   :  { %5643 = vtanh.f32 %v3711_v44  ;;  %v4730_v61 = vmul.f32 -1.442695, %v3711_v44 }
0x278e   :  { %5645 = vpow2.f32 %v4730_v61 }
0x2796   :  { %v5644_v55 = vpop.eup %5643 }
0x2797   :  { %3721 = vrot.lane.b32.xlu0 %v5644_v55, %s6198_s1 }
0x2798   :  { %v5646_v46 = vpop.eup %5645 }
0x2799   :  { %v3715_v22 = vadd.f32 1.0, %v5646_v46 }
0x279b   :  { %5647 = vrcp.f32 %v3715_v22 }
0x27a5   :  { %v5648_v29 = vpop.eup %5647 }
0x27a6   :  { %v3719_v11 = vmul.f32 0.0, %v5648_v29 }
0x2809   :  { %v3722_v4 = vpop.permute.xlu0 %3721 }
0x280a   :  { %v3724_v30 = vmul.f32 %v5648_v29, %v3722_v4 }
0x280c   :  { %3726 = vrot.lane.b32.xlu1 %v3724_v30, %s6223_s18 }
0x287e   :  { %v3727_v8 = vpop.permute.xlu1 %3726 }
0x287f   :  { %v3729_v10 = vadd.f32 %v3727_v8, %v3719_v11 }
0x2881   :  { %5649 = vtanh.f32 %v3729_v10  ;;  %v3793_v54 = vrot.slane %v3729_v10, 2 }
0x288b   :  { %v5650_v13 = vpop.eup %5649 }
0x288c   :  { %3732 = vrot.lane.b32.xlu0 %v5650_v13, %s6198_s1 }
0x28fe   :  { %v3733_v40 = vpop.permute.xlu0 %3732 }
0x28ff   :  { %v7261_v50 = vmul.f32 %v5648_v29, %v3733_v40 }
0x2901   :  { %v3736_v49 = vpack.c.bf16 %v7261_v50, %v7261_v50 }
0x2903   :  { %v3738_v57 = vrot.slane %v3736_v49, 1 }
0x2905   :  { %3739 = vrot.lane.b32.xlu1 %v3738_v57, %s6223_s18 }
0x2977   :  { %v3740_v17 = vpop.permute.xlu1 %3739 }
0x2978   :  { %5283 = vmatmul.mubr.msk.bf16.vlgmr.msra.gmra.mrb[96].mxu0 %vm509_vm6, %v3740_v17 }
0x2979   :  { %5295 = vmatpush3.bf16.msra.mxu0 %v7229_v41  ;;  %5298 = vmatprep.mubr.msk.bf16.mxu0 %vm6219_vm2, %v6217_v2 }
0x297a   :  { %5296 = vmatprep.subr.bf16.mxu0 %v6217_v2 }
0x297d   :  { %5297 = vmatpush3.bf16.msra.mxu0 %v7233_v27 }
0x297e   :  { %5310 = vmatprep.subr.bf16.mxu0 %v6217_v2 }
0x2a4b   :  { %v3778_v58 = vpop.f32.mrb[96].mxu0 }
0x2a4c   :  { %v3784_v6 = vadd.f32 %v3778_v58, %v3649_v31  ;;  %v5284_v51 = vpop.f32.mrb[97].mxu0 }
0x2a4d   :  { %v3781_v36 = vpop.f32.mrb[98].mxu0 }
0x2a4e   :  { %5651 = vtanh.f32 %v3784_v6  ;;  %v5285_v56 = vpop.f32.mrb[99].mxu0  ;;  %v4732_v33 = vmul.f32 -1.442695, %v3784_v6 }
0x2a50   :  { %5653 = vpow2.f32 %v4732_v33 }
0x2a58   :  { %v5652_v53 = vpop.eup %5651 }
0x2a59   :  { %3797 = vrot.lane.b32.xlu0 %v5652_v53, %s6198_s1 }
0x2a5a   :  { %v5654_v5 = vpop.eup %5653 }
0x2a5b   :  { %v3788_v34 = vadd.f32 1.0, %v5654_v5 }
0x2a5d   :  { %5655 = vrcp.f32 %v3788_v34 }
0x2a67   :  { %v5656_v23 = vpop.eup %5655 }
0x2a68   :  { %v3795_v25 = vmul.f32 %v5656_v23, %v3793_v54 }
0x2acb   :  { %v3798_v20 = vpop.permute.xlu0 %3797 }
0x2acc   :  { %v3800_v19 = vmul.f32 %v5656_v23, %v3798_v20 }
0x2ace   :  { %3802 = vrot.lane.b32.xlu1 %v3800_v19, %s6223_s18 }
0x2b40   :  { %v3803_v0 = vpop.permute.xlu1 %3802 }
0x2b41   :  { %v3805_v52 = vadd.f32 %v3803_v0, %v3795_v25 }
0x2b43   :  { %5657 = vtanh.f32 %v3805_v52  ;;  %v3871_v26 = vrot.slane %v3805_v52, 2 }
0x2b4d   :  { %v5658_v42 = vpop.eup %5657 }
0x2b4e   :  { %3808 = vrot.lane.b32.xlu0 %v5658_v42, %s6198_s1 }
0x2bc0   :  { %v3809_v24 = vpop.permute.xlu0 %3808 }
0x2bc1   :  { %v7276_v16 = vmul.f32 %v5656_v23, %v3809_v24 }
0x2bc3   :  { %v3812_v35 = vpack.c.bf16 %v7276_v16, %v7276_v16 }
0x2bc5   :  { %3814 = vrot.lane.b32.xlu1 %v3812_v35, %s6223_s18 }
0x2c37   :  { %v3815_v15 = vpop.permute.xlu1 %3814 }
0x2c38   :  { %5291 = vmatmul.mubr.msk.bf16.vlgmr.msra.gmra.mrb[104].mxu1 %vm509_vm6, %v3815_v15 }
0x2c39   :  { %5303 = vmatpush3.bf16.msra.mxu1 %v7229_v41  ;;  %5306 = vmatprep.mubr.msk.bf16.mxu1 %vm6219_vm2, %v6217_v2 }
0x2c3a   :  { %5304 = vmatprep.subr.bf16.mxu1 %v6217_v2 }
0x2c3d   :  { %5305 = vmatpush3.bf16.msra.mxu1 %v7233_v27 }
0x2c3e   :  { %5318 = vmatprep.subr.bf16.mxu1 %v6217_v2 }
0x2d0b   :  { %v3853_v38 = vpop.f32.mrb[104].mxu1 }
0x2d0c   :  { %v3860_v45 = vrot.slane %v3853_v38, 2  ;;  %v5292_v60 = vpop.f32.mrb[105].mxu1 }
0x2d0d   :  { %v3856_v63 = vpop.f32.mrb[106].mxu1 }
0x2d0e   :  { %v3862_v9 = vadd.f32 %v3860_v45, %v7221_v39  ;;  %v5293_v48 = vpop.f32.mrb[107].mxu1 }
0x2d10   :  { %5659 = vtanh.f32 %v3862_v9  ;;  %v4734_v62 = vmul.f32 -1.442695, %v3862_v9 }
0x2d12   :  { %5661 = vpow2.f32 %v4734_v62 }
0x2d1a   :  { %v5660_v32 = vpop.eup %5659 }
0x2d1b   :  { %3875 = vrot.lane.b32.xlu0 %v5660_v32, %s6198_s1 }
0x2d1c   :  { %v5662_v43 = vpop.eup %5661 }
0x2d1d   :  { %v3866_v14 = vadd.f32 1.0, %v5662_v43 }
0x2d1f   :  { %5663 = vrcp.f32 %v3866_v14  ;;  %v3553_v14 = vrot.slane %v7256_v59, 6 }
0x2d29   :  { %v5664_v3 = vpop.eup %5663 }
0x2d2a   :  { %v3873_v1 = vmul.f32 %v5664_v3, %v3871_v26 }
0x2d8d   :  { %v3876_v21 = vpop.permute.xlu0 %3875 }
0x2d8e   :  { %v3878_v31 = vmul.f32 %v5664_v3, %v3876_v21 }
0x2d90   :  { %3880 = vrot.lane.b32.xlu1 %v3878_v31, %s6223_s18 }
0x2e02   :  { %v3881_v28 = vpop.permute.xlu1 %3880 }
0x2e03   :  { %v3883_v44 = vadd.f32 %v3881_v28, %v3873_v1 }
0x2e05   :  { %5665 = vtanh.f32 %v3883_v44  ;;  %v3950_v6 = vrot.slane %v3883_v44, 2 }
0x2e0f   :  { %v5666_v47 = vpop.eup %5665 }
0x2e10   :  { %3886 = vrot.lane.b32.xlu0 %v5666_v47, %s6198_s1 }
0x2e82   :  { %v3887_v55 = vpop.permute.xlu0 %3886 }
0x2e83   :  { %v7292_v61 = vmul.f32 %v5664_v3, %v3887_v55  ;;  %v3555_v3 = vadd.f32 %v3553_v14, %v7159_v37  ;;  %v5544_v14 = vld [vmem:[%s7483_s3 + $0x8] sm:$0xff]  }
0x2e85   :  { %v3890_v46 = vpack.c.bf16 %v7292_v61, %v7292_v61  ;;  %v4723_v44 = vmul.f32 -1.442695, %v3555_v3 }
0x2e87   :  { %v3892_v22 = vrot.slane %v3890_v46, 3 }
0x2e89   :  { %3893 = vrot.lane.b32.xlu1 %v3892_v22, %s6223_s18 }
0x2efb   :  { %v3894_v29 = vpop.permute.xlu1 %3893 }
0x2efc   :  { %5299 = vmatmul.mubr.msk.bf16.vlgmr.msra.gmra.mrb[100].mxu0 %vm509_vm6, %v3894_v29  ;;  %v3564_v29 = vrot.slane %v7225_v7, 6 }
0x2efd   :  { %5311 = vmatpush3.bf16.msra.mxu0 %v7229_v41  ;;  %5314 = vmatprep.mubr.msk.bf16.mxu0 %vm6219_vm2, %v6217_v2 }
0x2efe   :  { %5312 = vmatprep.subr.bf16.mxu0 %v6217_v2 }
0x2f01   :  { %5313 = vmatpush3.bf16.msra.mxu0 %v7233_v27 }
0x2f02   :  { %5330 = vmatprep.subr.bf16.mxu0 %v6217_v2 }
0x2fcf   :  { %v3932_v4 = vpop.f32.mrb[100].mxu0 }
0x2fd0   :  { %v3939_v30 = vrot.slane %v3932_v4, 4  ;;  %v5300_v11 = vpop.f32.mrb[101].mxu0 }
0x2fd1   :  { %v3935_v8 = vpop.f32.mrb[102].mxu0 }
0x2fd2   :  { %v3941_v10 = vadd.f32 %v3939_v30, %v7221_v39  ;;  %v5301_v13 = vpop.f32.mrb[103].mxu0 }
0x2fd4   :  { %5667 = vtanh.f32 %v3941_v10  ;;  %v4736_v41 = vmul.f32 -1.442695, %v3941_v10  ;;  %v4147_v10 = vld [vmem:[%s7481_s25 + $0x8] sm:$0xf] }
0x2fd6   :  { %5669 = vpow2.f32 %v4736_v41 }
0x2fde   :  { %v5668_v40 = vpop.eup %5667 }
0x2fdf   :  { %3954 = vrot.lane.b32.xlu0 %v5668_v40, %s6198_s1 }
0x2fe0   :  { %v5670_v49 = vpop.eup %5669 }
0x2fe1   :  { %v3945_v57 = vadd.f32 1.0, %v5670_v49 }
0x2fe3   :  { %5671 = vrcp.f32 %v3945_v57 }
0x2fed   :  { %v5672_v17 = vpop.eup %5671 }
0x2fee   :  { %v3952_v51 = vmul.f32 %v5672_v17, %v3950_v6  ;;  %v4127_v6 = vsel %vm437_vm0, %v7276_v16, %v7261_v50 }
0x3051   :  { %v3955_v27 = vpop.permute.xlu0 %3954 }
0x3052   :  { %v3957_v58 = vmul.f32 %v5672_v17, %v3955_v27 }
0x3054   :  { %3959 = vrot.lane.b32.xlu1 %v3957_v58, %s6223_s18 }
0x30c6   :  { %v3960_v36 = vpop.permute.xlu1 %3959 }
0x30c7   :  { %v3962_v56 = vadd.f32 %v3960_v36, %v3952_v51 }
0x30c9   :  { %5673 = vtanh.f32 %v3962_v56  ;;  %v4029_v9 = vrot.slane %v3962_v56, 2 }
0x30d3   :  { %v5674_v53 = vpop.eup %5673 }
0x30d4   :  { %3965 = vrot.lane.b32.xlu0 %v5674_v53, %s6198_s1 }
0x3146   :  { %v3966_v33 = vpop.permute.xlu0 %3965 }
0x3147   :  { %v7308_v5 = vmul.f32 %v5672_v17, %v3966_v33 }
0x3149   :  { %v3969_v34 = vpack.c.bf16 %v7308_v5, %v7308_v5 }
0x314b   :  { %v3971_v23 = vrot.slane %v3969_v34, 2 }
0x314d   :  { %3972 = vrot.lane.b32.xlu1 %v3971_v23, %s6223_s18 }
0x31bf   :  { %v3973_v20 = vpop.permute.xlu1 %3972 }
0x31c0   :  { %5307 = vmatmul.mubr.msk.bf16.vlgmr.msra.gmra.mrb[108].mxu1 %vm509_vm6, %v3973_v20  ;;  %v4146_v20 = vld [vmem:[%s7481_s25] sm:$0xff] }
0x31c1   :  { %5326 = vmatprep.mubr.msk.bf16.mxu1 %vm6219_vm2, %v6217_v2 }
0x3293   :  { %v4011_v19 = vpop.f32.mrb[108].mxu1 }
0x3294   :  { %v4018_v54 = vrot.slane %v4011_v19, 6  ;;  %v5308_v25 = vpop.f32.mrb[109].mxu1  ;;  %v5539_v19 = vld [vmem:[%s7482_s2] sm:$0xff]  }
0x3295   :  { %v4014_v0 = vpop.f32.mrb[110].mxu1  ;;  %5319 = vmatpush3.bf16.msra.mxu1 %v5539_v19  ;;  %v5541_v25 = vld [vmem:[%s7482_s2 + $0x10] sm:$0xff]  }
0x3296   :  { %v4020_v52 = vadd.f32 %v4018_v54, %v7221_v39  ;;  %v5309_v42 = vpop.f32.mrb[111].mxu1  ;;  %v5540_v54 = vld [vmem:[%s7482_s2 + $0x8] sm:$0xff]   ;;  %5320 = vmatprep.subr.bf16.mxu1 %v6217_v2  ;;  %v5542_v0 = vld [vmem:[%s7482_s2 + $0x18] sm:$0xff]  }
0x3298   :  { %5675 = vtanh.f32 %v4020_v52  ;;  %v4738_v35 = vmul.f32 -1.442695, %v4020_v52 }
0x3299   :  { %5321 = vmatpush3.bf16.msra.mxu1 %v5540_v54 }
0x329a   :  { %5677 = vpow2.f32 %v4738_v35  ;;  %5322 = vmatprep.subr.bf16.mxu1 %v6217_v2 }
0x329d   :  { %5323 = vmatpush3.bf16.msra.mxu1 %v5541_v25  ;;  %v5547_v25 = vld [vmem:[%s6442_s13] sm:$0xff]  }
0x329e   :  { %5324 = vmatprep.subr.bf16.mxu1 %v6217_v2 }
0x32a1   :  { %5325 = vmatpush3.bf16.msra.mxu1 %v5542_v0 }
0x32a2   :  { %v5676_v24 = vpop.eup %5675  ;;  %5342 = vmatprep.subr.bf16.mxu1 %v6217_v2 }
0x32a3   :  { %4033 = vrot.lane.b32.xlu0 %v5676_v24, %s6198_s1 }
0x32a4   :  { %v5678_v15 = vpop.eup %5677 }
0x32a5   :  { %v4024_v38 = vadd.f32 1.0, %v5678_v15 }
0x32a7   :  { %5679 = vrcp.f32 %v4024_v38 }
0x32b1   :  { %v5680_v45 = vpop.eup %5679 }
0x32b2   :  { %v4031_v48 = vmul.f32 %v5680_v45, %v4029_v9 }
0x3315   :  { %v4034_v60 = vpop.permute.xlu0 %4033 }
0x3316   :  { %v4036_v63 = vmul.f32 %v5680_v45, %v4034_v60 }
0x3318   :  { %4038 = vrot.lane.b32.xlu1 %v4036_v63, %s6223_s18 }
0x338a   :  { %v4039_v32 = vpop.permute.xlu1 %4038 }
0x338b   :  { %v4041_v62 = vadd.f32 %v4039_v32, %v4031_v48 }
0x338d   :  { %5681 = vtanh.f32 %v4041_v62 }
0x338e   :  { %5683 = vtanh.f32 %v3555_v3  ;;  %v5545_v3 = vld [vmem:[%s7483_s3 + $0x10] sm:$0xff]  }
0x338f   :  { %5685 = vpow2.f32 %v4723_v44 }
0x3397   :  { %v5682_v43 = vpop.eup %5681 }
0x3398   :  { %4044 = vrot.lane.b32.xlu0 %v5682_v43, %s6198_s1  ;;  %v5684_v28 = vpop.eup %5683  ;;  %v5543_v43 = vld [vmem:[%s7483_s3] sm:$0xff]  }
0x3399   :  { %v5686_v47 = vpop.eup %5685 }
0x339a   :  { %v3559_v55 = vadd.f32 1.0, %v5686_v47 }
0x339c   :  { %5687 = vrcp.f32 %v3559_v55 }
0x33a6   :  { %v5688_v59 = vpop.eup %5687 }
0x33a7   :  { %v3566_v4 = vmul.f32 %v5688_v59, %v3564_v29 }
0x340a   :  { %v4045_v21 = vpop.permute.xlu0 %4044 }
0x340b   :  { %v7322_v31 = vmul.f32 %v5680_v45, %v4045_v21  ;;  %v5546_v21 = vld [vmem:[%s7483_s3 + $0x18] sm:$0xff]  }
0x340d   :  { %v4048_v26 = vpack.c.bf16 %v7322_v31, %v7322_v31 }
0x340f   :  { %v4050_v1 = vrot.slane %v4048_v26, 1 }
0x3411   :  { %4051 = vrot.lane.b32.xlu1 %v4050_v1, %s6223_s18 }
0x3415   :  { %3568 = vrot.lane.b32.xlu1 %v5684_v28, %s6198_s1 }
0x3483   :  { %v4052_v37 = vpop.permute.xlu1 %4051 }
0x3484   :  { %5315 = vmatmul.mubr.msk.bf16.vlgmr.msra.gmra.mrb[104].mxu0 %vm509_vm6, %v4052_v37 }
0x3485   :  { %5338 = vmatprep.mubr.msk.bf16.mxu0 %vm6219_vm2, %v6217_v2  ;;  %5331 = vmatpush3.bf16.msra.mxu0 %v5543_v43 }
0x3486   :  { %5332 = vmatprep.subr.bf16.mxu0 %v6217_v2 }
0x3487   :  { %v3569_v46 = vpop.permute.xlu1 %3568 }
0x3488   :  { %v3571_v22 = vmul.f32 %v5688_v59, %v3569_v46 }
0x3489   :  { %5333 = vmatpush3.bf16.msra.mxu0 %v5544_v14 }
0x348a   :  { %3573 = vrot.lane.b32.xlu1 %v3571_v22, %s6223_s18  ;;  %5334 = vmatprep.subr.bf16.mxu0 %v6217_v2  ;;  %v4747_v22 = vld [vmem:[#allocation2] ss:$0 sm:$0xff] }
0x348d   :  { %5335 = vmatpush3.bf16.msra.mxu0 %v5545_v3 }
0x348e   :  { %5336 = vmatprep.subr.bf16.mxu0 %v6217_v2 }
0x3491   :  { %5337 = vmatpush3.bf16.msra.mxu0 %v5546_v21 }
0x3492   :  { %5348 = vmatprep.subr.bf16.mxu0 %v6217_v2 }
0x34fc   :  { %v3574_v30 = vpop.permute.xlu1 %3573 }
0x34fd   :  { %v3576_v11 = vadd.f32 %v3574_v30, %v3566_v4 }
0x34ff   :  { %5689 = vtanh.f32 %v3576_v11 }
0x3509   :  { %v5690_v8 = vpop.eup %5689 }
0x350a   :  { %3579 = vrot.lane.b32.xlu1 %v5690_v8, %s6198_s1 }
0x350e   :  { %4155 = vperm.xlu1 %5443, %v4147_v10  }
0x3557   :  { %v4090_v13 = vpop.f32.mrb[104].mxu0 }
0x3558   :  { %v4096_v40 = vadd.f32 %v4090_v13, %v7221_v39  ;;  %v5316_v41 = vpop.f32.mrb[105].mxu0 }
0x3559   :  { %v4093_v49 = vpop.f32.mrb[106].mxu0 }
0x355a   :  { %5691 = vtanh.f32 %v4096_v40  ;;  %v5317_v57 = vpop.f32.mrb[107].mxu0  ;;  %v4740_v39 = vmul.f32 -1.442695, %v4096_v40 }
0x355c   :  { %5693 = vpow2.f32 %v4740_v39 }
0x3564   :  { %v5692_v17 = vpop.eup %5691 }
0x3565   :  { %4109 = vrot.lane.b32.xlu0 %v5692_v17, %s6198_s1 }
0x3566   :  { %v5694_v51 = vpop.eup %5693 }
0x3567   :  { %v4100_v36 = vadd.f32 1.0, %v5694_v51 }
0x3569   :  { %5695 = vrcp.f32 %v4100_v36 }
0x3573   :  { %v5696_v56 = vpop.eup %5695 }
0x357c   :  { %v3580_v7 = vpop.permute.xlu1 %3579 }
0x357d   :  { %v3582_v27 = vmul.f32 %v5688_v59, %v3580_v7 }
0x357f   :  { %v3587_v58 = vsel %vm437_vm0, %v7237_v12, %v3582_v27  ;;  %v4105_v12 = vrot.slane %v4041_v62, 2 }
0x3580   :  { %4132 = vrot.lane.b32.xlu1 %v3587_v58, %s6223_s18 }
0x3581   :  { %v4107_v34 = vmul.f32 %v5696_v56, %v4105_v12 }
0x3584   :  { %4140 = vrot.lane.b32.xlu1 %v4127_v6, %s6198_s1 }
0x358d   :  { %v4156_v15 = vpop.permute.xlu1 %4155 }
0x35d7   :  { %v4110_v53 = vpop.permute.xlu0 %4109 }
0x35d8   :  { %v4112_v33 = vmul.f32 %v5696_v56, %v4110_v53 }
0x35da   :  { %4114 = vrot.lane.b32.xlu0 %v4112_v33, %s6223_s18 }
0x35f2   :  { %v4133_v38 = vpop.permute.xlu1 %4132 }
0x35f6   :  { %v4141_v60 = vpop.permute.xlu1 %4140 }
0x35f7   :  { %v4145_v9 = vsel %vm509_vm6, %v4133_v38, %v4141_v60 }
0x364c   :  { %v4115_v23 = vpop.permute.xlu0 %4114 }
0x364d   :  { %v4117_v50 = vadd.f32 %v4115_v23, %v4107_v34 }
0x364f   :  { %5697 = vtanh.f32 %v4117_v50 }
0x3659   :  { %v5698_v16 = vpop.eup %5697 }
0x365a   :  { %4120 = vrot.lane.b32.xlu0 %v5698_v16, %s6198_s1 }
0x365e   :  { %4150 = vperm.xlu0 %5442, %v4146_v20  }
0x3662   :  { %4130 = vrot.lane.b32.xlu0 %v7208_v18, %s6223_s18 }
0x36cc   :  { %v4121_v52 = vpop.permute.xlu0 %4120 }
0x36cd   :  { %v4123_v42 = vmul.f32 %v5696_v56, %v4121_v52 }
0x36cf   :  { %v4124_v18 = vsel %vm437_vm0, %v4123_v42, %v7322_v31  ;;  %v4741_v31 = vld [vmem:[#allocation29] ss:$0 sm:$0xff]  ;;  %vm4330_vm0 = vcmask 7168   ;;  %v5548_v42 = vld [vmem:[%s6442_s13 + $0x8] sm:$0xff]  }
0x36d0   :  { %v4125_v24 = vsel %vm3584_vm4, %v4124_v18, %v7308_v5  ;;  %v7366_v5 = vmul.f32 %v4156_v15, %v4145_v9  ;;  %v5550_v15 = vld [vmem:[%s6442_s13 + $0x18] sm:$0xff]  }
0x36d1   :  { %v4126_v35 = vsel %vm686_vm8, %v4125_v24, %v7292_v61 }
0x36d2   :  { %4138 = vrot.lane.b32.xlu0 %v4126_v35, %s6198_s1  ;;  %s7484_s1 = sld [smem:[#allocation52_spill]]  ;;  %v5549_v35 = vld [vmem:[%s6442_s13 + $0x10] sm:$0xff]   ;;  %s6106_s13 = scalar_lea.vmem %s4551_s20, 32 }
0x36d3   :  { %p6107_p4 = scmp.ne.s32.totalorder %s4551_s20, %s6106_s13  ;;  %p6112_p6 = scmp.lt.s32.totalorder %s6106_s13, %s6106_s13 }
0x36d5   :  { %p6113_p7 = por %p6112_p6, %p6111_p5 }
0x36d7   :  { %p6114_p8 = pnand %p6113_p7, %p6107_p4 }
0x36d8   :  { %v4347_v34 = vld [vmem:[%s7484_s1] sm:$0x1] }
0x36dd   :  { %v4151_v45 = vpop.permute.xlu0 %4150 }
0x36e1   :  { %v4131_v63 = vpop.permute.xlu0 %4130 }
0x3744   :  { %v4139_v48 = vpop.permute.xlu0 %4138 }
0x3745   :  { %v4144_v32 = vsel %vm509_vm6, %v4131_v63, %v4139_v48  ;;  %vm4349_vm6 = vcmask 97280  }
0x3746   :  { %v7368_v62 = vmul.f32 %v4151_v45, %v4144_v32 }
0x3748   :  { %v4168_v61 = vpack.c.bf16 %v7366_v5, %v7368_v62 }
0x374a   :  { %5327 = vmatmul.mubr.msk.bf16.vlgmr.msra.gmra.mrb[112].mxu1 %vm1609_vm1, %v4168_v61 }
0x374b   :  { %5344 = vmatprep.mubr.msk.bf16.mxu1 %vm6219_vm2, %v6217_v2 }
0x381d   :  { %v4237_v26 = vpop.f32.mrb[112].mxu1 }
0x381e   :  { %v4238_v1 = vadd.f32 %v4741_v31, %v4237_v26  ;;  %v5328_v28 = vpop.f32.mrb[113].mxu1 }
0x381f   :  { %v4240_v44 = vpop.f32.mrb[114].mxu1 }
0x3820   :  { %v4241_v47 = vadd.f32 %v4741_v31, %v4240_v44  ;;  %v5329_v55 = vpop.f32.mrb[115].mxu1  ;;  %5699 = vtanh.f32 %v4238_v1 }
0x3822   :  { %5701 = vtanh.f32 %v4241_v47 }
0x382a   :  { %v5700_v37 = vpop.eup %5699 }
0x382c   :  { %v5702_v59 = vpop.eup %5701 }
0x382d   :  { %v4254_v46 = vpack.c.bf16 %v5702_v59, %v5700_v37 }
0x382f   :  { %5339 = vmatmul.mubr.msk.bf16.vlgmr.msra.gmra.mrb[108].mxu0 %vm1609_vm1, %v4254_v46 }
0x3830   :  { %5350 = vmatprep.mubr.msk.bf16.mxu0 %vm6219_vm2, %v6217_v2 }
0x3902   :  { %v4323_v29 = vpop.f32.mrb[108].mxu0 }
0x3903   :  { %v4324_v4 = vadd.f32 %v4747_v22, %v4323_v29  ;;  %v5340_v30 = vpop.f32.mrb[109].mxu0 }
0x3904   :  { %v4326_v11 = vpop.f32.mrb[110].mxu0 }
0x3905   :  { %v4327_v8 = vadd.f32 %v4747_v22, %v4326_v11  ;;  %v5341_v10 = vpop.f32.mrb[111].mxu0  ;;  %v4331_v13 = vsel %vm4330_vm0, %v4324_v4, -inf }
0x3907   :  { %v4333_v40 = vsel %vm4332_vm5, %v4327_v8, -inf }
0x3908   :  { %v4334_v41 = vmax.f32 %v4331_v13, %v4333_v40 }
0x390a   :  { %v4335_v49 = vrot.slane %v4334_v41, 4 }
0x390c   :  { %v4336_v57 = vmax.f32 %v4334_v41, %v4335_v49 }
0x390e   :  { %v4337_v17 = vrot.slane %v4336_v57, 2 }
0x3910   :  { %v4338_v7 = vmax.f32 %v4336_v57, %v4337_v17 }
0x3912   :  { %v4339_v27 = vrot.slane %v4338_v7, 1 }
0x3914   :  { %v4340_v58 = vmax.f32 %v4338_v7, %v4339_v27 }
0x3916   :  { %v4341_v6 = vsub.f32 %v4324_v4, %v4340_v58  ;;  %v4342_v39 = vsub.f32 %v4327_v8, %v4340_v58 }
0x3918   :  { %v4343_v51 = vmul.f32 1.442695, %v4341_v6  ;;  %v4345_v36 = vmul.f32 1.442695, %v4342_v39 }
0x391a   :  { %5703 = vpow2.f32 %v4343_v51 }
0x391b   :  { %5705 = vpow2.f32 %v4345_v36 }
0x3924   :  { %v5704_v56 = vpop.eup %5703 }
0x3925   :  { %v5706_v53 = vpop.eup %5705  ;;  %4398 = vperm.xlu0 %5442, %v5704_v56  }
0x3926   :  { %4403 = vperm.xlu1 %5443, %v5706_v53   ;;  %v4348_v33 = vpack.c.bf16 %v5706_v53, %v5704_v56 }
0x3928   :  { %v4354_v12 = vsel %vm686_vm8, %v4348_v33, 0 }
0x3929   :  { %5343 = vmatpush3.bf16.msra.mxu1 %v4354_v12 }
0x392a   :  { %5354 = vmatprep.subr.bf16.mxu1 %v6217_v2 }
0x392c   :  { %5345 = vmatmul.mubr.msk.bf16.vlgmr.msra.gmra.mrb[116].mxu1 %vm4349_vm6, %v4347_v34 }
0x392d   :  { %5362 = vmatprep.mubr.msk.bf16.mxu1 %vm6219_vm2, %v6217_v2  ;;  %5355 = vmatpush3.bf16.msra.mxu1 %v5547_v25  ;;  %vm4542_vm2 = vcmask 25600  }
0x392e   :  { %5356 = vmatprep.subr.bf16.mxu1 %v6217_v2 }
0x3931   :  { %5357 = vmatpush3.bf16.msra.mxu1 %v5548_v42 }
0x3932   :  { %5358 = vmatprep.subr.bf16.mxu1 %v6217_v2 }
0x3935   :  { %5359 = vmatpush3.bf16.msra.mxu1 %v5549_v35 }
0x3936   :  { %5360 = vmatprep.subr.bf16.mxu1 %v6217_v2 }
0x3939   :  { %5361 = vmatpush3.bf16.msra.mxu1 %v5550_v15 }
0x39a4   :  { %v4399_v23 = vpop.permute.xlu0 %4398 }
0x39a5   :  { %v4404_v50 = vpop.permute.xlu1 %4403  ;;  %v4406_v16 = vmul.f32 %v4399_v23, %v7368_v62  ;;  %v4755_v62 = vld [vmem:[#allocation30] ss:$0 sm:$0xff] }
0x39a6   :  { %v4407_v20 = vmul.f32 %v4404_v50, %v7366_v5 }
0x39a8   :  { %v4408_v19 = vpack.c.bf16 %v4407_v20, %v4406_v16 }
0x39aa   :  { %v4410_v54 = vsel %vm686_vm8, %v4408_v19, 0 }
0x39ab   :  { %5349 = vmatpush3.bf16.msra.mxu0 %v4410_v54 }
0x39ae   :  { %5351 = vmatmul.mubr.msk.bf16.vlgmr.msra.gmra.mrb[112].mxu0 %vm4349_vm6, %v4347_v34 }
0x39ff   :  { %v4390_v0 = vpop.f32.mrb[116].mxu1 }
0x3a00   :  { %4454 = vperm.xlu0 %5442, %v4390_v0   ;;  %v5346_v52 = vpop.f32.mrb[117].mxu1 }
0x3a01   :  { %v4393_v18 = vpop.f32.mrb[118].mxu1 }
0x3a02   :  { %v5347_v24 = vpop.f32.mrb[119].mxu1 }
0x3a7f   :  { %v4455_v38 = vpop.permute.xlu0 %4454 }
0x3a80   :  { %5707 = vrcp.f32 %v4455_v38 }
0x3a81   :  { %v4446_v45 = vpop.f32.mrb[112].mxu0 }
0x3a82   :  { %v5352_v60 = vpop.f32.mrb[113].mxu0 }
0x3a83   :  { %v4449_v63 = vpop.f32.mrb[114].mxu0 }
0x3a84   :  { %v5353_v9 = vpop.f32.mrb[115].mxu0 }
0x3a8a   :  { %v5708_v48 = vpop.eup %5707 }
0x3a8b   :  { %v4458_v32 = vmul.f32 %v5708_v48, %v4446_v45 }
0x3a8d   :  { %v4467_v5 = vpack.c.bf16 %v4458_v32, %v4458_v32 }
0x3a8f   :  { %5363 = vmatmul.mubr.msk.bf16.vlgmr.msra.gmra.mrb[120].mxu1 %vm1609_vm1, %v4467_v5 }
0x3b62   :  { %v4536_v61 = vpop.f32.mrb[120].mxu1 }
0x3b63   :  { %v4537_v43 = vadd.f32 %v4755_v62, %v4536_v61  ;;  %v5364_v2 = vpop.f32.mrb[121].mxu1 }
0x3b64   :  { %v4539_v14 = vpop.f32.mrb[122].mxu1 }
0x3b65   :  { %v5365_v3 = vpop.f32.mrb[123].mxu1  ;;  %4543 = vst.msk [vmem:[#allocation32] sm:$0x3] %vm4542_vm2, %v4537_v43 }
0x3b66   :  { %6117 = shalt.err (!%p6114_p8)
}
0x3b67   :  { %s6118_s10 = scalar_lea.hbm %s6452_s12, 32 }
0x3b68   :  { %p6119_p9 = scmp.ne.s32.totalorder %s6452_s12, %s6118_s10  ;;  %p6122_p10 = scmp.lt.u32.totalorder %s6118_s10, %s6452_s12 }
0x3b6a   :  { %p6124_p11 = pnand %p6122_p10, %p6119_p9 }
0x3b6c   :  { %6127 = shalt.err (!%p6124_p11)
}
0x3b6d   :  { %4553 = dma.vmem_to_hbm [thread:$0]  %s4551_s20, 32, %s6452_s12, [#allocation5]  }
0x3b6e   :  { %6148 = dma.done.wait [#allocation5], 32  }
0x3b6f   :  { %6149 = vsyncadd [#allocation5], 4294967264 }
0x3b70   :  { %4557 = vsyncpa [#allocation4], 1 }
0x3b71   :  { %4558 = vsyncpa [#allocation7], 1 }
0x3b72   :  { %4559 = vsyncpa [#allocation10], 1 }
0x3b73   :  { %4560 = vsyncpa [#allocation13], 1 }
0x3b74   :  { %4561 = vsyncpa [#allocation16], 1 }
0x3b75   :  { %4562 = vsyncpa [#allocation19], 1 }
0x3b76   :  { %4563 = vsyncpa [#allocation22], 1 }
0x3b77   :  { %4564 = vsyncpa [#allocation25], 1 }
0x3b78   :  { %4565 = vsyncpa [#allocation28], 1 }
0x3b79   :  { %4566 = vsyncpa [#allocation31], 1 }
0x3b7a   :  { %4567 = vsyncpa [#allocation5], 1 }

</bundles_post_ra>
